<compile_context>
chip_gen: v7x
topology: tpu7x:2x2x1
jax: 0.10.0
libtpu: 0.0.40
codegen_flags: <defaults>
</compile_context>

<pallas_src>
import functools

import jax
import jax.numpy as jnp
import numpy as np
from jax import lax
from jax.experimental import pallas as pl
from jax.experimental.pallas import tpu as pltpu

EPS = 1e-5                   # torch.nn.InstanceNorm2d default eps
MXU_DTYPE = jnp.bfloat16     # MXU operand precision (accumulation / stats stay f32)


def _round_up(x, m):
    return (x + m - 1) // m * m


def _vmem_limit_bytes():
    # ~3/4 of physical VMEM, capped at 100 MiB (48 MiB on v7x, 96 MiB on v5e/v6e).
    try:
        cap = pltpu.get_tpu_info().vmem_capacity_bytes
    except Exception:
        cap = 64 * 1024 * 1024
    return int(min(cap * 3 // 4, 100 * 1024 * 1024))


# ---------------------------------------------------------------------------
# Kernel: 3x3 conv (reflect pad baked into layout) + InstanceNorm
#         + optional ReLU + optional residual add.
# Grid = (N, phase, row_tile):
#   phase 0: conv -> resident f32 accumulator, streamed masked sum / ssq
#   phase 1: per-tile normalize (+ReLU) (+residual) + pipelined store
# ---------------------------------------------------------------------------
def _conv_in_kernel(*refs, ht, Wp, hw, use_act, add_residual):
    if add_residual:
        (x_ref, w_ref, mask_ref, res_ref, o_ref,
         acc_ref, sum_ref, ssq_ref, mean_ref, rstd_ref) = refs
    else:
        (x_ref, w_ref, mask_ref, o_ref,
         acc_ref, sum_ref, ssq_ref, mean_ref, rstd_ref) = refs
        res_ref = None

    p = pl.program_id(1)
    t = pl.program_id(2)
    rows = ht * Wp                      # flat rows handled per tile (row*Wp + col layout)

    # ---------------- phase 0: conv + streamed statistics ----------------
    @pl.when(p == 0)
    def _conv_phase():
        @pl.when(t == 0)
        def _init():
            sum_ref[...] = jnp.zeros_like(sum_ref)
            ssq_ref[...] = jnp.zeros_like(ssq_ref)

        astart = pl.multiple_of(t * rows, 8)

        # 9 accumulated MXU matmuls over aligned contiguous dy-slabs; the dx
        # column offset becomes a +-1 sublane roll of the f32 partial (XLU).
        for dx in (1, 0, 2):            # centre column first -> initialising store
            part = None
            for dy in range(3):
                s0 = pl.multiple_of((t * ht + dy) * Wp, 16)
                slab = x_ref[pl.ds(s0, rows), :]                        # bf16, aligned
                m = jnp.dot(slab, w_ref[3 * dy + dx],
                            preferred_element_type=jnp.float32)
                part = m if part is None else part + m
            if dx == 1:
                acc_ref[pl.ds(astart, rows), :] = part
            else:
                part = pltpu.roll(part, shift=(1 - dx) % rows, axis=0)
                acc_ref[pl.ds(astart, rows), :] += part

        # masked one-pass InstanceNorm statistics (mask zeroes pad columns).
        # (conv bias is omitted: it cancels exactly under affine-free InstanceNorm)
        y = acc_ref[pl.ds(astart, rows), :]
        msk = mask_ref[...]
        sum_ref[...] += jnp.sum(y * msk, axis=0, keepdims=True)
        ssq_ref[...] += jnp.sum(y * y * msk, axis=0, keepdims=True)

    # -------- phase 1: normalize (+act) (+residual) + per-tile store --------
    @pl.when(p == 1)
    def _finalize_phase():
        @pl.when(t == 0)
        def _stats():
            inv_hw = 1.0 / float(hw)
            mean = sum_ref[...] * inv_hw
            var = jnp.maximum(ssq_ref[...] * inv_hw - mean * mean, 0.0)
            mean_ref[...] = mean
            rstd_ref[...] = lax.rsqrt(var + EPS)

        astart = pl.multiple_of(t * rows, 8)
        out = (acc_ref[pl.ds(astart, rows), :] - mean_ref[...]) * rstd_ref[...]
        if use_act:
            out = jnp.maximum(out, 0.0)
        if add_residual:
            out = out + res_ref[...].astype(jnp.float32)
        o_ref[...] = out.astype(o_ref.dtype)


# ---------------------------------------------------------------------------
# pallas_call wrapper for one ConvGenBlock
# ---------------------------------------------------------------------------
def _conv_in_block(x_pad_flat, w_taps, mask, res_flat, *, H, W, Wp, ht,
                   use_act, add_residual, out_dtype):
    n, _, c = x_pad_flat.shape
    T = H // ht
    rows = ht * Wp

    kern = functools.partial(_conv_in_kernel, ht=ht, Wp=Wp, hw=H * W,
                             use_act=use_act, add_residual=add_residual)

    in_specs = [
        # whole reflect-padded image per n, flattened to ((H+2)*Wp, C); fetched once per n
        pl.BlockSpec((None, (H + 2) * Wp, c), lambda i, p, t: (i, 0, 0)),
        # 9 conv taps (Cin, Cout) bf16, resident
        pl.BlockSpec((9, c, c), lambda i, p, t: (0, 0, 0)),
        # column-validity mask for the InstanceNorm statistics, resident
        pl.BlockSpec((rows, 1), lambda i, p, t: (0, 0)),
    ]
    args = [x_pad_flat, w_taps, mask]
    if add_residual:
        # residual row tile (f32), fetched per tile during the finalize phase only
        in_specs.append(pl.BlockSpec((None, rows, c), lambda i, p, t: (i, p * t, 0)))
        args.append(res_flat)

    return pl.pallas_call(
        kern,
        out_shape=jax.ShapeDtypeStruct((n, H * Wp, c), out_dtype),
        grid_spec=pltpu.PrefetchScalarGridSpec(
            num_scalar_prefetch=0,
            grid=(n, 2, T),                       # (batch, phase, row tile)
            in_specs=in_specs,
            # output block index only advances during phase 1 -> no garbage writebacks
            out_specs=pl.BlockSpec((None, rows, c), lambda i, p, t: (i, p * t, 0)),
            scratch_shapes=[
                pltpu.VMEM((H * Wp, c), jnp.float32),   # resident conv output
                pltpu.VMEM((1, c), jnp.float32),        # running sum
                pltpu.VMEM((1, c), jnp.float32),        # running sum of squares
                pltpu.VMEM((1, c), jnp.float32),        # mean
                pltpu.VMEM((1, c), jnp.float32),        # rsqrt(var + eps)
            ],
        ),
        compiler_params=pltpu.CompilerParams(
            dimension_semantics=("parallel", "arbitrary", "arbitrary"),
            vmem_limit_bytes=_vmem_limit_bytes(),
        ),
    )(*args)


# ---------------------------------------------------------------------------
# Wrapper-side layout plumbing (reflect padding into the Wp-wide layout).
# Valid pixels always live at columns 1..W; columns 0 and W+1 hold the reflect
# pad, columns W+2..Wp-1 are zero filler for alignment.
# ---------------------------------------------------------------------------
def _pad_cols(x_nhwc, wp):
    n, h, w, c = x_nhwc.shape
    pieces = [x_nhwc[:, :, 1:2], x_nhwc, x_nhwc[:, :, w - 2:w - 1]]
    extra = wp - (w + 2)
    if extra:
        pieces.append(jnp.zeros((n, h, extra, c), x_nhwc.dtype))
    return jnp.concatenate(pieces, axis=2)


def _repad_cols(y_pad, w):
    # y_pad: (N, H, Wp, C) kernel output layout, valid pixels at columns 1..W.
    n, h, wp, c = y_pad.shape
    pieces = [y_pad[:, :, 2:3], y_pad[:, :, 1:w + 1], y_pad[:, :, w - 1:w]]
    extra = wp - (w + 2)
    if extra:
        pieces.append(jnp.zeros((n, h, extra, c), y_pad.dtype))
    return jnp.concatenate(pieces, axis=2)


def _pad_rows(x_col):
    return jnp.concatenate([x_col[:, 1:2], x_col, x_col[:, -2:-1]], axis=1)


def _weight_to_taps(w_oihw, dtype):
    # torch Conv2d weight (Cout, Cin, 3, 3) -> (9, Cin, Cout), tap index k = dy*3 + dx
    cout, cin, kh, kw = w_oihw.shape
    return jnp.transpose(w_oihw, (2, 3, 1, 0)).reshape(kh * kw, cin, cout).astype(dtype)


def _pick_tile_rows(h, wp):
    # Largest divisor of H keeping ~<=2K flat rows per tile, with >=2 tiles when possible.
    cap_rows = max(1, 2048 // wp)
    cap = min(cap_rows, max(1, h // 2))
    best = 1
    for d in range(1, h + 1):
        if h % d == 0 and d <= cap:
            best = d
    return best


# ---------------------------------------------------------------------------
# ResidualBlock forward: x + block(x)
# ---------------------------------------------------------------------------
@functools.partial(jax.jit, static_argnames=("tile_rows",))
def residual_block(x_nchw, w1, b1, w2, b2, tile_rows=None):
    # b1 / b2 are accepted for API fidelity but have no effect: the conv bias
    # cancels exactly under the affine-free InstanceNorm that follows each conv.
    del b1, b2
    n, c, h, w = x_nchw.shape
    Wp = _round_up(w + 2, 16)                 # 16 keeps bf16 sublane-packed loads aligned
    ht = tile_rows if tile_rows is not None else _pick_tile_rows(h, Wp)
    assert h % ht == 0, "tile_rows must divide H"
    rows = ht * Wp

    x_nhwc = jnp.transpose(x_nchw, (0, 2, 3, 1))

    # column reflect pad into the Wp-wide layout (valid pixels at columns 1..W)
    x_col = _pad_cols(x_nhwc, Wp)                                   # (N, H, Wp, C) f32
    x_in1 = _pad_rows(x_col).astype(MXU_DTYPE)                      # (N, H+2, Wp, C) bf16
    x_in1_flat = x_in1.reshape(n, (h + 2) * Wp, c)

    # column-validity mask for the InstanceNorm statistics (same for both blocks)
    col = np.arange(rows) % Wp
    mask = jnp.asarray(((col >= 1) & (col <= w)).astype(np.float32).reshape(rows, 1))

    w1t = _weight_to_taps(w1, MXU_DTYPE)
    w2t = _weight_to_taps(w2, MXU_DTYPE)

    # Block 1: conv3x3 (reflect) + InstanceNorm + ReLU, bf16 intermediate
    h1 = _conv_in_block(x_in1_flat, w1t, mask, None, H=h, W=w, Wp=Wp, ht=ht,
                        use_act=True, add_residual=False, out_dtype=MXU_DTYPE)

    # Block 2 input: re-apply reflect padding to the block-1 output (stays bf16)
    h1_img = h1.reshape(n, h, Wp, c)
    x_in2_flat = _pad_rows(_repad_cols(h1_img, w)).reshape(n, (h + 2) * Wp, c)

    # Block 2: conv3x3 (reflect) + InstanceNorm + in-kernel residual add (f32 residual)
    res_flat = x_col.reshape(n, h * Wp, c)
    out2 = _conv_in_block(x_in2_flat, w2t, mask, res_flat, H=h, W=w, Wp=Wp, ht=ht,
                          use_act=False, add_residual=True, out_dtype=x_nchw.dtype)

    out_img = out2.reshape(n, h, Wp, c)[:, :, 1:w + 1, :]
    return jnp.transpose(out_img, (0, 3, 1, 2))


# ---------------------------------------------------------------------------
# Pure-JAX reference (mirrors the PyTorch module) for correctness checking
# ---------------------------------------------------------------------------
def _reference(x, w1, b1, w2, b2, conv_dtype=jnp.float32):
    def conv(x_, wt, b):
        xp = jnp.pad(x_, ((0, 0), (0, 0), (1, 1), (1, 1)), mode="reflect")
        y = lax.conv_general_dilated(
            xp.astype(conv_dtype), wt.astype(conv_dtype),
            window_strides=(1, 1), padding="VALID",
            dimension_numbers=("NCHW", "OIHW", "NCHW"),
            preferred_element_type=jnp.float32)
        return y + b[None, :, None, None].astype(jnp.float32)

    def inorm(y):
        mean = y.mean(axis=(2, 3), keepdims=True)
        var = jnp.square(y - mean).mean(axis=(2, 3), keepdims=True)
        return (y - mean) * lax.rsqrt(var + EPS)

    h = jnp.maximum(inorm(conv(x, w1, b1)), 0.0)
    return x + inorm(conv(h, w2, b2))


if __name__ == "__main__":
    N, C, H, W = 2, 4, 16, 16

    key = jax.random.PRNGKey(0)
    kx, k1, k2, k3, k4 = jax.random.split(key, 5)

    x = jax.random.normal(kx, (N, C, H, W), dtype=jnp.float32)
    # Conv2d(channels, channels, kernel_size=3) parameter shapes
    w_scale = 1.0 / (C * 9) ** 0.5
    w1 = jax.random.normal(k1, (C, C, 3, 3), dtype=jnp.float32) * w_scale
    b1 = jax.random.normal(k2, (C,), dtype=jnp.float32) * w_scale
    w2 = jax.random.normal(k3, (C, C, 3, 3), dtype=jnp.float32) * w_scale
    b2 = jax.random.normal(k4, (C,), dtype=jnp.float32) * w_scale

    out = jax.block_until_ready(residual_block(x, w1, b1, w2, b2))
    assert out.shape == (N, C, H, W)
    assert bool(jnp.all(jnp.isfinite(out)))

    # Check vs. a reference using the kernel's bf16 MXU operand precision
    # (f32 accumulation / stats / residual), and a looser check vs. exact f32.
    ref_bf16 = _reference(x, w1, b1, w2, b2, conv_dtype=MXU_DTYPE)
    max_diff = float(jnp.max(jnp.abs(out - ref_bf16)))
    assert jnp.allclose(out, ref_bf16, atol=1e-2, rtol=1e-2), (
        f"mismatch vs bf16 reference (max abs diff {max_diff})")

    ref_f32 = _reference(x, w1, b1, w2, b2, conv_dtype=jnp.float32)
    assert jnp.allclose(out, ref_f32, atol=1e-1, rtol=1e-1), "mismatch vs f32 reference"

    print("KERNEL_OK")
</pallas_src>

<mosaic_0001>
module attributes {stable_mosaic.version = 11 : i64} {
  func.func @_conv_in_kernel(%arg0: i32, %arg1: i32, %arg2: i32, %arg3: memref<1x576x4xbf16, #tpu.memory_space<vmem>>, %arg4: memref<9x4x4xbf16, #tpu.memory_space<vmem>>, %arg5: memref<256x1xf32, #tpu.memory_space<vmem>>, %arg6: memref<1x256x4xbf16, #tpu.memory_space<vmem>>, %arg7: memref<512x4xf32, #tpu.memory_space<vmem>>, %arg8: memref<1x4xf32, #tpu.memory_space<vmem>>, %arg9: memref<1x4xf32, #tpu.memory_space<vmem>>, %arg10: memref<1x4xf32, #tpu.memory_space<vmem>>, %arg11: memref<1x4xf32, #tpu.memory_space<vmem>>) attributes {dimension_semantics = [#tpu.dimension_semantics<parallel>, #tpu.dimension_semantics<arbitrary>, #tpu.dimension_semantics<arbitrary>], iteration_bounds = array<i64: 2, 2, 2>, scalar_prefetch = 0 : i64, scratch_operands = 5 : i64, tpu.core_type = #tpu.core_type<tc>, window_params = [{transform_indices = @transform_0, window_bounds = array<i64: 1, 576, 4>}, {pipeline_mode = #tpu.pipeline_mode<synchronous>, transform_indices = @transform_1, window_bounds = array<i64: 9, 4, 4>}, {pipeline_mode = #tpu.pipeline_mode<synchronous>, transform_indices = @transform_2, window_bounds = array<i64: 256, 1>}, {transform_indices = @transform_3, window_bounds = array<i64: 1, 256, 4>}]} {
    %c0_i32 = arith.constant 0 : i32
    %0 = arith.cmpi eq, %arg1, %c0_i32 : i32
    %1 = arith.extui %0 : i1 to i32
    %c0_i32_0 = arith.constant 0 : i32
    %2 = arith.cmpi ne, %1, %c0_i32_0 : i32
    scf.if %2 {
      %c0_i32_2 = arith.constant 0 : i32
      %6 = arith.cmpi eq, %arg2, %c0_i32_2 : i32
      %7 = arith.extui %6 : i1 to i32
      %c0_i32_3 = arith.constant 0 : i32
      %8 = arith.cmpi ne, %7, %c0_i32_3 : i32
      scf.if %8 {
        %cst_91 = arith.constant 0.000000e+00 : f32
        %139 = vector.broadcast %cst_91 : f32 to vector<1x4xf32>
        %c0_92 = arith.constant 0 : index
        %c0_93 = arith.constant 0 : index
        %140 = vector.load %arg8[%c0_92, %c0_93] : memref<1x4xf32, #tpu.memory_space<vmem>>, vector<1x4xf32>
        tpu.vector_store %arg8[%c0_92, %c0_93], %139 {strides = array<i32>} : memref<1x4xf32, #tpu.memory_space<vmem>>, vector<1x4xf32>,
        %cst_94 = arith.constant 0.000000e+00 : f32
        %141 = vector.broadcast %cst_94 : f32 to vector<1x4xf32>
        %c0_95 = arith.constant 0 : index
        %c0_96 = arith.constant 0 : index
        %142 = vector.load %arg9[%c0_95, %c0_96] : memref<1x4xf32, #tpu.memory_space<vmem>>, vector<1x4xf32>
        tpu.vector_store %arg9[%c0_95, %c0_96], %141 {strides = array<i32>} : memref<1x4xf32, #tpu.memory_space<vmem>>, vector<1x4xf32>,
      } else {
      }
      %c256_i32 = arith.constant 256 : i32
      %9 = arith.muli %arg2, %c256_i32 : i32
      %10 = tpu.assume_multiple %9, 8 : i32
      %c8_i32 = arith.constant 8 : i32
      %11 = arith.muli %arg2, %c8_i32 : i32
      %c0_i32_4 = arith.constant 0 : i32
      %12 = arith.addi %11, %c0_i32_4 : i32
      %c32_i32 = arith.constant 32 : i32
      %13 = arith.muli %12, %c32_i32 : i32
      %14 = tpu.assume_multiple %13, 16 : i32
      %c0 = arith.constant 0 : index
      %15 = arith.index_cast %14 : i32 to index
      %c0_5 = arith.constant 0 : index
      %16 = vector.load %arg3[%c0, %15, %c0_5] : memref<1x576x4xbf16, #tpu.memory_space<vmem>>, vector<1x256x4xbf16>
      %17 = vector.shape_cast %16 : vector<1x256x4xbf16> to vector<256x4xbf16>
      %c1 = arith.constant 1 : index
      %c0_6 = arith.constant 0 : index
      %c0_7 = arith.constant 0 : index
      %18 = vector.load %arg4[%c1, %c0_6, %c0_7] : memref<9x4x4xbf16, #tpu.memory_space<vmem>>, vector<1x4x4xbf16>
      %19 = vector.shape_cast %18 : vector<1x4x4xbf16> to vector<4x4xbf16>
      %cst = arith.constant dense<0.000000e+00> : vector<256x4xf32>
      %20 = tpu.matmul %17, %19, %cst {dimension_numbers = #tpu.dot_dimension_numbers<[1], [0], [0], [1], [0, 0, 1, 1], [], []>} : vector<256x4xbf16>, vector<4x4xbf16>, vector<256x4xf32> -> vector<256x4xf32>
      %c8_i32_8 = arith.constant 8 : i32
      %21 = arith.muli %arg2, %c8_i32_8 : i32
      %c1_i32_9 = arith.constant 1 : i32
      %22 = arith.addi %21, %c1_i32_9 : i32
      %c32_i32_10 = arith.constant 32 : i32
      %23 = arith.muli %22, %c32_i32_10 : i32
      %24 = tpu.assume_multiple %23, 16 : i32
      %c0_11 = arith.constant 0 : index
      %25 = arith.index_cast %24 : i32 to index
      %c0_12 = arith.constant 0 : index
      %26 = vector.load %arg3[%c0_11, %25, %c0_12] : memref<1x576x4xbf16, #tpu.memory_space<vmem>>, vector<1x256x4xbf16>
      %27 = vector.shape_cast %26 : vector<1x256x4xbf16> to vector<256x4xbf16>
      %c4 = arith.constant 4 : index
      %c0_13 = arith.constant 0 : index
      %c0_14 = arith.constant 0 : index
      %28 = vector.load %arg4[%c4, %c0_13, %c0_14] : memref<9x4x4xbf16, #tpu.memory_space<vmem>>, vector<1x4x4xbf16>
      %29 = vector.shape_cast %28 : vector<1x4x4xbf16> to vector<4x4xbf16>
      %cst_15 = arith.constant dense<0.000000e+00> : vector<256x4xf32>
      %30 = tpu.matmul %27, %29, %cst_15 {dimension_numbers = #tpu.dot_dimension_numbers<[1], [0], [0], [1], [0, 0, 1, 1], [], []>} : vector<256x4xbf16>, vector<4x4xbf16>, vector<256x4xf32> -> vector<256x4xf32>
      %31 = arith.addf %20, %30 : vector<256x4xf32>
      %c8_i32_16 = arith.constant 8 : i32
      %32 = arith.muli %arg2, %c8_i32_16 : i32
      %c2_i32 = arith.constant 2 : i32
      %33 = arith.addi %32, %c2_i32 : i32
      %c32_i32_17 = arith.constant 32 : i32
      %34 = arith.muli %33, %c32_i32_17 : i32
      %35 = tpu.assume_multiple %34, 16 : i32
      %c0_18 = arith.constant 0 : index
      %36 = arith.index_cast %35 : i32 to index
      %c0_19 = arith.constant 0 : index
      %37 = vector.load %arg3[%c0_18, %36, %c0_19] : memref<1x576x4xbf16, #tpu.memory_space<vmem>>, vector<1x256x4xbf16>
      %38 = vector.shape_cast %37 : vector<1x256x4xbf16> to vector<256x4xbf16>
      %c7 = arith.constant 7 : index
      %c0_20 = arith.constant 0 : index
      %c0_21 = arith.constant 0 : index
      %39 = vector.load %arg4[%c7, %c0_20, %c0_21] : memref<9x4x4xbf16, #tpu.memory_space<vmem>>, vector<1x4x4xbf16>
      %40 = vector.shape_cast %39 : vector<1x4x4xbf16> to vector<4x4xbf16>
      %cst_22 = arith.constant dense<0.000000e+00> : vector<256x4xf32>
      %41 = tpu.matmul %38, %40, %cst_22 {dimension_numbers = #tpu.dot_dimension_numbers<[1], [0], [0], [1], [0, 0, 1, 1], [], []>} : vector<256x4xbf16>, vector<4x4xbf16>, vector<256x4xf32> -> vector<256x4xf32>
      %42 = arith.addf %31, %41 : vector<256x4xf32>
      %43 = arith.index_cast %10 : i32 to index
      %c0_23 = arith.constant 0 : index
      %44 = vector.load %arg7[%43, %c0_23] : memref<512x4xf32, #tpu.memory_space<vmem>>, vector<256x4xf32>
      tpu.vector_store %arg7[%43, %c0_23], %42 {strides = array<i32>} : memref<512x4xf32, #tpu.memory_space<vmem>>, vector<256x4xf32>,
      %c8_i32_24 = arith.constant 8 : i32
      %45 = arith.muli %arg2, %c8_i32_24 : i32
      %c0_i32_25 = arith.constant 0 : i32
      %46 = arith.addi %45, %c0_i32_25 : i32
      %c32_i32_26 = arith.constant 32 : i32
      %47 = arith.muli %46, %c32_i32_26 : i32
      %48 = tpu.assume_multiple %47, 16 : i32
      %c0_27 = arith.constant 0 : index
      %49 = arith.index_cast %48 : i32 to index
      %c0_28 = arith.constant 0 : index
      %50 = vector.load %arg3[%c0_27, %49, %c0_28] : memref<1x576x4xbf16, #tpu.memory_space<vmem>>, vector<1x256x4xbf16>
      %51 = vector.shape_cast %50 : vector<1x256x4xbf16> to vector<256x4xbf16>
      %c0_29 = arith.constant 0 : index
      %c0_30 = arith.constant 0 : index
      %c0_31 = arith.constant 0 : index
      %52 = vector.load %arg4[%c0_29, %c0_30, %c0_31] : memref<9x4x4xbf16, #tpu.memory_space<vmem>>, vector<1x4x4xbf16>
      %53 = vector.shape_cast %52 : vector<1x4x4xbf16> to vector<4x4xbf16>
      %cst_32 = arith.constant dense<0.000000e+00> : vector<256x4xf32>
      %54 = tpu.matmul %51, %53, %cst_32 {dimension_numbers = #tpu.dot_dimension_numbers<[1], [0], [0], [1], [0, 0, 1, 1], [], []>} : vector<256x4xbf16>, vector<4x4xbf16>, vector<256x4xf32> -> vector<256x4xf32>
      %c8_i32_33 = arith.constant 8 : i32
      %55 = arith.muli %arg2, %c8_i32_33 : i32
      %c1_i32_34 = arith.constant 1 : i32
      %56 = arith.addi %55, %c1_i32_34 : i32
      %c32_i32_35 = arith.constant 32 : i32
      %57 = arith.muli %56, %c32_i32_35 : i32
      %58 = tpu.assume_multiple %57, 16 : i32
      %c0_36 = arith.constant 0 : index
      %59 = arith.index_cast %58 : i32 to index
      %c0_37 = arith.constant 0 : index
      %60 = vector.load %arg3[%c0_36, %59, %c0_37] : memref<1x576x4xbf16, #tpu.memory_space<vmem>>, vector<1x256x4xbf16>
      %61 = vector.shape_cast %60 : vector<1x256x4xbf16> to vector<256x4xbf16>
      %c3 = arith.constant 3 : index
      %c0_38 = arith.constant 0 : index
      %c0_39 = arith.constant 0 : index
      %62 = vector.load %arg4[%c3, %c0_38, %c0_39] : memref<9x4x4xbf16, #tpu.memory_space<vmem>>, vector<1x4x4xbf16>
      %63 = vector.shape_cast %62 : vector<1x4x4xbf16> to vector<4x4xbf16>
      %cst_40 = arith.constant dense<0.000000e+00> : vector<256x4xf32>
      %64 = tpu.matmul %61, %63, %cst_40 {dimension_numbers = #tpu.dot_dimension_numbers<[1], [0], [0], [1], [0, 0, 1, 1], [], []>} : vector<256x4xbf16>, vector<4x4xbf16>, vector<256x4xf32> -> vector<256x4xf32>
      %65 = arith.addf %54, %64 : vector<256x4xf32>
      %c8_i32_41 = arith.constant 8 : i32
      %66 = arith.muli %arg2, %c8_i32_41 : i32
      %c2_i32_42 = arith.constant 2 : i32
      %67 = arith.addi %66, %c2_i32_42 : i32
      %c32_i32_43 = arith.constant 32 : i32
      %68 = arith.muli %67, %c32_i32_43 : i32
      %69 = tpu.assume_multiple %68, 16 : i32
      %c0_44 = arith.constant 0 : index
      %70 = arith.index_cast %69 : i32 to index
      %c0_45 = arith.constant 0 : index
      %71 = vector.load %arg3[%c0_44, %70, %c0_45] : memref<1x576x4xbf16, #tpu.memory_space<vmem>>, vector<1x256x4xbf16>
      %72 = vector.shape_cast %71 : vector<1x256x4xbf16> to vector<256x4xbf16>
      %c6 = arith.constant 6 : index
      %c0_46 = arith.constant 0 : index
      %c0_47 = arith.constant 0 : index
      %73 = vector.load %arg4[%c6, %c0_46, %c0_47] : memref<9x4x4xbf16, #tpu.memory_space<vmem>>, vector<1x4x4xbf16>
      %74 = vector.shape_cast %73 : vector<1x4x4xbf16> to vector<4x4xbf16>
      %cst_48 = arith.constant dense<0.000000e+00> : vector<256x4xf32>
      %75 = tpu.matmul %72, %74, %cst_48 {dimension_numbers = #tpu.dot_dimension_numbers<[1], [0], [0], [1], [0, 0, 1, 1], [], []>} : vector<256x4xbf16>, vector<4x4xbf16>, vector<256x4xf32> -> vector<256x4xf32>
      %76 = arith.addf %65, %75 : vector<256x4xf32>
      %c1_i32_49 = arith.constant 1 : i32
      %77 = tpu.dynamic_rotate %76 by %c1_i32_49 dim 0 : vector<256x4xf32>, i32 -> vector<256x4xf32>
      %78 = arith.index_cast %10 : i32 to index
      %c0_50 = arith.constant 0 : index
      %79 = vector.load %arg7[%78, %c0_50] : memref<512x4xf32, #tpu.memory_space<vmem>>, vector<256x4xf32>
      %80 = arith.addf %79, %77 : vector<256x4xf32>
      %81 = arith.index_cast %10 : i32 to index
      %c0_51 = arith.constant 0 : index
      %82 = vector.load %arg7[%81, %c0_51] : memref<512x4xf32, #tpu.memory_space<vmem>>, vector<256x4xf32>
      tpu.vector_store %arg7[%81, %c0_51], %80 {strides = array<i32>} : memref<512x4xf32, #tpu.memory_space<vmem>>, vector<256x4xf32>,
      %c8_i32_52 = arith.constant 8 : i32
      %83 = arith.muli %arg2, %c8_i32_52 : i32
      %c0_i32_53 = arith.constant 0 : i32
      %84 = arith.addi %83, %c0_i32_53 : i32
      %c32_i32_54 = arith.constant 32 : i32
      %85 = arith.muli %84, %c32_i32_54 : i32
      %86 = tpu.assume_multiple %85, 16 : i32
      %c0_55 = arith.constant 0 : index
      %87 = arith.index_cast %86 : i32 to index
      %c0_56 = arith.constant 0 : index
      %88 = vector.load %arg3[%c0_55, %87, %c0_56] : memref<1x576x4xbf16, #tpu.memory_space<vmem>>, vector<1x256x4xbf16>
      %89 = vector.shape_cast %88 : vector<1x256x4xbf16> to vector<256x4xbf16>
      %c2 = arith.constant 2 : index
      %c0_57 = arith.constant 0 : index
      %c0_58 = arith.constant 0 : index
      %90 = vector.load %arg4[%c2, %c0_57, %c0_58] : memref<9x4x4xbf16, #tpu.memory_space<vmem>>, vector<1x4x4xbf16>
      %91 = vector.shape_cast %90 : vector<1x4x4xbf16> to vector<4x4xbf16>
      %cst_59 = arith.constant dense<0.000000e+00> : vector<256x4xf32>
      %92 = tpu.matmul %89, %91, %cst_59 {dimension_numbers = #tpu.dot_dimension_numbers<[1], [0], [0], [1], [0, 0, 1, 1], [], []>} : vector<256x4xbf16>, vector<4x4xbf16>, vector<256x4xf32> -> vector<256x4xf32>
      %c8_i32_60 = arith.constant 8 : i32
      %93 = arith.muli %arg2, %c8_i32_60 : i32
      %c1_i32_61 = arith.constant 1 : i32
      %94 = arith.addi %93, %c1_i32_61 : i32
      %c32_i32_62 = arith.constant 32 : i32
      %95 = arith.muli %94, %c32_i32_62 : i32
      %96 = tpu.assume_multiple %95, 16 : i32
      %c0_63 = arith.constant 0 : index
      %97 = arith.index_cast %96 : i32 to index
      %c0_64 = arith.constant 0 : index
      %98 = vector.load %arg3[%c0_63, %97, %c0_64] : memref<1x576x4xbf16, #tpu.memory_space<vmem>>, vector<1x256x4xbf16>
      %99 = vector.shape_cast %98 : vector<1x256x4xbf16> to vector<256x4xbf16>
      %c5 = arith.constant 5 : index
      %c0_65 = arith.constant 0 : index
      %c0_66 = arith.constant 0 : index
      %100 = vector.load %arg4[%c5, %c0_65, %c0_66] : memref<9x4x4xbf16, #tpu.memory_space<vmem>>, vector<1x4x4xbf16>
      %101 = vector.shape_cast %100 : vector<1x4x4xbf16> to vector<4x4xbf16>
      %cst_67 = arith.constant dense<0.000000e+00> : vector<256x4xf32>
      %102 = tpu.matmul %99, %101, %cst_67 {dimension_numbers = #tpu.dot_dimension_numbers<[1], [0], [0], [1], [0, 0, 1, 1], [], []>} : vector<256x4xbf16>, vector<4x4xbf16>, vector<256x4xf32> -> vector<256x4xf32>
      %103 = arith.addf %92, %102 : vector<256x4xf32>
      %c8_i32_68 = arith.constant 8 : i32
      %104 = arith.muli %arg2, %c8_i32_68 : i32
      %c2_i32_69 = arith.constant 2 : i32
      %105 = arith.addi %104, %c2_i32_69 : i32
      %c32_i32_70 = arith.constant 32 : i32
      %106 = arith.muli %105, %c32_i32_70 : i32
      %107 = tpu.assume_multiple %106, 16 : i32
      %c0_71 = arith.constant 0 : index
      %108 = arith.index_cast %107 : i32 to index
      %c0_72 = arith.constant 0 : index
      %109 = vector.load %arg3[%c0_71, %108, %c0_72] : memref<1x576x4xbf16, #tpu.memory_space<vmem>>, vector<1x256x4xbf16>
      %110 = vector.shape_cast %109 : vector<1x256x4xbf16> to vector<256x4xbf16>
      %c8 = arith.constant 8 : index
      %c0_73 = arith.constant 0 : index
      %c0_74 = arith.constant 0 : index
      %111 = vector.load %arg4[%c8, %c0_73, %c0_74] : memref<9x4x4xbf16, #tpu.memory_space<vmem>>, vector<1x4x4xbf16>
      %112 = vector.shape_cast %111 : vector<1x4x4xbf16> to vector<4x4xbf16>
      %cst_75 = arith.constant dense<0.000000e+00> : vector<256x4xf32>
      %113 = tpu.matmul %110, %112, %cst_75 {dimension_numbers = #tpu.dot_dimension_numbers<[1], [0], [0], [1], [0, 0, 1, 1], [], []>} : vector<256x4xbf16>, vector<4x4xbf16>, vector<256x4xf32> -> vector<256x4xf32>
      %114 = arith.addf %103, %113 : vector<256x4xf32>
      %c255_i32 = arith.constant 255 : i32
      %115 = tpu.dynamic_rotate %114 by %c255_i32 dim 0 : vector<256x4xf32>, i32 -> vector<256x4xf32>
      %116 = arith.index_cast %10 : i32 to index
      %c0_76 = arith.constant 0 : index
      %117 = vector.load %arg7[%116, %c0_76] : memref<512x4xf32, #tpu.memory_space<vmem>>, vector<256x4xf32>
      %118 = arith.addf %117, %115 : vector<256x4xf32>
      %119 = arith.index_cast %10 : i32 to index
      %c0_77 = arith.constant 0 : index
      %120 = vector.load %arg7[%119, %c0_77] : memref<512x4xf32, #tpu.memory_space<vmem>>, vector<256x4xf32>
      tpu.vector_store %arg7[%119, %c0_77], %118 {strides = array<i32>} : memref<512x4xf32, #tpu.memory_space<vmem>>, vector<256x4xf32>,
      %121 = arith.index_cast %10 : i32 to index
      %c0_78 = arith.constant 0 : index
      %122 = vector.load %arg7[%121, %c0_78] : memref<512x4xf32, #tpu.memory_space<vmem>>, vector<256x4xf32>
      %c0_79 = arith.constant 0 : index
      %c0_80 = arith.constant 0 : index
      %123 = vector.load %arg5[%c0_79, %c0_80] : memref<256x1xf32, #tpu.memory_space<vmem>>, vector<256x1xf32>
      %c0_81 = arith.constant 0 : index
      %c0_82 = arith.constant 0 : index
      %124 = vector.load %arg8[%c0_81, %c0_82] : memref<1x4xf32, #tpu.memory_space<vmem>>, vector<1x4xf32>
      %125 = vector.broadcast %123 : vector<256x1xf32> to vector<256x4xf32>
      %126 = arith.mulf %122, %125 : vector<256x4xf32>
      %cst_83 = arith.constant dense<0.000000e+00> : vector<4xf32>
      %127 = vector.multi_reduction <add>, %126, %cst_83 [0] : vector<256x4xf32> to vector<4xf32>
      %128 = vector.shape_cast %127 : vector<4xf32> to vector<1x4xf32>
      %129 = arith.addf %124, %128 : vector<1x4xf32>
      %c0_84 = arith.constant 0 : index
      %c0_85 = arith.constant 0 : index
      %130 = vector.load %arg8[%c0_84, %c0_85] : memref<1x4xf32, #tpu.memory_space<vmem>>, vector<1x4xf32>
      tpu.vector_store %arg8[%c0_84, %c0_85], %129 {strides = array<i32>} : memref<1x4xf32, #tpu.memory_space<vmem>>, vector<1x4xf32>,
      %c0_86 = arith.constant 0 : index
      %c0_87 = arith.constant 0 : index
      %131 = vector.load %arg9[%c0_86, %c0_87] : memref<1x4xf32, #tpu.memory_space<vmem>>, vector<1x4xf32>
      %132 = arith.mulf %122, %122 : vector<256x4xf32>
      %133 = vector.broadcast %123 : vector<256x1xf32> to vector<256x4xf32>
      %134 = arith.mulf %132, %133 : vector<256x4xf32>
      %cst_88 = arith.constant dense<0.000000e+00> : vector<4xf32>
      %135 = vector.multi_reduction <add>, %134, %cst_88 [0] : vector<256x4xf32> to vector<4xf32>
      %136 = vector.shape_cast %135 : vector<4xf32> to vector<1x4xf32>
      %137 = arith.addf %131, %136 : vector<1x4xf32>
      %c0_89 = arith.constant 0 : index
      %c0_90 = arith.constant 0 : index
      %138 = vector.load %arg9[%c0_89, %c0_90] : memref<1x4xf32, #tpu.memory_space<vmem>>, vector<1x4xf32>
      tpu.vector_store %arg9[%c0_89, %c0_90], %137 {strides = array<i32>} : memref<1x4xf32, #tpu.memory_space<vmem>>, vector<1x4xf32>,
    } else {
    }
    %c1_i32 = arith.constant 1 : i32
    %3 = arith.cmpi eq, %arg1, %c1_i32 : i32
    %4 = arith.extui %3 : i1 to i32
    %c0_i32_1 = arith.constant 0 : i32
    %5 = arith.cmpi ne, %4, %c0_i32_1 : i32
    scf.if %5 {
      %c0_i32_2 = arith.constant 0 : i32
      %6 = arith.cmpi eq, %arg2, %c0_i32_2 : i32
      %7 = arith.extui %6 : i1 to i32
      %c0_i32_3 = arith.constant 0 : i32
      %8 = arith.cmpi ne, %7, %c0_i32_3 : i32
      scf.if %8 {
        %c0_11 = arith.constant 0 : index
        %c0_12 = arith.constant 0 : index
        %25 = vector.load %arg8[%c0_11, %c0_12] : memref<1x4xf32, #tpu.memory_space<vmem>>, vector<1x4xf32>
        %cst_13 = arith.constant 3.906250e-03 : f32
        %26 = vector.broadcast %cst_13 : f32 to vector<1x4xf32>
        %27 = arith.mulf %25, %26 : vector<1x4xf32>
        %c0_14 = arith.constant 0 : index
        %c0_15 = arith.constant 0 : index
        %28 = vector.load %arg9[%c0_14, %c0_15] : memref<1x4xf32, #tpu.memory_space<vmem>>, vector<1x4xf32>
        %cst_16 = arith.constant 3.906250e-03 : f32
        %29 = vector.broadcast %cst_16 : f32 to vector<1x4xf32>
        %30 = arith.mulf %28, %29 : vector<1x4xf32>
        %31 = arith.mulf %27, %27 : vector<1x4xf32>
        %32 = arith.subf %30, %31 : vector<1x4xf32>
        %cst_17 = arith.constant 0.000000e+00 : f32
        %33 = vector.broadcast %cst_17 : f32 to vector<1x4xf32>
        %34 = arith.maximumf %32, %33 : vector<1x4xf32>
        %c0_18 = arith.constant 0 : index
        %c0_19 = arith.constant 0 : index
        %35 = vector.load %arg10[%c0_18, %c0_19] : memref<1x4xf32, #tpu.memory_space<vmem>>, vector<1x4xf32>
        tpu.vector_store %arg10[%c0_18, %c0_19], %27 {strides = array<i32>} : memref<1x4xf32, #tpu.memory_space<vmem>>, vector<1x4xf32>,
        %cst_20 = arith.constant 9.99999974E-6 : f32
        %36 = vector.broadcast %cst_20 : f32 to vector<1x4xf32>
        %37 = arith.addf %34, %36 : vector<1x4xf32>
        %38 = math.rsqrt %37 : vector<1x4xf32>
        %c0_21 = arith.constant 0 : index
        %c0_22 = arith.constant 0 : index
        %39 = vector.load %arg11[%c0_21, %c0_22] : memref<1x4xf32, #tpu.memory_space<vmem>>, vector<1x4xf32>
        tpu.vector_store %arg11[%c0_21, %c0_22], %38 {strides = array<i32>} : memref<1x4xf32, #tpu.memory_space<vmem>>, vector<1x4xf32>,
      } else {
      }
      %c256_i32 = arith.constant 256 : i32
      %9 = arith.muli %arg2, %c256_i32 : i32
      %10 = tpu.assume_multiple %9, 8 : i32
      %11 = arith.index_cast %10 : i32 to index
      %c0 = arith.constant 0 : index
      %12 = vector.load %arg7[%11, %c0] : memref<512x4xf32, #tpu.memory_space<vmem>>, vector<256x4xf32>
      %c0_4 = arith.constant 0 : index
      %c0_5 = arith.constant 0 : index
      %13 = vector.load %arg10[%c0_4, %c0_5] : memref<1x4xf32, #tpu.memory_space<vmem>>, vector<1x4xf32>
      %14 = vector.broadcast %13 : vector<1x4xf32> to vector<256x4xf32>
      %15 = arith.subf %12, %14 : vector<256x4xf32>
      %c0_6 = arith.constant 0 : index
      %c0_7 = arith.constant 0 : index
      %16 = vector.load %arg11[%c0_6, %c0_7] : memref<1x4xf32, #tpu.memory_space<vmem>>, vector<1x4xf32>
      %17 = vector.broadcast %16 : vector<1x4xf32> to vector<256x4xf32>
      %18 = arith.mulf %15, %17 : vector<256x4xf32>
      %cst = arith.constant 0.000000e+00 : f32
      %19 = vector.broadcast %cst : f32 to vector<256x4xf32>
      %20 = arith.maximumf %18, %19 : vector<256x4xf32>
      %21 = arith.truncf %20 : vector<256x4xf32> to vector<256x4xbf16>
      %c0_8 = arith.constant 0 : index
      %c0_9 = arith.constant 0 : index
      %c0_10 = arith.constant 0 : index
      %22 = vector.load %arg6[%c0_8, %c0_9, %c0_10] : memref<1x256x4xbf16, #tpu.memory_space<vmem>>, vector<1x256x4xbf16>
      %23 = vector.shape_cast %22 : vector<1x256x4xbf16> to vector<256x4xbf16>
      %24 = vector.shape_cast %21 : vector<256x4xbf16> to vector<1x256x4xbf16>
      tpu.vector_store %arg6[%c0_8, %c0_9, %c0_10], %24 {strides = array<i32>} : memref<1x256x4xbf16, #tpu.memory_space<vmem>>, vector<1x256x4xbf16>,
    } else {
    }
    return
  }
  func.func @transform_0(%arg0: i32, %arg1: i32, %arg2: i32) -> (i32, i32, i32) {
    %c0_i32 = arith.constant 0 : i32
    %c0_i32_0 = arith.constant 0 : i32
    %c0_i32_1 = arith.constant 0 : i32
    return %arg0, %c0_i32, %c0_i32_0 : i32, i32, i32
  }
  func.func @transform_1(%arg0: i32, %arg1: i32, %arg2: i32) -> (i32, i32, i32) {
    %c0_i32 = arith.constant 0 : i32
    %c0_i32_0 = arith.constant 0 : i32
    %c0_i32_1 = arith.constant 0 : i32
    %c0_i32_2 = arith.constant 0 : i32
    return %c0_i32, %c0_i32_0, %c0_i32_1 : i32, i32, i32
  }
  func.func @transform_2(%arg0: i32, %arg1: i32, %arg2: i32) -> (i32, i32) {
    %c0_i32 = arith.constant 0 : i32
    %c0_i32_0 = arith.constant 0 : i32
    %c0_i32_1 = arith.constant 0 : i32
    return %c0_i32, %c0_i32_0 : i32, i32
  }
  func.func @transform_3(%arg0: i32, %arg1: i32, %arg2: i32) -> (i32, i32, i32) {
    %0 = arith.muli %arg1, %arg2 : i32
    %c0_i32 = arith.constant 0 : i32
    %c0_i32_0 = arith.constant 0 : i32
    return %arg0, %0, %c0_i32 : i32, i32, i32
  }
}

module attributes {stable_mosaic.version = 11 : i64} {
  func.func @_conv_in_kernel(%arg0: i32, %arg1: i32, %arg2: i32, %arg3: memref<1x576x4xbf16, #tpu.memory_space<vmem>>, %arg4: memref<9x4x4xbf16, #tpu.memory_space<vmem>>, %arg5: memref<256x1xf32, #tpu.memory_space<vmem>>, %arg6: memref<1x256x4xf32, #tpu.memory_space<vmem>>, %arg7: memref<1x256x4xf32, #tpu.memory_space<vmem>>, %arg8: memref<512x4xf32, #tpu.memory_space<vmem>>, %arg9: memref<1x4xf32, #tpu.memory_space<vmem>>, %arg10: memref<1x4xf32, #tpu.memory_space<vmem>>, %arg11: memref<1x4xf32, #tpu.memory_space<vmem>>, %arg12: memref<1x4xf32, #tpu.memory_space<vmem>>) attributes {dimension_semantics = [#tpu.dimension_semantics<parallel>, #tpu.dimension_semantics<arbitrary>, #tpu.dimension_semantics<arbitrary>], iteration_bounds = array<i64: 2, 2, 2>, scalar_prefetch = 0 : i64, scratch_operands = 5 : i64, tpu.core_type = #tpu.core_type<tc>, window_params = [{transform_indices = @transform_0, window_bounds = array<i64: 1, 576, 4>}, {pipeline_mode = #tpu.pipeline_mode<synchronous>, transform_indices = @transform_1, window_bounds = array<i64: 9, 4, 4>}, {pipeline_mode = #tpu.pipeline_mode<synchronous>, transform_indices = @transform_2, window_bounds = array<i64: 256, 1>}, {transform_indices = @transform_3, window_bounds = array<i64: 1, 256, 4>}, {transform_indices = @transform_4, window_bounds = array<i64: 1, 256, 4>}]} {
    %c0_i32 = arith.constant 0 : i32
    %0 = arith.cmpi eq, %arg1, %c0_i32 : i32
    %1 = arith.extui %0 : i1 to i32
    %c0_i32_0 = arith.constant 0 : i32
    %2 = arith.cmpi ne, %1, %c0_i32_0 : i32
    scf.if %2 {
      %c0_i32_2 = arith.constant 0 : i32
      %6 = arith.cmpi eq, %arg2, %c0_i32_2 : i32
      %7 = arith.extui %6 : i1 to i32
      %c0_i32_3 = arith.constant 0 : i32
      %8 = arith.cmpi ne, %7, %c0_i32_3 : i32
      scf.if %8 {
        %cst_91 = arith.constant 0.000000e+00 : f32
        %139 = vector.broadcast %cst_91 : f32 to vector<1x4xf32>
        %c0_92 = arith.constant 0 : index
        %c0_93 = arith.constant 0 : index
        %140 = vector.load %arg9[%c0_92, %c0_93] : memref<1x4xf32, #tpu.memory_space<vmem>>, vector<1x4xf32>
        tpu.vector_store %arg9[%c0_92, %c0_93], %139 {strides = array<i32>} : memref<1x4xf32, #tpu.memory_space<vmem>>, vector<1x4xf32>,
        %cst_94 = arith.constant 0.000000e+00 : f32
        %141 = vector.broadcast %cst_94 : f32 to vector<1x4xf32>
        %c0_95 = arith.constant 0 : index
        %c0_96 = arith.constant 0 : index
        %142 = vector.load %arg10[%c0_95, %c0_96] : memref<1x4xf32, #tpu.memory_space<vmem>>, vector<1x4xf32>
        tpu.vector_store %arg10[%c0_95, %c0_96], %141 {strides = array<i32>} : memref<1x4xf32, #tpu.memory_space<vmem>>, vector<1x4xf32>,
      } else {
      }
      %c256_i32 = arith.constant 256 : i32
      %9 = arith.muli %arg2, %c256_i32 : i32
      %10 = tpu.assume_multiple %9, 8 : i32
      %c8_i32 = arith.constant 8 : i32
      %11 = arith.muli %arg2, %c8_i32 : i32
      %c0_i32_4 = arith.constant 0 : i32
      %12 = arith.addi %11, %c0_i32_4 : i32
      %c32_i32 = arith.constant 32 : i32
      %13 = arith.muli %12, %c32_i32 : i32
      %14 = tpu.assume_multiple %13, 16 : i32
      %c0 = arith.constant 0 : index
      %15 = arith.index_cast %14 : i32 to index
      %c0_5 = arith.constant 0 : index
      %16 = vector.load %arg3[%c0, %15, %c0_5] : memref<1x576x4xbf16, #tpu.memory_space<vmem>>, vector<1x256x4xbf16>
      %17 = vector.shape_cast %16 : vector<1x256x4xbf16> to vector<256x4xbf16>
      %c1 = arith.constant 1 : index
      %c0_6 = arith.constant 0 : index
      %c0_7 = arith.constant 0 : index
      %18 = vector.load %arg4[%c1, %c0_6, %c0_7] : memref<9x4x4xbf16, #tpu.memory_space<vmem>>, vector<1x4x4xbf16>
      %19 = vector.shape_cast %18 : vector<1x4x4xbf16> to vector<4x4xbf16>
      %cst = arith.constant dense<0.000000e+00> : vector<256x4xf32>
      %20 = tpu.matmul %17, %19, %cst {dimension_numbers = #tpu.dot_dimension_numbers<[1], [0], [0], [1], [0, 0, 1, 1], [], []>} : vector<256x4xbf16>, vector<4x4xbf16>, vector<256x4xf32> -> vector<256x4xf32>
      %c8_i32_8 = arith.constant 8 : i32
      %21 = arith.muli %arg2, %c8_i32_8 : i32
      %c1_i32_9 = arith.constant 1 : i32
      %22 = arith.addi %21, %c1_i32_9 : i32
      %c32_i32_10 = arith.constant 32 : i32
      %23 = arith.muli %22, %c32_i32_10 : i32
      %24 = tpu.assume_multiple %23, 16 : i32
      %c0_11 = arith.constant 0 : index
      %25 = arith.index_cast %24 : i32 to index
      %c0_12 = arith.constant 0 : index
      %26 = vector.load %arg3[%c0_11, %25, %c0_12] : memref<1x576x4xbf16, #tpu.memory_space<vmem>>, vector<1x256x4xbf16>
      %27 = vector.shape_cast %26 : vector<1x256x4xbf16> to vector<256x4xbf16>
      %c4 = arith.constant 4 : index
      %c0_13 = arith.constant 0 : index
      %c0_14 = arith.constant 0 : index
      %28 = vector.load %arg4[%c4, %c0_13, %c0_14] : memref<9x4x4xbf16, #tpu.memory_space<vmem>>, vector<1x4x4xbf16>
      %29 = vector.shape_cast %28 : vector<1x4x4xbf16> to vector<4x4xbf16>
      %cst_15 = arith.constant dense<0.000000e+00> : vector<256x4xf32>
      %30 = tpu.matmul %27, %29, %cst_15 {dimension_numbers = #tpu.dot_dimension_numbers<[1], [0], [0], [1], [0, 0, 1, 1], [], []>} : vector<256x4xbf16>, vector<4x4xbf16>, vector<256x4xf32> -> vector<256x4xf32>
      %31 = arith.addf %20, %30 : vector<256x4xf32>
      %c8_i32_16 = arith.constant 8 : i32
      %32 = arith.muli %arg2, %c8_i32_16 : i32
      %c2_i32 = arith.constant 2 : i32
      %33 = arith.addi %32, %c2_i32 : i32
      %c32_i32_17 = arith.constant 32 : i32
      %34 = arith.muli %33, %c32_i32_17 : i32
      %35 = tpu.assume_multiple %34, 16 : i32
      %c0_18 = arith.constant 0 : index
      %36 = arith.index_cast %35 : i32 to index
      %c0_19 = arith.constant 0 : index
      %37 = vector.load %arg3[%c0_18, %36, %c0_19] : memref<1x576x4xbf16, #tpu.memory_space<vmem>>, vector<1x256x4xbf16>
      %38 = vector.shape_cast %37 : vector<1x256x4xbf16> to vector<256x4xbf16>
      %c7 = arith.constant 7 : index
      %c0_20 = arith.constant 0 : index
      %c0_21 = arith.constant 0 : index
      %39 = vector.load %arg4[%c7, %c0_20, %c0_21] : memref<9x4x4xbf16, #tpu.memory_space<vmem>>, vector<1x4x4xbf16>
      %40 = vector.shape_cast %39 : vector<1x4x4xbf16> to vector<4x4xbf16>
      %cst_22 = arith.constant dense<0.000000e+00> : vector<256x4xf32>
      %41 = tpu.matmul %38, %40, %cst_22 {dimension_numbers = #tpu.dot_dimension_numbers<[1], [0], [0], [1], [0, 0, 1, 1], [], []>} : vector<256x4xbf16>, vector<4x4xbf16>, vector<256x4xf32> -> vector<256x4xf32>
      %42 = arith.addf %31, %41 : vector<256x4xf32>
      %43 = arith.index_cast %10 : i32 to index
      %c0_23 = arith.constant 0 : index
      %44 = vector.load %arg8[%43, %c0_23] : memref<512x4xf32, #tpu.memory_space<vmem>>, vector<256x4xf32>
      tpu.vector_store %arg8[%43, %c0_23], %42 {strides = array<i32>} : memref<512x4xf32, #tpu.memory_space<vmem>>, vector<256x4xf32>,
      %c8_i32_24 = arith.constant 8 : i32
      %45 = arith.muli %arg2, %c8_i32_24 : i32
      %c0_i32_25 = arith.constant 0 : i32
      %46 = arith.addi %45, %c0_i32_25 : i32
      %c32_i32_26 = arith.constant 32 : i32
      %47 = arith.muli %46, %c32_i32_26 : i32
      %48 = tpu.assume_multiple %47, 16 : i32
      %c0_27 = arith.constant 0 : index
      %49 = arith.index_cast %48 : i32 to index
      %c0_28 = arith.constant 0 : index
      %50 = vector.load %arg3[%c0_27, %49, %c0_28] : memref<1x576x4xbf16, #tpu.memory_space<vmem>>, vector<1x256x4xbf16>
      %51 = vector.shape_cast %50 : vector<1x256x4xbf16> to vector<256x4xbf16>
      %c0_29 = arith.constant 0 : index
      %c0_30 = arith.constant 0 : index
      %c0_31 = arith.constant 0 : index
      %52 = vector.load %arg4[%c0_29, %c0_30, %c0_31] : memref<9x4x4xbf16, #tpu.memory_space<vmem>>, vector<1x4x4xbf16>
      %53 = vector.shape_cast %52 : vector<1x4x4xbf16> to vector<4x4xbf16>
      %cst_32 = arith.constant dense<0.000000e+00> : vector<256x4xf32>
      %54 = tpu.matmul %51, %53, %cst_32 {dimension_numbers = #tpu.dot_dimension_numbers<[1], [0], [0], [1], [0, 0, 1, 1], [], []>} : vector<256x4xbf16>, vector<4x4xbf16>, vector<256x4xf32> -> vector<256x4xf32>
      %c8_i32_33 = arith.constant 8 : i32
      %55 = arith.muli %arg2, %c8_i32_33 : i32
      %c1_i32_34 = arith.constant 1 : i32
      %56 = arith.addi %55, %c1_i32_34 : i32
      %c32_i32_35 = arith.constant 32 : i32
      %57 = arith.muli %56, %c32_i32_35 : i32
      %58 = tpu.assume_multiple %57, 16 : i32
      %c0_36 = arith.constant 0 : index
      %59 = arith.index_cast %58 : i32 to index
      %c0_37 = arith.constant 0 : index
      %60 = vector.load %arg3[%c0_36, %59, %c0_37] : memref<1x576x4xbf16, #tpu.memory_space<vmem>>, vector<1x256x4xbf16>
      %61 = vector.shape_cast %60 : vector<1x256x4xbf16> to vector<256x4xbf16>
      %c3 = arith.constant 3 : index
      %c0_38 = arith.constant 0 : index
      %c0_39 = arith.constant 0 : index
      %62 = vector.load %arg4[%c3, %c0_38, %c0_39] : memref<9x4x4xbf16, #tpu.memory_space<vmem>>, vector<1x4x4xbf16>
      %63 = vector.shape_cast %62 : vector<1x4x4xbf16> to vector<4x4xbf16>
      %cst_40 = arith.constant dense<0.000000e+00> : vector<256x4xf32>
      %64 = tpu.matmul %61, %63, %cst_40 {dimension_numbers = #tpu.dot_dimension_numbers<[1], [0], [0], [1], [0, 0, 1, 1], [], []>} : vector<256x4xbf16>, vector<4x4xbf16>, vector<256x4xf32> -> vector<256x4xf32>
      %65 = arith.addf %54, %64 : vector<256x4xf32>
      %c8_i32_41 = arith.constant 8 : i32
      %66 = arith.muli %arg2, %c8_i32_41 : i32
      %c2_i32_42 = arith.constant 2 : i32
      %67 = arith.addi %66, %c2_i32_42 : i32
      %c32_i32_43 = arith.constant 32 : i32
      %68 = arith.muli %67, %c32_i32_43 : i32
      %69 = tpu.assume_multiple %68, 16 : i32
      %c0_44 = arith.constant 0 : index
      %70 = arith.index_cast %69 : i32 to index
      %c0_45 = arith.constant 0 : index
      %71 = vector.load %arg3[%c0_44, %70, %c0_45] : memref<1x576x4xbf16, #tpu.memory_space<vmem>>, vector<1x256x4xbf16>
      %72 = vector.shape_cast %71 : vector<1x256x4xbf16> to vector<256x4xbf16>
      %c6 = arith.constant 6 : index
      %c0_46 = arith.constant 0 : index
      %c0_47 = arith.constant 0 : index
      %73 = vector.load %arg4[%c6, %c0_46, %c0_47] : memref<9x4x4xbf16, #tpu.memory_space<vmem>>, vector<1x4x4xbf16>
      %74 = vector.shape_cast %73 : vector<1x4x4xbf16> to vector<4x4xbf16>
      %cst_48 = arith.constant dense<0.000000e+00> : vector<256x4xf32>
      %75 = tpu.matmul %72, %74, %cst_48 {dimension_numbers = #tpu.dot_dimension_numbers<[1], [0], [0], [1], [0, 0, 1, 1], [], []>} : vector<256x4xbf16>, vector<4x4xbf16>, vector<256x4xf32> -> vector<256x4xf32>
      %76 = arith.addf %65, %75 : vector<256x4xf32>
      %c1_i32_49 = arith.constant 1 : i32
      %77 = tpu.dynamic_rotate %76 by %c1_i32_49 dim 0 : vector<256x4xf32>, i32 -> vector<256x4xf32>
      %78 = arith.index_cast %10 : i32 to index
      %c0_50 = arith.constant 0 : index
      %79 = vector.load %arg8[%78, %c0_50] : memref<512x4xf32, #tpu.memory_space<vmem>>, vector<256x4xf32>
      %80 = arith.addf %79, %77 : vector<256x4xf32>
      %81 = arith.index_cast %10 : i32 to index
      %c0_51 = arith.constant 0 : index
      %82 = vector.load %arg8[%81, %c0_51] : memref<512x4xf32, #tpu.memory_space<vmem>>, vector<256x4xf32>
      tpu.vector_store %arg8[%81, %c0_51], %80 {strides = array<i32>} : memref<512x4xf32, #tpu.memory_space<vmem>>, vector<256x4xf32>,
      %c8_i32_52 = arith.constant 8 : i32
      %83 = arith.muli %arg2, %c8_i32_52 : i32
      %c0_i32_53 = arith.constant 0 : i32
      %84 = arith.addi %83, %c0_i32_53 : i32
      %c32_i32_54 = arith.constant 32 : i32
      %85 = arith.muli %84, %c32_i32_54 : i32
      %86 = tpu.assume_multiple %85, 16 : i32
      %c0_55 = arith.constant 0 : index
      %87 = arith.index_cast %86 : i32 to index
      %c0_56 = arith.constant 0 : index
      %88 = vector.load %arg3[%c0_55, %87, %c0_56] : memref<1x576x4xbf16, #tpu.memory_space<vmem>>, vector<1x256x4xbf16>
      %89 = vector.shape_cast %88 : vector<1x256x4xbf16> to vector<256x4xbf16>
      %c2 = arith.constant 2 : index
      %c0_57 = arith.constant 0 : index
      %c0_58 = arith.constant 0 : index
      %90 = vector.load %arg4[%c2, %c0_57, %c0_58] : memref<9x4x4xbf16, #tpu.memory_space<vmem>>, vector<1x4x4xbf16>
      %91 = vector.shape_cast %90 : vector<1x4x4xbf16> to vector<4x4xbf16>
      %cst_59 = arith.constant dense<0.000000e+00> : vector<256x4xf32>
      %92 = tpu.matmul %89, %91, %cst_59 {dimension_numbers = #tpu.dot_dimension_numbers<[1], [0], [0], [1], [0, 0, 1, 1], [], []>} : vector<256x4xbf16>, vector<4x4xbf16>, vector<256x4xf32> -> vector<256x4xf32>
      %c8_i32_60 = arith.constant 8 : i32
      %93 = arith.muli %arg2, %c8_i32_60 : i32
      %c1_i32_61 = arith.constant 1 : i32
      %94 = arith.addi %93, %c1_i32_61 : i32
      %c32_i32_62 = arith.constant 32 : i32
      %95 = arith.muli %94, %c32_i32_62 : i32
      %96 = tpu.assume_multiple %95, 16 : i32
      %c0_63 = arith.constant 0 : index
      %97 = arith.index_cast %96 : i32 to index
      %c0_64 = arith.constant 0 : index
      %98 = vector.load %arg3[%c0_63, %97, %c0_64] : memref<1x576x4xbf16, #tpu.memory_space<vmem>>, vector<1x256x4xbf16>
      %99 = vector.shape_cast %98 : vector<1x256x4xbf16> to vector<256x4xbf16>
      %c5 = arith.constant 5 : index
      %c0_65 = arith.constant 0 : index
      %c0_66 = arith.constant 0 : index
      %100 = vector.load %arg4[%c5, %c0_65, %c0_66] : memref<9x4x4xbf16, #tpu.memory_space<vmem>>, vector<1x4x4xbf16>
      %101 = vector.shape_cast %100 : vector<1x4x4xbf16> to vector<4x4xbf16>
      %cst_67 = arith.constant dense<0.000000e+00> : vector<256x4xf32>
      %102 = tpu.matmul %99, %101, %cst_67 {dimension_numbers = #tpu.dot_dimension_numbers<[1], [0], [0], [1], [0, 0, 1, 1], [], []>} : vector<256x4xbf16>, vector<4x4xbf16>, vector<256x4xf32> -> vector<256x4xf32>
      %103 = arith.addf %92, %102 : vector<256x4xf32>
      %c8_i32_68 = arith.constant 8 : i32
      %104 = arith.muli %arg2, %c8_i32_68 : i32
      %c2_i32_69 = arith.constant 2 : i32
      %105 = arith.addi %104, %c2_i32_69 : i32
      %c32_i32_70 = arith.constant 32 : i32
      %106 = arith.muli %105, %c32_i32_70 : i32
      %107 = tpu.assume_multiple %106, 16 : i32
      %c0_71 = arith.constant 0 : index
      %108 = arith.index_cast %107 : i32 to index
      %c0_72 = arith.constant 0 : index
      %109 = vector.load %arg3[%c0_71, %108, %c0_72] : memref<1x576x4xbf16, #tpu.memory_space<vmem>>, vector<1x256x4xbf16>
      %110 = vector.shape_cast %109 : vector<1x256x4xbf16> to vector<256x4xbf16>
      %c8 = arith.constant 8 : index
      %c0_73 = arith.constant 0 : index
      %c0_74 = arith.constant 0 : index
      %111 = vector.load %arg4[%c8, %c0_73, %c0_74] : memref<9x4x4xbf16, #tpu.memory_space<vmem>>, vector<1x4x4xbf16>
      %112 = vector.shape_cast %111 : vector<1x4x4xbf16> to vector<4x4xbf16>
      %cst_75 = arith.constant dense<0.000000e+00> : vector<256x4xf32>
      %113 = tpu.matmul %110, %112, %cst_75 {dimension_numbers = #tpu.dot_dimension_numbers<[1], [0], [0], [1], [0, 0, 1, 1], [], []>} : vector<256x4xbf16>, vector<4x4xbf16>, vector<256x4xf32> -> vector<256x4xf32>
      %114 = arith.addf %103, %113 : vector<256x4xf32>
      %c255_i32 = arith.constant 255 : i32
      %115 = tpu.dynamic_rotate %114 by %c255_i32 dim 0 : vector<256x4xf32>, i32 -> vector<256x4xf32>
      %116 = arith.index_cast %10 : i32 to index
      %c0_76 = arith.constant 0 : index
      %117 = vector.load %arg8[%116, %c0_76] : memref<512x4xf32, #tpu.memory_space<vmem>>, vector<256x4xf32>
      %118 = arith.addf %117, %115 : vector<256x4xf32>
      %119 = arith.index_cast %10 : i32 to index
      %c0_77 = arith.constant 0 : index
      %120 = vector.load %arg8[%119, %c0_77] : memref<512x4xf32, #tpu.memory_space<vmem>>, vector<256x4xf32>
      tpu.vector_store %arg8[%119, %c0_77], %118 {strides = array<i32>} : memref<512x4xf32, #tpu.memory_space<vmem>>, vector<256x4xf32>,
      %121 = arith.index_cast %10 : i32 to index
      %c0_78 = arith.constant 0 : index
      %122 = vector.load %arg8[%121, %c0_78] : memref<512x4xf32, #tpu.memory_space<vmem>>, vector<256x4xf32>
      %c0_79 = arith.constant 0 : index
      %c0_80 = arith.constant 0 : index
      %123 = vector.load %arg5[%c0_79, %c0_80] : memref<256x1xf32, #tpu.memory_space<vmem>>, vector<256x1xf32>
      %c0_81 = arith.constant 0 : index
      %c0_82 = arith.constant 0 : index
      %124 = vector.load %arg9[%c0_81, %c0_82] : memref<1x4xf32, #tpu.memory_space<vmem>>, vector<1x4xf32>
      %125 = vector.broadcast %123 : vector<256x1xf32> to vector<256x4xf32>
      %126 = arith.mulf %122, %125 : vector<256x4xf32>
      %cst_83 = arith.constant dense<0.000000e+00> : vector<4xf32>
      %127 = vector.multi_reduction <add>, %126, %cst_83 [0] : vector<256x4xf32> to vector<4xf32>
      %128 = vector.shape_cast %127 : vector<4xf32> to vector<1x4xf32>
      %129 = arith.addf %124, %128 : vector<1x4xf32>
      %c0_84 = arith.constant 0 : index
      %c0_85 = arith.constant 0 : index
      %130 = vector.load %arg9[%c0_84, %c0_85] : memref<1x4xf32, #tpu.memory_space<vmem>>, vector<1x4xf32>
      tpu.vector_store %arg9[%c0_84, %c0_85], %129 {strides = array<i32>} : memref<1x4xf32, #tpu.memory_space<vmem>>, vector<1x4xf32>,
      %c0_86 = arith.constant 0 : index
      %c0_87 = arith.constant 0 : index
      %131 = vector.load %arg10[%c0_86, %c0_87] : memref<1x4xf32, #tpu.memory_space<vmem>>, vector<1x4xf32>
      %132 = arith.mulf %122, %122 : vector<256x4xf32>
      %133 = vector.broadcast %123 : vector<256x1xf32> to vector<256x4xf32>
      %134 = arith.mulf %132, %133 : vector<256x4xf32>
      %cst_88 = arith.constant dense<0.000000e+00> : vector<4xf32>
      %135 = vector.multi_reduction <add>, %134, %cst_88 [0] : vector<256x4xf32> to vector<4xf32>
      %136 = vector.shape_cast %135 : vector<4xf32> to vector<1x4xf32>
      %137 = arith.addf %131, %136 : vector<1x4xf32>
      %c0_89 = arith.constant 0 : index
      %c0_90 = arith.constant 0 : index
      %138 = vector.load %arg10[%c0_89, %c0_90] : memref<1x4xf32, #tpu.memory_space<vmem>>, vector<1x4xf32>
      tpu.vector_store %arg10[%c0_89, %c0_90], %137 {strides = array<i32>} : memref<1x4xf32, #tpu.memory_space<vmem>>, vector<1x4xf32>,
    } else {
    }
    %c1_i32 = arith.constant 1 : i32
    %3 = arith.cmpi eq, %arg1, %c1_i32 : i32
    %4 = arith.extui %3 : i1 to i32
    %c0_i32_1 = arith.constant 0 : i32
    %5 = arith.cmpi ne, %4, %c0_i32_1 : i32
    scf.if %5 {
      %c0_i32_2 = arith.constant 0 : i32
      %6 = arith.cmpi eq, %arg2, %c0_i32_2 : i32
      %7 = arith.extui %6 : i1 to i32
      %c0_i32_3 = arith.constant 0 : i32
      %8 = arith.cmpi ne, %7, %c0_i32_3 : i32
      scf.if %8 {
        %c0_14 = arith.constant 0 : index
        %c0_15 = arith.constant 0 : index
        %25 = vector.load %arg9[%c0_14, %c0_15] : memref<1x4xf32, #tpu.memory_space<vmem>>, vector<1x4xf32>
        %cst = arith.constant 3.906250e-03 : f32
        %26 = vector.broadcast %cst : f32 to vector<1x4xf32>
        %27 = arith.mulf %25, %26 : vector<1x4xf32>
        %c0_16 = arith.constant 0 : index
        %c0_17 = arith.constant 0 : index
        %28 = vector.load %arg10[%c0_16, %c0_17] : memref<1x4xf32, #tpu.memory_space<vmem>>, vector<1x4xf32>
        %cst_18 = arith.constant 3.906250e-03 : f32
        %29 = vector.broadcast %cst_18 : f32 to vector<1x4xf32>
        %30 = arith.mulf %28, %29 : vector<1x4xf32>
        %31 = arith.mulf %27, %27 : vector<1x4xf32>
        %32 = arith.subf %30, %31 : vector<1x4xf32>
        %cst_19 = arith.constant 0.000000e+00 : f32
        %33 = vector.broadcast %cst_19 : f32 to vector<1x4xf32>
        %34 = arith.maximumf %32, %33 : vector<1x4xf32>
        %c0_20 = arith.constant 0 : index
        %c0_21 = arith.constant 0 : index
        %35 = vector.load %arg11[%c0_20, %c0_21] : memref<1x4xf32, #tpu.memory_space<vmem>>, vector<1x4xf32>
        tpu.vector_store %arg11[%c0_20, %c0_21], %27 {strides = array<i32>} : memref<1x4xf32, #tpu.memory_space<vmem>>, vector<1x4xf32>,
        %cst_22 = arith.constant 9.99999974E-6 : f32
        %36 = vector.broadcast %cst_22 : f32 to vector<1x4xf32>
        %37 = arith.addf %34, %36 : vector<1x4xf32>
        %38 = math.rsqrt %37 : vector<1x4xf32>
        %c0_23 = arith.constant 0 : index
        %c0_24 = arith.constant 0 : index
        %39 = vector.load %arg12[%c0_23, %c0_24] : memref<1x4xf32, #tpu.memory_space<vmem>>, vector<1x4xf32>
        tpu.vector_store %arg12[%c0_23, %c0_24], %38 {strides = array<i32>} : memref<1x4xf32, #tpu.memory_space<vmem>>, vector<1x4xf32>,
      } else {
      }
      %c256_i32 = arith.constant 256 : i32
      %9 = arith.muli %arg2, %c256_i32 : i32
      %10 = tpu.assume_multiple %9, 8 : i32
      %11 = arith.index_cast %10 : i32 to index
      %c0 = arith.constant 0 : index
      %12 = vector.load %arg8[%11, %c0] : memref<512x4xf32, #tpu.memory_space<vmem>>, vector<256x4xf32>
      %c0_4 = arith.constant 0 : index
      %c0_5 = arith.constant 0 : index
      %13 = vector.load %arg11[%c0_4, %c0_5] : memref<1x4xf32, #tpu.memory_space<vmem>>, vector<1x4xf32>
      %14 = vector.broadcast %13 : vector<1x4xf32> to vector<256x4xf32>
      %15 = arith.subf %12, %14 : vector<256x4xf32>
      %c0_6 = arith.constant 0 : index
      %c0_7 = arith.constant 0 : index
      %16 = vector.load %arg12[%c0_6, %c0_7] : memref<1x4xf32, #tpu.memory_space<vmem>>, vector<1x4xf32>
      %17 = vector.broadcast %16 : vector<1x4xf32> to vector<256x4xf32>
      %18 = arith.mulf %15, %17 : vector<256x4xf32>
      %c0_8 = arith.constant 0 : index
      %c0_9 = arith.constant 0 : index
      %c0_10 = arith.constant 0 : index
      %19 = vector.load %arg6[%c0_8, %c0_9, %c0_10] : memref<1x256x4xf32, #tpu.memory_space<vmem>>, vector<1x256x4xf32>
      %20 = vector.shape_cast %19 : vector<1x256x4xf32> to vector<256x4xf32>
      %21 = arith.addf %18, %20 : vector<256x4xf32>
      %c0_11 = arith.constant 0 : index
      %c0_12 = arith.constant 0 : index
      %c0_13 = arith.constant 0 : index
      %22 = vector.load %arg7[%c0_11, %c0_12, %c0_13] : memref<1x256x4xf32, #tpu.memory_space<vmem>>, vector<1x256x4xf32>
      %23 = vector.shape_cast %22 : vector<1x256x4xf32> to vector<256x4xf32>
      %24 = vector.shape_cast %21 : vector<256x4xf32> to vector<1x256x4xf32>
      tpu.vector_store %arg7[%c0_11, %c0_12, %c0_13], %24 {strides = array<i32>} : memref<1x256x4xf32, #tpu.memory_space<vmem>>, vector<1x256x4xf32>,
    } else {
    }
    return
  }
  func.func @transform_0(%arg0: i32, %arg1: i32, %arg2: i32) -> (i32, i32, i32) {
    %c0_i32 = arith.constant 0 : i32
    %c0_i32_0 = arith.constant 0 : i32
    %c0_i32_1 = arith.constant 0 : i32
    return %arg0, %c0_i32, %c0_i32_0 : i32, i32, i32
  }
  func.func @transform_1(%arg0: i32, %arg1: i32, %arg2: i32) -> (i32, i32, i32) {
    %c0_i32 = arith.constant 0 : i32
    %c0_i32_0 = arith.constant 0 : i32
    %c0_i32_1 = arith.constant 0 : i32
    %c0_i32_2 = arith.constant 0 : i32
    return %c0_i32, %c0_i32_0, %c0_i32_1 : i32, i32, i32
  }
  func.func @transform_2(%arg0: i32, %arg1: i32, %arg2: i32) -> (i32, i32) {
    %c0_i32 = arith.constant 0 : i32
    %c0_i32_0 = arith.constant 0 : i32
    %c0_i32_1 = arith.constant 0 : i32
    return %c0_i32, %c0_i32_0 : i32, i32
  }
  func.func @transform_3(%arg0: i32, %arg1: i32, %arg2: i32) -> (i32, i32, i32) {
    %0 = arith.muli %arg1, %arg2 : i32
    %c0_i32 = arith.constant 0 : i32
    %c0_i32_0 = arith.constant 0 : i32
    return %arg0, %0, %c0_i32 : i32, i32, i32
  }
  func.func @transform_4(%arg0: i32, %arg1: i32, %arg2: i32) -> (i32, i32, i32) {
    %0 = arith.muli %arg1, %arg2 : i32
    %c0_i32 = arith.constant 0 : i32
    %c0_i32_0 = arith.constant 0 : i32
    return %arg0, %0, %c0_i32 : i32, i32, i32
  }
}

</mosaic_0001>

<bundles_post_ra>
// kernel: residual_block.2
= control target key start
LH: loop header
LB: loop body
LE: loop exit
PB: predicated region body
PF: predicated region fallthrough
CT: control target
= control target key end

     0   :  { %s5856_s12 = smov 0   ;;  %s5858_s13 = smov 0   ;;  %s7315_s0 = inlined_call_operand.vmem [shape: bf16[2,576,4], index: 0, kind: input, shape index: {}]   ;;  %s7316_s1 = inlined_call_operand.vmem [shape: bf16[9,4,4], index: 1, kind: input, shape index: {}]   ;;  %s7317_s2 = inlined_call_operand.vmem [shape: f32[256,1], index: 2, kind: input, shape index: {}]   ;;  %s7318_s3 = inlined_call_operand.vmem [shape: bf16[2,512,4], index: 3, kind: output, shape index: {}]  }
   0x1   :  { %s5860_s14 = smov 0   ;;  %s5862_s15 = smov 0  }
   0x2   :  { %s5864_s16 = smov 0   ;;  %s5866_s17 = smov 0  }
   0x3   :  { %s5868_s18 = smov 0  }
   0x4 LB: > { %s25_s19 = sadd.s32 1, %s5820_s15  ;;  %s28_s20 = sadd.s32 1, %s5824_s16  ;;  %s5832_s18 = sphi %s5868_s18, %s13_s18   ;;  %s5828_s17 = sphi %s5866_s17, %s7324_s17   ;;  %s5824_s16 = sphi %s5864_s16, %s7323_s16   ;;  %s5820_s15 = sphi %s5862_s15, %s7322_s15   ;;  %s5816_s14 = sphi %s5860_s14, %s7321_s14   ;;  %s5812_s13 = sphi %s5858_s13, %s7320_s13   ;;  %s5808_s12 = sphi %s5856_s12, %s7319_s12  }
   0x5   : > { %p26_p0 = scmp.ge.s32.totalorder %s25_s19, 2  ;;  %p4521_p1 = scmp.ge.s32.totalorder %s5832_s18, 1 }
   0x6   : > { %p160_p2 = scmp.lt.s32.totalorder %s5832_s18, 9  ;;  %s32_s21 = sadd.s32 1, %s5828_s17 }
   0x7   : > { %s7326_s19 = smov (%p26_p0, %s25_s19), 0  ;;  %s7328_s20 = smov (!%p26_p0, %s28_s20), %s5824_s16 }
   0x8   : > { %p161_p3 = pnand %p4521_p1, %p160_p2  ;;  %p30_p4 = scmp.ge.s32.totalorder %s7328_s20, 2 }
   0x9   : > { %p189_p6 = scmp.lt.s32.totalorder (!%p161_p3), %s5816_s14, 1  ;;  %s194_s22 = smul.u32 (!%p161_p3), %s5808_s12, %s5812_s13 }
   0xa   : > { %s7330_s20 = smov (%p30_p4, %s7328_s20), 0  ;;  %s7332_s21 = smov (!%p30_p4, %s32_s21), %s5828_s17 }
   0xb   : > { %p34_p5 = scmp.ge.s32.totalorder %s7332_s21, 2  ;;  %164 = sbr.rel (%p161_p3) target bundleno = 717 (0x2cd), region = 32 }
   0xc   : > { %s4523_s23 = sshll.u32 (!%p161_p3), %s194_s22, 5  ;;  %p4526_p8 = scmp.ne.s32.totalorder (!%p161_p3), %s5812_s13, 0 }
   0xd   : > { %s7334_s21 = smov (%p34_p5, %s7332_s21), 0  ;;  %p198_p7 = scmp.lt.s32.totalorder (!%p161_p3), %s4523_s23, 63 }
  0x12   : > { %s7336_s14 = smov (!%p189_p6, %s5816_s14), 1  ;;  %s7338_s23 = smov (!%p198_p7, %s4523_s23), 63 }
  0x13   : > { %s5571_s24 = smul.u32 288, %s7336_s14  ;;  %s4524_s28 = sshll.u32 %s7336_s14, 6 }
  0x14   : > { %s201_s29 = sadd.s32 %s4524_s28, %s7338_s23  ;;  %210 = sbr.rel (%p4526_p8) target bundleno = 643 (0x283), region = 36 }
  0x15   : > { %s5907_s27 = scalar_lea.vmem %s7315_s0, %s5571_s24  ;;  %s4525_s30 = sshll.u32 %s201_s29, 2 }
  0x16   : > { %s5912_s6 = scalar_lea.vmem %s7318_s3, %s4525_s30  ;;  %p4527_p9 = scmp.ne.s32.totalorder (!%p4526_p8), %s5808_s12, 0 }
  0x1b   : > { %214 = sbr.rel (%p4527_p9) target bundleno = 34 (0x22), region = 40  ;;  %vm215_vm0 = vcmask (!%p4527_p9), 24576   ;;  %v5834_v0 = vmov (!%p4527_p9), 0.0  }
  0x1c   : > { %216 = vst.msk [vmem:[#allocation3] sm:$0x1] (!%p4527_p9), %vm215_vm0, %v5834_v0  ;;  %217 = vst.msk [vmem:[#allocation4] sm:$0x1] (!%p4527_p9), %vm215_vm0, %v5834_v0 }
  0x22 PF: > { %v4534_v1 = vld [vmem:[%s7316_s1 + $0x8] sm:$0x3]  ;;  %vm427_vm1 = vcmask 1041408   ;;  %v4530_v2 = vld [vmem:[%s7316_s1 + $0x2] sm:$0x3]  ;;  %s5923_s11 = sshll.u32 %s5808_s12, 8 }
  0x23   : > { %5561 = vmatprep.subr.msk.bf16.mxu1 %vm427_vm1, %v4534_v1  ;;  %5562 = vmatprep.subr.msk.bf16.mxu0 %vm427_vm1, %v4530_v2  ;;  %v429_v3 = vsel %vm427_vm1, %v4534_v1, 0  ;;  %v721_v4 = vsel %vm427_vm1, %v4530_v2, 0  ;;  %s219_s14 = sshra.s32 %s5923_s11, 3  ;;  %s4871_s23 = sadd.s32 32, %s5923_s11  ;;  %v4601_v5 = vld [vmem:[%s7316_s1 + $0xe] sm:$0x3] }
  0x24   : > { %5062 = vmatpush3.bf16.msra.mxu1 %v429_v3  ;;  %5096 = vmatpush3.bf16.msra.mxu0 %v721_v4  ;;  %s4529_s22 = sshll.u32 %s219_s14, 2  ;;  %vm378_vm2 = vcmask 31744   ;;  %s260_s28 = sshra.s32 %s4871_s23, 3  ;;  %v4733_v7 = vld [vmem:[%s7316_s1 + $0xa] sm:$0x3]  ;;  %v1053_v9 = vsel %vm427_vm1, %v4601_v5, 0 }
  0x25   : > { %s5935_s26 = scalar_lea.vmem %s5907_s27, %s4529_s22  ;;  %5563 = vmatprep.subr.msk.bf16.mxu1 %vm427_vm1, %v4530_v2  ;;  %5564 = vmatprep.subr.msk.bf16.mxu0 %vm427_vm1, %v4601_v5  ;;  %s4533_s29 = sshll.u32 %s260_s28, 2  ;;  %v5953_v11 = vld [vmem:[%s7316_s1 + $0x6] sm:$0x3]  ;;  %v2650_v30 = vsel %vm427_vm1, %v4733_v7, 0  ;;  %v1313_v49 = vld [vmem:[%s7316_s1] sm:$0x3] }
  0x26   : > { %v5632_v6 = vld [vmem:[%s5935_s26] sm:$0xff]   ;;  %s5944_s5 = scalar_lea.vmem %s5907_s27, %s4533_s29  ;;  %v5634_v8 = vld [vmem:[%s5935_s26 + $0x8] sm:$0xff]   ;;  %v5636_v13 = vld [vmem:[%s5935_s26 + $0x10] sm:$0xff]   ;;  %s4873_s9 = sadd.s32 64, %s5923_s11  ;;  %v1477_v48 = vsel %vm427_vm1, %v5953_v11, 0  ;;  %vm3951_vm5 = vcmask 24576  }
  0x27   : > { %5097 = vmatprep.mubr.msk.bf16.mxu0 %vm378_vm2, %v5632_v6  ;;  %v5633_v10 = vld [vmem:[%s5944_s5] sm:$0xff]   ;;  %v5635_v12 = vld [vmem:[%s5944_s5 + $0x8] sm:$0xff]   ;;  %v5637_v14 = vld [vmem:[%s5944_s5 + $0x10] sm:$0xff]   ;;  %s886_s10 = sshra.s32 %s4873_s9, 3 }
  0x28   : > { %5098 = vmatmul.mubr.msk.bf16.vlgmr.msra.gmra.mrb[0].mxu0 %vm378_vm2, %v5634_v8  ;;  %5063 = vmatprep.mubr.msk.bf16.mxu1 %vm378_vm2, %v5633_v10  ;;  %v5638_v15 = vld [vmem:[%s5935_s26 + $0x18] sm:$0xff]   ;;  %v5640_v16 = vld [vmem:[%s5935_s26 + $0x20] sm:$0xff]   ;;  %s4600_s14 = sshll.u32 %s886_s10, 2  ;;  %v5642_v19 = vld [vmem:[%s5935_s26 + $0x28] sm:$0xff]  }
  0x29   : > { %5130 = vmatpush3.bf16.msra.mxu0 %v1053_v9  ;;  %5064 = vmatmul.mubr.msk.bf16.vlgmr.msra.gmra.mrb[0].mxu1 %vm378_vm2, %v5635_v12  ;;  %v5639_v17 = vld [vmem:[%s5944_s5 + $0x18] sm:$0xff]   ;;  %v5641_v18 = vld [vmem:[%s5944_s5 + $0x20] sm:$0xff]   ;;  %s5977_s22 = scalar_lea.vmem %s5907_s27, %s4600_s14  ;;  %v5644_v20 = vld [vmem:[%s5935_s26 + $0x30] sm:$0xff]   ;;  %s6370_s27 = scalar_lea.vmem [#allocation2], %s5923_s11 }
  0x2a   : > { %5568 = vmatprep.subr.msk.bf16.mxu0 %vm427_vm1, %v4733_v7  ;;  %5368 = vmatpush3.bf16.msra.mxu1 %v721_v4  ;;  %v5643_v21 = vld [vmem:[%s5944_s5 + $0x28] sm:$0xff]   ;;  %v5645_v22 = vld [vmem:[%s5944_s5 + $0x30] sm:$0xff]   ;;  %v5646_v23 = vld [vmem:[%s5935_s26 + $0x38] sm:$0xff]   ;;  %v1769_v4 = vsel %vm427_vm1, %v1313_v49, 0 }
  0x2b   : > { %5101 = vmatprep.mubr.msk.bf16.mxu0 %vm378_vm2, %v5636_v13  ;;  %5067 = vmatprep.mubr.msk.bf16.mxu1 %vm378_vm2, %v5637_v14  ;;  %v5648_v24 = vld [vmem:[%s5977_s22] sm:$0xff]   ;;  %v5647_v25 = vld [vmem:[%s5944_s5 + $0x38] sm:$0xff]   ;;  %v5650_v27 = vld [vmem:[%s5977_s22 + $0x8] sm:$0xff]  }
  0x2c   : > { %5565 = vmatprep.subr.msk.bf16.mxu1 %vm427_vm1, %v5953_v11  ;;  %v5649_v26 = vld [vmem:[%s5944_s5 + $0x40] sm:$0xff]   ;;  %v5652_v28 = vld [vmem:[%s5977_s22 + $0x10] sm:$0xff]   ;;  %v5651_v29 = vld [vmem:[%s5944_s5 + $0x48] sm:$0xff]  }
  0x2d   : > { %v5653_v31 = vld [vmem:[%s5944_s5 + $0x50] sm:$0xff]   ;;  %v5654_v32 = vld [vmem:[%s5977_s22 + $0x18] sm:$0xff]   ;;  %v5656_v33 = vld [vmem:[%s5977_s22 + $0x20] sm:$0xff]  }
  0x2e   : > { %v5655_v34 = vld [vmem:[%s5944_s5 + $0x58] sm:$0xff]   ;;  %v5657_v35 = vld [vmem:[%s5944_s5 + $0x60] sm:$0xff]   ;;  %v5658_v36 = vld [vmem:[%s5977_s22 + $0x28] sm:$0xff]  }
  0x2f   : > { %v5660_v37 = vld [vmem:[%s5977_s22 + $0x30] sm:$0xff]   ;;  %v5659_v38 = vld [vmem:[%s5944_s5 + $0x68] sm:$0xff]   ;;  %v5662_v40 = vld [vmem:[%s5977_s22 + $0x38] sm:$0xff]  }
  0x30   : > { %5102 = vmatmul.mubr.msk.bf16.gmra.mrb[4].mxu0 %vm378_vm2, %v5638_v15  ;;  %v5661_v39 = vld [vmem:[%s5944_s5 + $0x70] sm:$0xff]   ;;  %v5664_v41 = vld [vmem:[%s5977_s22 + $0x40] sm:$0xff]   ;;  %v5663_v42 = vld [vmem:[%s5944_s5 + $0x78] sm:$0xff]  }
  0x31   : > { %5105 = vmatprep.mubr.msk.bf16.mxu0 %vm378_vm2, %v5640_v16  ;;  %5068 = vmatmul.mubr.msk.bf16.gmra.mrb[4].mxu1 %vm378_vm2, %v5639_v17  ;;  %v5665_v43 = vld [vmem:[%s5935_s26 + $0x40] sm:$0xff]   ;;  %v5666_v44 = vld [vmem:[%s5977_s22 + $0x48] sm:$0xff]   ;;  %v5668_v45 = vld [vmem:[%s5977_s22 + $0x50] sm:$0xff]  }
  0x32   : > { %5071 = vmatprep.mubr.msk.bf16.mxu1 %vm378_vm2, %v5641_v18  ;;  %v5667_v46 = vld [vmem:[%s5935_s26 + $0x48] sm:$0xff]   ;;  %v5669_v47 = vld [vmem:[%s5935_s26 + $0x50] sm:$0xff]   ;;  %v5670_v50 = vld [vmem:[%s5977_s22 + $0x58] sm:$0xff]  }
  0x33   : > { %v5672_v51 = vld [vmem:[%s5977_s22 + $0x60] sm:$0xff]   ;;  %v5671_v52 = vld [vmem:[%s5935_s26 + $0x58] sm:$0xff]   ;;  %v5674_v54 = vld [vmem:[%s5977_s22 + $0x68] sm:$0xff]  }
  0x34   : > { %v5673_v53 = vld [vmem:[%s5935_s26 + $0x60] sm:$0xff]   ;;  %v5676_v55 = vld [vmem:[%s5977_s22 + $0x70] sm:$0xff]   ;;  %v5675_v57 = vld [vmem:[%s5935_s26 + $0x68] sm:$0xff]  }
  0x35   : > { %v4732_v56 = vld [vmem:[%s7316_s1 + $0x4] sm:$0x3]  ;;  %v5677_v58 = vld [vmem:[%s5935_s26 + $0x70] sm:$0xff]   ;;  %v5678_v59 = vld [vmem:[%s5977_s22 + $0x78] sm:$0xff]  }
  0x36   : > { %v5680_v60 = vld [vmem:[%s5944_s5] sm:$0xff]   ;;  %v5679_v61 = vld [vmem:[%s5935_s26 + $0x78] sm:$0xff]   ;;  %v5682_v63 = vld [vmem:[%s5944_s5 + $0x8] sm:$0xff]   ;;  %v2942_v2 = vsel %vm427_vm1, %v4732_v56, 0 }
  0x37   : > { %v5681_v62 = vld [vmem:[%s5944_s5] sm:$0xff]   ;;  %v5684_v0 = vld [vmem:[%s5944_s5 + $0x10] sm:$0xff]   ;;  %v5683_v1 = vld [vmem:[%s5944_s5 + $0x8] sm:$0xff]  }
  0x38   : > { %5106 = vmatmul.mubr.msk.bf16.gmra.mrb[8].mxu0 %vm378_vm2, %v5642_v19  ;;  %v5685_v3 = vld [vmem:[%s5944_s5 + $0x10] sm:$0xff]   ;;  %v6080_v5 = vld [vmem:[%s7316_s1 + $0xc] sm:$0x3]  ;;  %v5686_v6 = vld [vmem:[%s5944_s5 + $0x18] sm:$0xff]  }
  0x39   : > { %5109 = vmatprep.mubr.msk.bf16.mxu0 %vm378_vm2, %v5644_v20  ;;  %5072 = vmatmul.mubr.msk.bf16.gmra.mrb[8].mxu1 %vm378_vm2, %v5643_v21  ;;  %v5688_v7 = vld [vmem:[%s5944_s5 + $0x20] sm:$0xff]   ;;  %v5687_v8 = vld [vmem:[%s5944_s5 + $0x18] sm:$0xff]   ;;  %v5690_v10 = vld [vmem:[%s5944_s5 + $0x28] sm:$0xff]  }
  0x3a   : > { %5075 = vmatprep.mubr.msk.bf16.mxu1 %vm378_vm2, %v5645_v22  ;;  %v5689_v9 = vld [vmem:[%s5944_s5 + $0x20] sm:$0xff]   ;;  %v5691_v11 = vld [vmem:[%s5944_s5 + $0x28] sm:$0xff]   ;;  %v5692_v12 = vld [vmem:[%s5944_s5 + $0x30] sm:$0xff]  }
  0x3b   : > { %v4798_v13 = vld [vmem:[%s7316_s1 + $0x10] sm:$0x3]  ;;  %v5694_v15 = vld [vmem:[%s5944_s5 + $0x38] sm:$0xff]   ;;  %v5696_v16 = vld [vmem:[%s5944_s5 + $0x40] sm:$0xff]  }
  0x3c   : > { %v5693_v14 = vld [vmem:[%s5944_s5 + $0x30] sm:$0xff]   ;;  %v5695_v17 = vld [vmem:[%s5944_s5 + $0x38] sm:$0xff]   ;;  %v5697_v18 = vld [vmem:[%s5944_s5 + $0x40] sm:$0xff]  }
  0x3d   : > { %v5698_v19 = vld [vmem:[%s5944_s5 + $0x48] sm:$0xff]   ;;  %v5700_v20 = vld [vmem:[%s5944_s5 + $0x50] sm:$0xff]  }
  0x3e   : > { %v5699_v21 = vld [vmem:[%s5944_s5 + $0x48] sm:$0xff]   ;;  %v5701_v22 = vld [vmem:[%s5944_s5 + $0x50] sm:$0xff]  }
  0x40   : > { %5110 = vmatmul.mubr.msk.bf16.gmra.mrb[12].mxu0 %vm378_vm2, %v5646_v23  ;;  %v5702_v23 = vld [vmem:[%s5944_s5 + $0x58] sm:$0xff]  }
  0x41   : > { %5131 = vmatprep.mubr.msk.bf16.mxu0 %vm378_vm2, %v5648_v24  ;;  %5076 = vmatmul.mubr.msk.bf16.gmra.mrb[12].mxu1 %vm378_vm2, %v5647_v25  ;;  %v5704_v24 = vld [vmem:[%s5944_s5 + $0x60] sm:$0xff]   ;;  %v5703_v25 = vld [vmem:[%s5944_s5 + $0x58] sm:$0xff]  }
  0x42   : > { %5079 = vmatprep.mubr.msk.bf16.mxu1 %vm378_vm2, %v5649_v26  ;;  %v5705_v26 = vld [vmem:[%s5944_s5 + $0x60] sm:$0xff]  }
  0x48   : > { %5132 = vmatmul.mubr.msk.bf16.vlgmr.msra.gmra.mrb[0].mxu0 %vm378_vm2, %v5650_v27  ;;  %v5706_v27 = vld [vmem:[%s5944_s5 + $0x68] sm:$0xff]  }
  0x49   : > { %5135 = vmatprep.mubr.msk.bf16.mxu0 %vm378_vm2, %v5652_v28  ;;  %5266 = vmatpush3.bf16.msra.mxu0 %v2650_v30  ;;  %v5708_v28 = vld [vmem:[%s5944_s5 + $0x70] sm:$0xff]  }
  0x4a   : > { %5080 = vmatmul.mubr.msk.bf16.gmra.mrb[16].mxu1 %vm378_vm2, %v5651_v29  ;;  %5569 = vmatprep.subr.msk.bf16.mxu0 %vm427_vm1, %v4732_v56  ;;  %v5707_v29 = vld [vmem:[%s5944_s5 + $0x68] sm:$0xff]   ;;  %v5709_v30 = vld [vmem:[%s5944_s5 + $0x70] sm:$0xff]   ;;  %v5729_v56 = vld [vmem:[%s5935_s26 + $0x40] sm:$0xff]  }
  0x4b   : > { %5083 = vmatprep.mubr.msk.bf16.mxu1 %vm378_vm2, %v5653_v31  ;;  %v5710_v31 = vld [vmem:[%s5944_s5 + $0x78] sm:$0xff]  }
  0x50   : > { %5136 = vmatmul.mubr.msk.bf16.gmra.mrb[4].mxu0 %vm378_vm2, %v5654_v32  ;;  %v5712_v32 = vld [vmem:[%s5935_s26] sm:$0xff]  }
  0x51   : > { %5139 = vmatprep.mubr.msk.bf16.mxu0 %vm378_vm2, %v5656_v33  ;;  %v5711_v33 = vld [vmem:[%s5944_s5 + $0x78] sm:$0xff]  }
  0x52   : > { %5084 = vmatmul.mubr.msk.bf16.gmra.mrb[20].mxu1 %vm378_vm2, %v5655_v34  ;;  %v5713_v34 = vld [vmem:[%s5935_s26] sm:$0xff]  }
  0x53   : > { %5087 = vmatprep.mubr.msk.bf16.mxu1 %vm378_vm2, %v5657_v35  ;;  %v5714_v35 = vld [vmem:[%s5935_s26 + $0x8] sm:$0xff]  }
  0x58   : > { %5140 = vmatmul.mubr.msk.bf16.gmra.mrb[8].mxu0 %vm378_vm2, %v5658_v36  ;;  %v5716_v36 = vld [vmem:[%s5935_s26 + $0x10] sm:$0xff]  }
  0x59   : > { %5143 = vmatprep.mubr.msk.bf16.mxu0 %vm378_vm2, %v5660_v37  ;;  %v5715_v37 = vld [vmem:[%s5935_s26 + $0x8] sm:$0xff]  }
  0x5a   : > { %5088 = vmatmul.mubr.msk.bf16.gmra.mrb[24].mxu1 %vm378_vm2, %v5659_v38  ;;  %v3268_v38 = vsel %vm427_vm1, %v4798_v13, 0 }
  0x5b   : > { %5091 = vmatprep.mubr.msk.bf16.mxu1 %vm378_vm2, %v5661_v39  ;;  %v5717_v39 = vld [vmem:[%s5935_s26 + $0x10] sm:$0xff]  }
  0x60   : > { %5144 = vmatmul.mubr.msk.bf16.gmra.mrb[12].mxu0 %vm378_vm2, %v5662_v40  ;;  %v2095_v40 = vsel %vm427_vm1, %v6080_v5, 0 }
  0x61   : > { %5147 = vmatprep.mubr.msk.bf16.mxu0 %vm378_vm2, %v5664_v41  ;;  %v5718_v41 = vld [vmem:[%s5935_s26 + $0x18] sm:$0xff]  }
  0x62   : > { %5092 = vmatmul.mubr.msk.bf16.gmra.mrb[28].mxu1 %vm378_vm2, %v5663_v42  ;;  %v5720_v42 = vld [vmem:[%s5935_s26 + $0x20] sm:$0xff]  }
  0x63   : > { %5113 = vmatprep.mubr.msk.bf16.mxu1 %vm378_vm2, %v5665_v43  ;;  %v5719_v43 = vld [vmem:[%s5935_s26 + $0x18] sm:$0xff]  }
  0x68   : > { %5148 = vmatmul.mubr.msk.bf16.gmra.mrb[16].mxu0 %vm378_vm2, %v5666_v44  ;;  %v5721_v44 = vld [vmem:[%s5935_s26 + $0x20] sm:$0xff]  }
  0x69   : > { %5151 = vmatprep.mubr.msk.bf16.mxu0 %vm378_vm2, %v5668_v45  ;;  %v5722_v45 = vld [vmem:[%s5935_s26 + $0x28] sm:$0xff]  }
  0x6a   : > { %5114 = vmatmul.mubr.msk.bf16.vlgmr.msra.gmra.mrb[16].mxu1 %vm378_vm2, %v5667_v46  ;;  %v5724_v46 = vld [vmem:[%s5935_s26 + $0x30] sm:$0xff]  }
  0x6b   : > { %5164 = vmatpush3.bf16.msra.mxu1 %v1477_v48  ;;  %5117 = vmatprep.mubr.msk.bf16.mxu1 %vm378_vm2, %v5669_v47  ;;  %v5723_v47 = vld [vmem:[%s5935_s26 + $0x28] sm:$0xff]   ;;  %v5725_v48 = vld [vmem:[%s5935_s26 + $0x30] sm:$0xff]  }
  0x6c   : > { %5566 = vmatprep.subr.msk.bf16.mxu1 %vm427_vm1, %v1313_v49  ;;  %v3656_v49 = vld [vmem:[%s7317_s2] sm:$0xff] }
  0x70   : > { %5152 = vmatmul.mubr.msk.bf16.gmra.mrb[20].mxu0 %vm378_vm2, %v5670_v50  ;;  %v3658_v50 = vld [vmem:[%s7317_s2 + $0x10] sm:$0xff] }
  0x71   : > { %5155 = vmatprep.mubr.msk.bf16.mxu0 %vm378_vm2, %v5672_v51  ;;  %v5726_v51 = vld [vmem:[%s5935_s26 + $0x38] sm:$0xff]  }
  0x72   : > { %5118 = vmatmul.mubr.msk.bf16.gmra.mrb[20].mxu1 %vm378_vm2, %v5671_v52  ;;  %v5835_v52 = vmov 0  }
  0x73   : > { %5121 = vmatprep.mubr.msk.bf16.mxu1 %vm378_vm2, %v5673_v53  ;;  %5630 = vset.pattern.permute.xlu0 %v5835_v52  ;;  %v5728_v53 = vld [vmem:[%s5935_s26 + $0x40] sm:$0xff]  }
  0x74   : > { %5631 = vset.pattern.permute.xlu1 %v5835_v52  ;;  %3691 = vperm.xlu0 %5630, %v3656_v49   ;;  %v3682_v49 = vld [vmem:[%s7317_s2 + $0xd0] sm:$0xff]  ;;  %v3683_v52 = vld [vmem:[%s7317_s2 + $0xd8] sm:$0xff] }
  0x75   : > { %3701 = vperm.xlu1 %5631, %v3658_v50  }
  0x78   : > { %5156 = vmatmul.mubr.msk.bf16.gmra.mrb[24].mxu0 %vm378_vm2, %v5674_v54  ;;  %v5727_v54 = vld [vmem:[%s5935_s26 + $0x38] sm:$0xff]  }
  0x79   : > { %5159 = vmatprep.mubr.msk.bf16.mxu0 %vm378_vm2, %v5676_v55  ;;  %v3657_v55 = vld [vmem:[%s7317_s2 + $0x8] sm:$0xff] }
  0x7a   : > { %5122 = vmatmul.mubr.msk.bf16.gmra.mrb[24].mxu1 %vm378_vm2, %v5675_v57  ;;  %v3659_v57 = vld [vmem:[%s7317_s2 + $0x18] sm:$0xff]  ;;  %3696 = vperm.xlu0 %5630, %v3657_v55   ;;  %v3685_v55 = vld [vmem:[%s7317_s2 + $0xe8] sm:$0xff] }
  0x7b   : > { %5125 = vmatprep.mubr.msk.bf16.mxu1 %vm378_vm2, %v5677_v58  ;;  %3706 = vperm.xlu1 %5631, %v3659_v57   ;;  %v3660_v58 = vld [vmem:[%s7317_s2 + $0x20] sm:$0xff] }
  0x7e   : > { %3711 = vperm.xlu0 %5630, %v3660_v58   ;;  %v5756_v58 = vld [vmem:[%s5977_s22 + $0x30] sm:$0xff]  }
  0x80   : > { %5160 = vmatmul.mubr.msk.bf16.gmra.mrb[28].mxu0 %vm378_vm2, %v5678_v59  ;;  %v3661_v59 = vld [vmem:[%s7317_s2 + $0x28] sm:$0xff] }
  0x81   : > { %5267 = vmatprep.mubr.msk.bf16.mxu0 %vm378_vm2, %v5680_v60  ;;  %v5730_v60 = vld [vmem:[%s5935_s26 + $0x48] sm:$0xff]   ;;  %3716 = vperm.xlu1 %5631, %v3661_v59  }
  0x82   : > { %5126 = vmatmul.mubr.msk.bf16.gmra.mrb[28].mxu1 %vm378_vm2, %v5679_v61  ;;  %v5732_v61 = vld [vmem:[%s5935_s26 + $0x50] sm:$0xff]  }
  0x83   : > { %5165 = vmatprep.mubr.msk.bf16.mxu1 %vm378_vm2, %v5681_v62  ;;  %v5731_v62 = vld [vmem:[%s5935_s26 + $0x48] sm:$0xff]  }
  0x88   : > { %5268 = vmatmul.mubr.msk.bf16.vlgmr.msra.gmra.mrb[32].mxu0 %vm378_vm2, %v5682_v63  ;;  %v3662_v63 = vld [vmem:[%s7317_s2 + $0x30] sm:$0xff] }
  0x89   : > { %5271 = vmatprep.mubr.msk.bf16.mxu0 %vm378_vm2, %v5684_v0  ;;  %5300 = vmatpush3.bf16.msra.mxu0 %v2942_v2  ;;  %v5733_v0 = vld [vmem:[%s5935_s26 + $0x50] sm:$0xff]   ;;  %v3664_v2 = vld [vmem:[%s7317_s2 + $0x40] sm:$0xff] }
  0x8a   : > { %5166 = vmatmul.mubr.msk.bf16.vlgmr.msra.gmra.mrb[32].mxu1 %vm378_vm2, %v5683_v1  ;;  %5570 = vmatprep.subr.msk.bf16.mxu0 %vm427_vm1, %v4798_v13  ;;  %v3663_v1 = vld [vmem:[%s7317_s2 + $0x38] sm:$0xff]  ;;  %v5740_v13 = vld [vmem:[%s5935_s26 + $0x70] sm:$0xff]  }
  0x8b   : > { %5198 = vmatpush3.bf16.msra.mxu1 %v1769_v4  ;;  %5169 = vmatprep.mubr.msk.bf16.mxu1 %vm378_vm2, %v5685_v3  ;;  %v3665_v3 = vld [vmem:[%s7317_s2 + $0x48] sm:$0xff]  ;;  %v5734_v4 = vld [vmem:[%s5935_s26 + $0x58] sm:$0xff]  }
  0x8c   : > { %5567 = vmatprep.subr.msk.bf16.mxu1 %vm427_vm1, %v6080_v5  ;;  %3721 = vperm.xlu0 %5630, %v3662_v63   ;;  %v5736_v5 = vld [vmem:[%s5935_s26 + $0x60] sm:$0xff]   ;;  %v5757_v63 = vld [vmem:[%s5977_s22 + $0x30] sm:$0xff]  }
  0x8d   : > { %3726 = vperm.xlu1 %5631, %v3663_v1  }
  0x90   : > { %5272 = vmatmul.mubr.msk.bf16.gmra.mrb[36].mxu0 %vm378_vm2, %v5686_v6  ;;  %3731 = vperm.xlu0 %5630, %v3664_v2   ;;  %v5735_v6 = vld [vmem:[%s5935_s26 + $0x58] sm:$0xff]  }
  0x91   : > { %5275 = vmatprep.mubr.msk.bf16.mxu0 %vm378_vm2, %v5688_v7  ;;  %3736 = vperm.xlu1 %5631, %v3665_v3   ;;  %v3666_v7 = vld [vmem:[%s7317_s2 + $0x50] sm:$0xff] }
  0x92   : > { %5170 = vmatmul.mubr.msk.bf16.gmra.mrb[36].mxu1 %vm378_vm2, %v5687_v8  ;;  %v5737_v8 = vld [vmem:[%s5935_s26 + $0x60] sm:$0xff]  }
  0x93   : > { %5173 = vmatprep.mubr.msk.bf16.mxu1 %vm378_vm2, %v5689_v9  ;;  %v3667_v9 = vld [vmem:[%s7317_s2 + $0x58] sm:$0xff] }
  0x94   : > { %3741 = vperm.xlu0 %5630, %v3666_v7  }
  0x95   : > { %3746 = vperm.xlu1 %5631, %v3667_v9  }
  0x98   : > { %5276 = vmatmul.mubr.msk.bf16.gmra.mrb[40].mxu0 %vm378_vm2, %v5690_v10  ;;  %v3668_v10 = vld [vmem:[%s7317_s2 + $0x60] sm:$0xff] }
  0x99   : > { %5279 = vmatprep.mubr.msk.bf16.mxu0 %vm378_vm2, %v5692_v12  ;;  %v5738_v12 = vld [vmem:[%s5935_s26 + $0x68] sm:$0xff]   ;;  %3751 = vperm.xlu0 %5630, %v3668_v10  }
  0x9a   : > { %5174 = vmatmul.mubr.msk.bf16.gmra.mrb[40].mxu1 %vm378_vm2, %v5691_v11  ;;  %v3669_v11 = vld [vmem:[%s7317_s2 + $0x68] sm:$0xff] }
  0x9b   : > { %5177 = vmatprep.mubr.msk.bf16.mxu1 %vm378_vm2, %v5693_v14  ;;  %v5739_v14 = vld [vmem:[%s5935_s26 + $0x68] sm:$0xff]   ;;  %3756 = vperm.xlu1 %5631, %v3669_v11   ;;  %v5759_v11 = vld [vmem:[%s5977_s22 + $0x38] sm:$0xff]  }
  0xa0   : > { %5280 = vmatmul.mubr.msk.bf16.gmra.mrb[44].mxu0 %vm378_vm2, %v5694_v15  ;;  %v3670_v15 = vld [vmem:[%s7317_s2 + $0x70] sm:$0xff] }
  0xa1   : > { %5283 = vmatprep.mubr.msk.bf16.mxu0 %vm378_vm2, %v5696_v16  ;;  %v5741_v16 = vld [vmem:[%s5935_s26 + $0x70] sm:$0xff]   ;;  %3761 = vperm.xlu0 %5630, %v3670_v15  }
  0xa2   : > { %5178 = vmatmul.mubr.msk.bf16.gmra.mrb[44].mxu1 %vm378_vm2, %v5695_v17  ;;  %v3671_v17 = vld [vmem:[%s7317_s2 + $0x78] sm:$0xff] }
  0xa3   : > { %5181 = vmatprep.mubr.msk.bf16.mxu1 %vm378_vm2, %v5697_v18  ;;  %3766 = vperm.xlu1 %5631, %v3671_v17   ;;  %v3672_v18 = vld [vmem:[%s7317_s2 + $0x80] sm:$0xff]  ;;  %v5762_v17 = vld [vmem:[%s5977_s22 + $0x48] sm:$0xff]  }
  0xa5   : > { %3771 = vperm.xlu0 %5630, %v3672_v18  }
  0xa8   : > { %5284 = vmatmul.mubr.msk.bf16.gmra.mrb[48].mxu0 %vm378_vm2, %v5698_v19  ;;  %v3673_v19 = vld [vmem:[%s7317_s2 + $0x88] sm:$0xff] }
  0xa9   : > { %5287 = vmatprep.mubr.msk.bf16.mxu0 %vm378_vm2, %v5700_v20  ;;  %v5742_v20 = vld [vmem:[%s5935_s26 + $0x78] sm:$0xff]   ;;  %3776 = vperm.xlu1 %5631, %v3673_v19  }
  0xaa   : > { %5182 = vmatmul.mubr.msk.bf16.gmra.mrb[48].mxu1 %vm378_vm2, %v5699_v21 }
  0xab   : > { %5185 = vmatprep.mubr.msk.bf16.mxu1 %vm378_vm2, %v5701_v22  ;;  %v5744_v22 = vld [vmem:[%s5977_s22] sm:$0xff]  }
  0xb0   : > { %5288 = vmatmul.mubr.msk.bf16.gmra.mrb[52].mxu0 %vm378_vm2, %v5702_v23 }
  0xb1   : > { %5291 = vmatprep.mubr.msk.bf16.mxu0 %vm378_vm2, %v5704_v24  ;;  %v5743_v24 = vld [vmem:[%s5935_s26 + $0x78] sm:$0xff]  }
  0xb2   : > { %5186 = vmatmul.mubr.msk.bf16.gmra.mrb[52].mxu1 %vm378_vm2, %v5703_v25  ;;  %v3674_v25 = vld [vmem:[%s7317_s2 + $0x90] sm:$0xff] }
  0xb3   : > { %5189 = vmatprep.mubr.msk.bf16.mxu1 %vm378_vm2, %v5705_v26  ;;  %3781 = vperm.xlu0 %5630, %v3674_v25   ;;  %v5765_v25 = vld [vmem:[%s5977_s22 + $0x50] sm:$0xff]  }
  0xb8   : > { %5292 = vmatmul.mubr.msk.bf16.gmra.mrb[56].mxu0 %vm378_vm2, %v5706_v27  ;;  %v5745_v27 = vld [vmem:[%s5977_s22] sm:$0xff]  }
  0xb9   : > { %5295 = vmatprep.mubr.msk.bf16.mxu0 %vm378_vm2, %v5708_v28  ;;  %v3675_v28 = vld [vmem:[%s7317_s2 + $0x98] sm:$0xff] }
  0xba   : > { %5190 = vmatmul.mubr.msk.bf16.gmra.mrb[56].mxu1 %vm378_vm2, %v5707_v29  ;;  %3786 = vperm.xlu1 %5631, %v3675_v28  }
  0xbb   : > { %5193 = vmatprep.mubr.msk.bf16.mxu1 %vm378_vm2, %v5709_v30  ;;  %v3676_v30 = vld [vmem:[%s7317_s2 + $0xa0] sm:$0xff] }
  0xbc   : > { %3791 = vperm.xlu0 %5630, %v3676_v30  }
  0xc0   : > { %5296 = vmatmul.mubr.msk.bf16.gmra.mrb[60].mxu0 %vm378_vm2, %v5710_v31  ;;  %v3677_v31 = vld [vmem:[%s7317_s2 + $0xa8] sm:$0xff] }
  0xc1   : > { %5301 = vmatprep.mubr.msk.bf16.mxu0 %vm378_vm2, %v5712_v32  ;;  %v5746_v32 = vld [vmem:[%s5977_s22 + $0x8] sm:$0xff]   ;;  %3796 = vperm.xlu1 %5631, %v3677_v31  }
  0xc2   : > { %5194 = vmatmul.mubr.msk.bf16.gmra.mrb[60].mxu1 %vm378_vm2, %v5711_v33 }
  0xc3   : > { %5199 = vmatprep.mubr.msk.bf16.mxu1 %vm378_vm2, %v5713_v34  ;;  %v5748_v34 = vld [vmem:[%s5977_s22 + $0x10] sm:$0xff]  }
  0xc8   : > { %5302 = vmatmul.mubr.msk.bf16.vlgmr.msra.gmra.mrb[32].mxu0 %vm378_vm2, %v5714_v35 }
  0xc9   : > { %5305 = vmatprep.mubr.msk.bf16.mxu0 %vm378_vm2, %v5716_v36  ;;  %5334 = vmatpush3.bf16.msra.mxu0 %v3268_v38  ;;  %v5747_v36 = vld [vmem:[%s5977_s22 + $0x8] sm:$0xff]  }
  0xca   : > { %5200 = vmatmul.mubr.msk.bf16.vlgmr.msra.gmra.mrb[32].mxu1 %vm378_vm2, %v5715_v37  ;;  %v3678_v37 = vld [vmem:[%s7317_s2 + $0xb0] sm:$0xff] }
  0xcb   : > { %5232 = vmatpush3.bf16.msra.mxu1 %v2095_v40  ;;  %5203 = vmatprep.mubr.msk.bf16.mxu1 %vm378_vm2, %v5717_v39  ;;  %v5749_v39 = vld [vmem:[%s5977_s22 + $0x10] sm:$0xff]   ;;  %v3679_v40 = vld [vmem:[%s7317_s2 + $0xb8] sm:$0xff] }
  0xcc   : > { %3801 = vperm.xlu0 %5630, %v3678_v37   ;;  %3806 = vperm.xlu1 %5631, %v3679_v40   ;;  %v5769_v37 = vld [vmem:[%s5977_s22 + $0x60] sm:$0xff]  }
  0xd0   : > { %5306 = vmatmul.mubr.msk.bf16.gmra.mrb[36].mxu0 %vm378_vm2, %v5718_v41 }
  0xd1   : > { %5309 = vmatprep.mubr.msk.bf16.mxu0 %vm378_vm2, %v5720_v42  ;;  %v3680_v42 = vld [vmem:[%s7317_s2 + $0xc0] sm:$0xff] }
  0xd2   : > { %5204 = vmatmul.mubr.msk.bf16.gmra.mrb[36].mxu1 %vm378_vm2, %v5719_v43  ;;  %v3681_v43 = vld [vmem:[%s7317_s2 + $0xc8] sm:$0xff]  ;;  %3811 = vperm.xlu0 %5630, %v3680_v42  }
  0xd3   : > { %5207 = vmatprep.mubr.msk.bf16.mxu1 %vm378_vm2, %v5721_v44  ;;  %v5750_v44 = vld [vmem:[%s5977_s22 + $0x18] sm:$0xff]   ;;  %3816 = vperm.xlu1 %5631, %v3681_v43  }
  0xd6   : > { %3821 = vperm.xlu0 %5630, %v3682_v49   ;;  %v5773_v49 = vld [vmem:[%s5977_s22 + $0x70] sm:$0xff]  }
  0xd7   : > { %3826 = vperm.xlu1 %5631, %v3683_v52   ;;  %v5774_v52 = vld [vmem:[%s5977_s22 + $0x78] sm:$0xff]  }
  0xd8   : > { %5310 = vmatmul.mubr.msk.bf16.gmra.mrb[40].mxu0 %vm378_vm2, %v5722_v45 }
  0xd9   : > { %5313 = vmatprep.mubr.msk.bf16.mxu0 %vm378_vm2, %v5724_v46  ;;  %v5752_v46 = vld [vmem:[%s5977_s22 + $0x20] sm:$0xff]  }
  0xda   : > { %5208 = vmatmul.mubr.msk.bf16.gmra.mrb[40].mxu1 %vm378_vm2, %v5723_v47 }
  0xdb   : > { %5211 = vmatprep.mubr.msk.bf16.mxu1 %vm378_vm2, %v5725_v48  ;;  %v5751_v48 = vld [vmem:[%s5977_s22 + $0x18] sm:$0xff]   ;;  %3836 = vperm.xlu1 %5631, %v3685_v55  }
  0xe0   : > { %5314 = vmatmul.mubr.msk.bf16.gmra.mrb[44].mxu0 %vm378_vm2, %v5726_v51  ;;  %v5753_v51 = vld [vmem:[%s5977_s22 + $0x20] sm:$0xff]  }
  0xe1   : > { %5317 = vmatprep.mubr.msk.bf16.mxu0 %vm378_vm2, %v5728_v53 }
  0xe2   : > { %5212 = vmatmul.mubr.msk.bf16.gmra.mrb[44].mxu1 %vm378_vm2, %v5727_v54  ;;  %v3684_v54 = vld [vmem:[%s7317_s2 + $0xe0] sm:$0xff] }
  0xe3   : > { %5215 = vmatprep.mubr.msk.bf16.mxu1 %vm378_vm2, %v5729_v56  ;;  %v5754_v56 = vld [vmem:[%s5977_s22 + $0x28] sm:$0xff]   ;;  %3831 = vperm.xlu0 %5630, %v3684_v54  }
  0xe8   : > { %5318 = vmatmul.mubr.msk.bf16.gmra.mrb[48].mxu0 %vm378_vm2, %v5730_v60  ;;  %v5755_v60 = vld [vmem:[%s5977_s22 + $0x28] sm:$0xff]  }
  0xe9   : > { %5321 = vmatprep.mubr.msk.bf16.mxu0 %vm378_vm2, %v5732_v61  ;;  %v3686_v61 = vld [vmem:[%s7317_s2 + $0xf0] sm:$0xff] }
  0xea   : > { %5216 = vmatmul.mubr.msk.bf16.gmra.mrb[48].mxu1 %vm378_vm2, %v5731_v62  ;;  %3841 = vperm.xlu0 %5630, %v3686_v61  }
  0xeb   : > { %5219 = vmatprep.mubr.msk.bf16.mxu1 %vm378_vm2, %v5733_v0  ;;  %v3687_v0 = vld [vmem:[%s7317_s2 + $0xf8] sm:$0xff] }
  0xec   : > { %3846 = vperm.xlu1 %5631, %v3687_v0  }
  0xf0   : > { %5322 = vmatmul.mubr.msk.bf16.gmra.mrb[52].mxu0 %vm378_vm2, %v5734_v4 }
  0xf1   : > { %5325 = vmatprep.mubr.msk.bf16.mxu0 %vm378_vm2, %v5736_v5  ;;  %v5758_v5 = vld [vmem:[%s5977_s22 + $0x38] sm:$0xff]  }
  0xf2   : > { %5220 = vmatmul.mubr.msk.bf16.gmra.mrb[52].mxu1 %vm378_vm2, %v5735_v6 }
  0xf3   : > { %5223 = vmatprep.mubr.msk.bf16.mxu1 %vm378_vm2, %v5737_v8  ;;  %v5760_v8 = vld [vmem:[%s5977_s22 + $0x40] sm:$0xff]  }
  0xf8   : > { %5326 = vmatmul.mubr.msk.bf16.gmra.mrb[56].mxu0 %vm378_vm2, %v5738_v12 }
  0xf9   : > { %5329 = vmatprep.mubr.msk.bf16.mxu0 %vm378_vm2, %v5740_v13  ;;  %v5761_v13 = vld [vmem:[%s5977_s22 + $0x40] sm:$0xff]  }
  0xfa   : > { %5224 = vmatmul.mubr.msk.bf16.gmra.mrb[56].mxu1 %vm378_vm2, %v5739_v14 }
  0xfb   : > { %5227 = vmatprep.mubr.msk.bf16.mxu1 %vm378_vm2, %v5741_v16 }
  0xfc   : > { %v6260_v21 = vpop.f32.mrb[0].mxu1 }
  0xfd   : > { %v6263_v23 = vpop.f32.mrb[1].mxu1 }
  0xfe   : > { %v6269_v26 = vpop.f32.mrb[2].mxu1 }
  0xff   : > { %v6275_v29 = vpop.f32.mrb[3].mxu1 }
 0x100   : > { %5330 = vmatmul.mubr.msk.bf16.gmra.mrb[60].mxu0 %vm378_vm2, %v5742_v20  ;;  %v5764_v20 = vld [vmem:[%s5977_s22 + $0x50] sm:$0xff]  }
 0x101   : > { %5335 = vmatprep.mubr.msk.bf16.mxu0 %vm378_vm2, %v5744_v22 }
 0x102   : > { %5228 = vmatmul.mubr.msk.bf16.gmra.mrb[60].mxu1 %vm378_vm2, %v5743_v24 }
 0x103   : > { %5233 = vmatprep.mubr.msk.bf16.mxu1 %vm378_vm2, %v5745_v27 }
 0x104   : > { %v6288_v33 = vpop.f32.mrb[4].mxu1 }
 0x105   : > { %v6291_v35 = vpop.f32.mrb[5].mxu1 }
 0x106   : > { %v6297_v38 = vpop.f32.mrb[6].mxu1 }
 0x107   : > { %v6303_v41 = vpop.f32.mrb[7].mxu1 }
 0x108   : > { %5336 = vmatmul.mubr.msk.bf16.vlgmr.msra.gmra.mrb[32].mxu0 %vm378_vm2, %v5746_v32  ;;  %v5768_v32 = vld [vmem:[%s5977_s22 + $0x60] sm:$0xff]  }
 0x109   : > { %5339 = vmatprep.mubr.msk.bf16.mxu0 %vm378_vm2, %v5748_v34 }
 0x10a   : > { %5234 = vmatmul.mubr.msk.bf16.vlgmr.msra.gmra.mrb[32].mxu1 %vm378_vm2, %v5747_v36 }
 0x10b   : > { %5237 = vmatprep.mubr.msk.bf16.mxu1 %vm378_vm2, %v5749_v39 }
 0x10c   : > { %v6316_v45 = vpop.f32.mrb[8].mxu1 }
 0x10d   : > { %v6319_v47 = vpop.f32.mrb[9].mxu1 }
 0x10e   : > { %v6325_v50 = vpop.f32.mrb[10].mxu1 }
 0x10f   : > { %v6331_v53 = vpop.f32.mrb[11].mxu1 }
 0x110   : > { %5340 = vmatmul.mubr.msk.bf16.gmra.mrb[36].mxu0 %vm378_vm2, %v5750_v44  ;;  %v5772_v44 = vld [vmem:[%s5977_s22 + $0x70] sm:$0xff]  }
 0x111   : > { %5343 = vmatprep.mubr.msk.bf16.mxu0 %vm378_vm2, %v5752_v46 }
 0x112   : > { %5238 = vmatmul.mubr.msk.bf16.gmra.mrb[36].mxu1 %vm378_vm2, %v5751_v48 }
 0x113   : > { %5241 = vmatprep.mubr.msk.bf16.mxu1 %vm378_vm2, %v5753_v51 }
 0x114   : > { %v6344_v57 = vpop.f32.mrb[12].mxu1 }
 0x115   : > { %v6347_v59 = vpop.f32.mrb[13].mxu1 }
 0x116   : > { %v6353_v62 = vpop.f32.mrb[14].mxu1 }
 0x117   : > { %v6359_v1 = vpop.f32.mrb[15].mxu1 }
 0x118   : > { %5344 = vmatmul.mubr.msk.bf16.gmra.mrb[40].mxu0 %vm378_vm2, %v5754_v56 }
 0x119   : > { %5347 = vmatprep.mubr.msk.bf16.mxu0 %vm378_vm2, %v5756_v58  ;;  %v5775_v58 = vld [vmem:[%s5977_s22 + $0x78] sm:$0xff]  }
 0x11a   : > { %5242 = vmatmul.mubr.msk.bf16.gmra.mrb[40].mxu1 %vm378_vm2, %v5755_v60 }
 0x11b   : > { %v5133_v2 = vpop.f32.mrb[0].mxu0  ;;  %5245 = vmatprep.mubr.msk.bf16.mxu1 %vm378_vm2, %v5757_v63 }
 0x11c   : > { %v5369_v3 = vadd.f32 %v5133_v2, %v6260_v21  ;;  %v1089_v4 = vpop.f32.mrb[1].mxu0 }
 0x11d   : > { %v5370_v6 = vadd.f32 %v1089_v4, %v6263_v23  ;;  %v5134_v7 = vpop.f32.mrb[2].mxu0  ;;  %v5763_v23 = vld [vmem:[%s5977_s22 + $0x48] sm:$0xff]  }
 0x11e   : > { %1251 = vst.msk [vmem:[%s6370_s27 + $0x10] sm:$0xff] %vm378_vm2, %v5369_v3  ;;  %v5371_v9 = vadd.f32 %v5134_v7, %v6269_v26  ;;  %v1092_v10 = vpop.f32.mrb[3].mxu0 }
 0x11f   : > { %1249 = vst.msk [vmem:[%s6370_s27] sm:$0xff] %vm378_vm2, %v5370_v6  ;;  %v5372_v12 = vadd.f32 %v1092_v10, %v6275_v29  ;;  %v5766_v29 = vld [vmem:[%s5977_s22 + $0x58] sm:$0xff]  }
 0x120   : > { %1252 = vst.msk [vmem:[%s6370_s27 + $0x18] sm:$0xff] %vm378_vm2, %v5371_v9  ;;  %5348 = vmatmul.mubr.msk.bf16.gmra.mrb[44].mxu0 %vm378_vm2, %v5758_v5 }
 0x121   : > { %1250 = vst.msk [vmem:[%s6370_s27 + $0x8] sm:$0xff] %vm378_vm2, %v5372_v12  ;;  %5351 = vmatprep.mubr.msk.bf16.mxu0 %vm378_vm2, %v5760_v8 }
 0x122   : > { %5246 = vmatmul.mubr.msk.bf16.gmra.mrb[44].mxu1 %vm378_vm2, %v5759_v11 }
 0x123   : > { %v5137_v14 = vpop.f32.mrb[4].mxu0  ;;  %5249 = vmatprep.mubr.msk.bf16.mxu1 %vm378_vm2, %v5761_v13 }
 0x124   : > { %v5373_v15 = vadd.f32 %v5137_v14, %v6288_v33  ;;  %v1105_v16 = vpop.f32.mrb[5].mxu0 }
 0x125   : > { %v5374_v18 = vadd.f32 %v1105_v16, %v6291_v35  ;;  %v5138_v19 = vpop.f32.mrb[6].mxu0  ;;  %v5767_v35 = vld [vmem:[%s5977_s22 + $0x58] sm:$0xff]  }
 0x126   : > { %1255 = vst.msk [vmem:[%s6370_s27 + $0x30] sm:$0xff] %vm378_vm2, %v5373_v15  ;;  %v5375_v21 = vadd.f32 %v5138_v19, %v6297_v38  ;;  %v1108_v22 = vpop.f32.mrb[7].mxu0 }
 0x127   : > { %1253 = vst.msk [vmem:[%s6370_s27 + $0x20] sm:$0xff] %vm378_vm2, %v5374_v18  ;;  %v5376_v24 = vadd.f32 %v1108_v22, %v6303_v41  ;;  %v5770_v41 = vld [vmem:[%s5977_s22 + $0x68] sm:$0xff]  }
 0x128   : > { %1256 = vst.msk [vmem:[%s6370_s27 + $0x38] sm:$0xff] %vm378_vm2, %v5375_v21  ;;  %5352 = vmatmul.mubr.msk.bf16.gmra.mrb[48].mxu0 %vm378_vm2, %v5762_v17 }
 0x129   : > { %1254 = vst.msk [vmem:[%s6370_s27 + $0x28] sm:$0xff] %vm378_vm2, %v5376_v24  ;;  %5355 = vmatprep.mubr.msk.bf16.mxu0 %vm378_vm2, %v5764_v20 }
 0x12a   : > { %5250 = vmatmul.mubr.msk.bf16.gmra.mrb[48].mxu1 %vm378_vm2, %v5763_v23 }
 0x12b   : > { %v5141_v26 = vpop.f32.mrb[8].mxu0  ;;  %5253 = vmatprep.mubr.msk.bf16.mxu1 %vm378_vm2, %v5765_v25 }
 0x12c   : > { %v5377_v27 = vadd.f32 %v5141_v26, %v6316_v45  ;;  %v1121_v28 = vpop.f32.mrb[9].mxu0 }
 0x12d   : > { %v5378_v30 = vadd.f32 %v1121_v28, %v6319_v47  ;;  %v5142_v31 = vpop.f32.mrb[10].mxu0  ;;  %v5771_v47 = vld [vmem:[%s5977_s22 + $0x68] sm:$0xff]  }
 0x12e   : > { %1259 = vst.msk [vmem:[%s6370_s27 + $0x50] sm:$0xff] %vm378_vm2, %v5377_v27  ;;  %v5379_v33 = vadd.f32 %v5142_v31, %v6325_v50  ;;  %v1124_v34 = vpop.f32.mrb[11].mxu0 }
 0x12f   : > { %1257 = vst.msk [vmem:[%s6370_s27 + $0x40] sm:$0xff] %vm378_vm2, %v5378_v30  ;;  %v5380_v36 = vadd.f32 %v1124_v34, %v6331_v53 }
 0x130   : > { %1260 = vst.msk [vmem:[%s6370_s27 + $0x58] sm:$0xff] %vm378_vm2, %v5379_v33  ;;  %5356 = vmatmul.mubr.msk.bf16.gmra.mrb[52].mxu0 %vm378_vm2, %v5766_v29 }
 0x131   : > { %1258 = vst.msk [vmem:[%s6370_s27 + $0x48] sm:$0xff] %vm378_vm2, %v5380_v36  ;;  %5359 = vmatprep.mubr.msk.bf16.mxu0 %vm378_vm2, %v5768_v32  ;;  %v2322_v36 = vlaneseq }
 0x132   : > { %5254 = vmatmul.mubr.msk.bf16.gmra.mrb[52].mxu1 %vm378_vm2, %v5767_v35 }
 0x133   : > { %v5145_v38 = vpop.f32.mrb[12].mxu0  ;;  %5257 = vmatprep.mubr.msk.bf16.mxu1 %vm378_vm2, %v5769_v37  ;;  %v6484_v37 = vshrl.u32 %v2322_v36, 7 }
 0x134   : > { %v5381_v39 = vadd.f32 %v5145_v38, %v6344_v57  ;;  %v1137_v40 = vpop.f32.mrb[13].mxu0 }
 0x135   : > { %v5382_v42 = vadd.f32 %v1137_v40, %v6347_v59  ;;  %v5146_v43 = vpop.f32.mrb[14].mxu0  ;;  %vm3495_vm3 = vcmp.lt.s32.totalorder %v6484_v37, 7  ;;  %vm2324_vm4 = vcmp.lt.s32.totalorder %v6484_v37, 1 }
 0x136   : > { %1263 = vst.msk [vmem:[%s6370_s27 + $0x70] sm:$0xff] %vm378_vm2, %v5381_v39  ;;  %v5383_v45 = vadd.f32 %v5146_v43, %v6353_v62  ;;  %v1140_v46 = vpop.f32.mrb[15].mxu0 }
 0x137   : > { %1261 = vst.msk [vmem:[%s6370_s27 + $0x60] sm:$0xff] %vm378_vm2, %v5382_v42  ;;  %v5384_v48 = vadd.f32 %v1140_v46, %v6359_v1 }
 0x138   : > { %1264 = vst.msk [vmem:[%s6370_s27 + $0x78] sm:$0xff] %vm378_vm2, %v5383_v45  ;;  %5360 = vmatmul.mubr.msk.bf16.gmra.mrb[56].mxu0 %vm378_vm2, %v5770_v41 }
 0x139   : > { %1262 = vst.msk [vmem:[%s6370_s27 + $0x68] sm:$0xff] %vm378_vm2, %v5384_v48  ;;  %5363 = vmatprep.mubr.msk.bf16.mxu0 %vm378_vm2, %v5772_v44 }
 0x13a   : > { %5258 = vmatmul.mubr.msk.bf16.gmra.mrb[56].mxu1 %vm378_vm2, %v5771_v47 }
 0x13b   : > { %v5149_v50 = vpop.f32.mrb[16].mxu0  ;;  %5261 = vmatprep.mubr.msk.bf16.mxu1 %vm378_vm2, %v5773_v49 }
 0x13c   : > { %v1153_v51 = vpop.f32.mrb[17].mxu0 }
 0x13d   : > { %v5115_v53 = vpop.f32.mrb[16].mxu1  ;;  %v5150_v54 = vpop.f32.mrb[18].mxu0 }
 0x13e   : > { %v5385_v55 = vadd.f32 %v5149_v50, %v5115_v53  ;;  %v821_v56 = vpop.f32.mrb[17].mxu1  ;;  %v1156_v57 = vpop.f32.mrb[19].mxu0 }
 0x13f   : > { %v5386_v59 = vadd.f32 %v1153_v51, %v821_v56  ;;  %v5116_v60 = vpop.f32.mrb[18].mxu1 }
 0x140   : > { %1267 = vst.msk [vmem:[%s6370_s27 + $0x90] sm:$0xff] %vm378_vm2, %v5385_v55  ;;  %v5387_v61 = vadd.f32 %v5150_v54, %v5116_v60  ;;  %v824_v62 = vpop.f32.mrb[19].mxu1  ;;  %5364 = vmatmul.mubr.msk.bf16.gmra.mrb[60].mxu0 %vm378_vm2, %v5774_v52 }
 0x141   : > { %1265 = vst.msk [vmem:[%s6370_s27 + $0x80] sm:$0xff] %vm378_vm2, %v5386_v59  ;;  %v5388_v63 = vadd.f32 %v1156_v57, %v824_v62  ;;  %v2358_v62 = vld [vmem:[%s6370_s27 + $0x8] sm:$0xff] }
 0x142   : > { %1268 = vst.msk [vmem:[%s6370_s27 + $0x98] sm:$0xff] %vm378_vm2, %v5387_v61  ;;  %5262 = vmatmul.mubr.msk.bf16.gmra.mrb[60].mxu1 %vm378_vm2, %v5775_v58  ;;  %v2360_v58 = vld [vmem:[%s6370_s27 + $0x18] sm:$0xff] }
 0x143   : > { %1266 = vst.msk [vmem:[%s6370_s27 + $0x88] sm:$0xff] %vm378_vm2, %v5388_v63  ;;  %v5153_v0 = vpop.f32.mrb[20].mxu0  ;;  %v2359_v63 = vld [vmem:[%s6370_s27 + $0x10] sm:$0xff] }
 0x144   : > { %v1169_v1 = vpop.f32.mrb[21].mxu0 }
 0x145   : > { %v5119_v2 = vpop.f32.mrb[20].mxu1  ;;  %v5154_v3 = vpop.f32.mrb[22].mxu0 }
 0x146   : > { %v5389_v4 = vadd.f32 %v5153_v0, %v5119_v2  ;;  %v837_v5 = vpop.f32.mrb[21].mxu1  ;;  %v1172_v6 = vpop.f32.mrb[23].mxu0 }
 0x147   : > { %v5390_v7 = vadd.f32 %v1169_v1, %v837_v5  ;;  %v5120_v8 = vpop.f32.mrb[22].mxu1 }
 0x148   : > { %1271 = vst.msk [vmem:[%s6370_s27 + $0xb0] sm:$0xff] %vm378_vm2, %v5389_v4  ;;  %v5391_v9 = vadd.f32 %v5154_v3, %v5120_v8  ;;  %v840_v10 = vpop.f32.mrb[23].mxu1 }
 0x149   : > { %1269 = vst.msk [vmem:[%s6370_s27 + $0xa0] sm:$0xff] %vm378_vm2, %v5390_v7  ;;  %v5392_v11 = vadd.f32 %v1172_v6, %v840_v10 }
 0x14a   : > { %1272 = vst.msk [vmem:[%s6370_s27 + $0xb8] sm:$0xff] %vm378_vm2, %v5391_v9 }
 0x14b   : > { %1270 = vst.msk [vmem:[%s6370_s27 + $0xa8] sm:$0xff] %vm378_vm2, %v5392_v11  ;;  %v5157_v12 = vpop.f32.mrb[24].mxu0 }
 0x14c   : > { %v1185_v13 = vpop.f32.mrb[25].mxu0 }
 0x14d   : > { %v5123_v14 = vpop.f32.mrb[24].mxu1  ;;  %v5158_v15 = vpop.f32.mrb[26].mxu0 }
 0x14e   : > { %v5393_v16 = vadd.f32 %v5157_v12, %v5123_v14  ;;  %v853_v17 = vpop.f32.mrb[25].mxu1  ;;  %v1188_v18 = vpop.f32.mrb[27].mxu0 }
 0x14f   : > { %v5394_v19 = vadd.f32 %v1185_v13, %v853_v17  ;;  %v5124_v20 = vpop.f32.mrb[26].mxu1 }
 0x150   : > { %1275 = vst.msk [vmem:[%s6370_s27 + $0xd0] sm:$0xff] %vm378_vm2, %v5393_v16  ;;  %v5395_v21 = vadd.f32 %v5158_v15, %v5124_v20  ;;  %v856_v22 = vpop.f32.mrb[27].mxu1  ;;  %v2361_v20 = vld [vmem:[%s6370_s27 + $0x20] sm:$0xff] }
 0x151   : > { %1273 = vst.msk [vmem:[%s6370_s27 + $0xc0] sm:$0xff] %vm378_vm2, %v5394_v19  ;;  %v5396_v23 = vadd.f32 %v1188_v18, %v856_v22 }
 0x152   : > { %1276 = vst.msk [vmem:[%s6370_s27 + $0xd8] sm:$0xff] %vm378_vm2, %v5395_v21 }
 0x153   : > { %1274 = vst.msk [vmem:[%s6370_s27 + $0xc8] sm:$0xff] %vm378_vm2, %v5396_v23  ;;  %v5161_v24 = vpop.f32.mrb[28].mxu0 }
 0x154   : > { %v1201_v25 = vpop.f32.mrb[29].mxu0 }
 0x155   : > { %v5127_v26 = vpop.f32.mrb[28].mxu1  ;;  %v5162_v27 = vpop.f32.mrb[30].mxu0 }
 0x156   : > { %v5397_v28 = vadd.f32 %v5161_v24, %v5127_v26  ;;  %v869_v29 = vpop.f32.mrb[29].mxu1  ;;  %v1204_v30 = vpop.f32.mrb[31].mxu0  ;;  %v2364_v26 = vld [vmem:[%s6370_s27 + $0x38] sm:$0xff] }
 0x157   : > { %v5398_v31 = vadd.f32 %v1201_v25, %v869_v29  ;;  %v5128_v32 = vpop.f32.mrb[30].mxu1 }
 0x158   : > { %1279 = vst.msk [vmem:[%s6370_s27 + $0xf0] sm:$0xff] %vm378_vm2, %v5397_v28  ;;  %v5399_v33 = vadd.f32 %v5162_v27, %v5128_v32  ;;  %v872_v34 = vpop.f32.mrb[31].mxu1 }
 0x159   : > { %1277 = vst.msk [vmem:[%s6370_s27 + $0xe0] sm:$0xff] %vm378_vm2, %v5398_v31  ;;  %v5400_v35 = vadd.f32 %v1204_v30, %v872_v34  ;;  %v2362_v30 = vld [vmem:[%s6370_s27 + $0x28] sm:$0xff]  ;;  %v2363_v31 = vld [vmem:[%s6370_s27 + $0x30] sm:$0xff] }
 0x15a   : > { %1280 = vst.msk [vmem:[%s6370_s27 + $0xf8] sm:$0xff] %vm378_vm2, %v5399_v33 }
 0x15b   : > { %1278 = vst.msk [vmem:[%s6370_s27 + $0xe8] sm:$0xff] %vm378_vm2, %v5400_v35 }
 0x1db   : > { %v5337_v38 = vpop.f32.mrb[32].mxu0 }
 0x1dc   : > { %v6486_v39 = vpop.f32.mrb[33].mxu0  ;;  %v3465_v42 = vrot.slane %v5337_v38, 1 }
 0x1dd   : > { %v5235_v40 = vpop.f32.mrb[32].mxu1  ;;  %v5338_v41 = vpop.f32.mrb[34].mxu0  ;;  %v3463_v46 = vrot.slane %v6486_v39, 1  ;;  %v2388_v39 = vld [vmem:[%s6370_s27 + $0xf8] sm:$0xff] }
 0x1de   : > { %v6489_v43 = vpop.f32.mrb[33].mxu1  ;;  %v3466_v44 = vrot.slane %v5338_v41, 1  ;;  %v3307_v45 = vpop.f32.mrb[35].mxu0  ;;  %v2292_v49 = vrot.slane %v5235_v40, 7 }
 0x1df   : > { %v5236_v47 = vpop.f32.mrb[34].mxu1  ;;  %v3464_v48 = vrot.slane %v3307_v45, 1  ;;  %v2290_v53 = vrot.slane %v6489_v43, 7 }
 0x1e0   : > { %v6495_v50 = vsel %vm3495_vm3, %v3465_v42, %v3466_v44  ;;  %v2293_v51 = vrot.slane %v5236_v47, 7  ;;  %v2134_v52 = vpop.f32.mrb[35].mxu1 }
 0x1e1   : > { %v3525_v54 = vsel %vm3495_vm3, %v3464_v48, %v3465_v42  ;;  %v6504_v55 = vsel %vm3495_vm3, %v3463_v46, %v3464_v48  ;;  %v2291_v56 = vrot.slane %v2134_v52, 7 }
 0x1e2   : > { %v2353_v57 = vsel %vm2324_vm4, %v2292_v49, %v2293_v51 }
 0x1e3   : > { %v2392_v59 = vadd.f32 %v2360_v58, %v2353_v57  ;;  %v2354_v60 = vsel %vm2324_vm4, %v2291_v56, %v2292_v49  ;;  %v2355_v61 = vsel %vm2324_vm4, %v2290_v53, %v2291_v56  ;;  %v5341_v0 = vpop.f32.mrb[36].mxu0 }
 0x1e4   : > { %v2390_v1 = vadd.f32 %v2358_v62, %v2355_v61  ;;  %v2391_v2 = vadd.f32 %v2359_v63, %v2354_v60  ;;  %v3320_v3 = vpop.f32.mrb[37].mxu0  ;;  %v3469_v7 = vrot.slane %v5341_v0, 1  ;;  %v2365_v0 = vld [vmem:[%s6370_s27 + $0x40] sm:$0xff] }
 0x1e5   : > { %2424 = vst.msk [vmem:[%s6370_s27 + $0x18] sm:$0xff] %vm378_vm2, %v2392_v59  ;;  %v5239_v4 = vpop.f32.mrb[36].mxu1  ;;  %v3467_v5 = vrot.slane %v3320_v3, 1  ;;  %v5342_v6 = vpop.f32.mrb[38].mxu0 }
 0x1e6   : > { %2422 = vst.msk [vmem:[%s6370_s27 + $0x8] sm:$0xff] %vm378_vm2, %v2390_v1  ;;  %2423 = vst.msk [vmem:[%s6370_s27 + $0x10] sm:$0xff] %vm378_vm2, %v2391_v2  ;;  %v2147_v8 = vpop.f32.mrb[37].mxu1  ;;  %v3470_v9 = vrot.slane %v5342_v6, 1  ;;  %v3323_v10 = vpop.f32.mrb[39].mxu0  ;;  %v2296_v15 = vrot.slane %v5239_v4, 7 }
 0x1e7   : > { %v3523_v11 = vsel %vm3495_vm3, %v3466_v44, %v3467_v5  ;;  %v2294_v12 = vrot.slane %v2147_v8, 7  ;;  %v5240_v13 = vpop.f32.mrb[38].mxu1  ;;  %v3468_v14 = vrot.slane %v3323_v10, 1  ;;  %v2368_v6 = vld [vmem:[%s6370_s27 + $0x58] sm:$0xff] }
 0x1e8   : > { %v6527_v16 = vsel %vm3495_vm3, %v3469_v7, %v3470_v9  ;;  %v2297_v17 = vrot.slane %v5240_v13, 7  ;;  %v2150_v18 = vpop.f32.mrb[39].mxu1 }
 0x1e9   : > { %v2352_v19 = vsel %vm2324_vm4, %v2293_v51, %v2294_v12  ;;  %v6534_v21 = vsel %vm3495_vm3, %v3468_v14, %v3469_v7  ;;  %v3522_v22 = vsel %vm3495_vm3, %v3467_v5, %v3468_v14  ;;  %v2295_v23 = vrot.slane %v2150_v18, 7 }
 0x1ea   : > { %v2393_v24 = vadd.f32 %v2361_v20, %v2352_v19  ;;  %v2349_v25 = vsel %vm2324_vm4, %v2296_v15, %v2297_v17 }
 0x1eb   : > { %v2396_v27 = vadd.f32 %v2364_v26, %v2349_v25  ;;  %v2350_v28 = vsel %vm2324_vm4, %v2295_v23, %v2296_v15  ;;  %v2351_v29 = vsel %vm2324_vm4, %v2294_v12, %v2295_v23  ;;  %v5345_v32 = vpop.f32.mrb[40].mxu0  ;;  %v2367_v12 = vld [vmem:[%s6370_s27 + $0x50] sm:$0xff] }
 0x1ec   : > { %v3531_v33 = vld [vmem:[%s6370_s27 + $0x18] sm:$0xff]  ;;  %2425 = vst.msk [vmem:[%s6370_s27 + $0x20] sm:$0xff] %vm378_vm2, %v2393_v24  ;;  %v2394_v34 = vadd.f32 %v2362_v30, %v2351_v29  ;;  %v2395_v35 = vadd.f32 %v2363_v31, %v2350_v28  ;;  %v3336_v36 = vpop.f32.mrb[41].mxu0  ;;  %v3473_v49 = vrot.slane %v5345_v32, 1 }
 0x1ed   : > { %v3529_v38 = vld [vmem:[%s6370_s27 + $0x8] sm:$0xff]  ;;  %v3530_v40 = vld [vmem:[%s6370_s27 + $0x10] sm:$0xff]  ;;  %v3563_v41 = vadd.f32 %v3531_v33, %v3523_v11  ;;  %2428 = vst.msk [vmem:[%s6370_s27 + $0x38] sm:$0xff] %vm378_vm2, %v2396_v27  ;;  %v5243_v42 = vpop.f32.mrb[40].mxu1  ;;  %v3471_v44 = vrot.slane %v3336_v36, 1  ;;  %v5346_v45 = vpop.f32.mrb[42].mxu0 }
 0x1ee   : > { %v3561_v47 = vadd.f32 %v3529_v38, %v3525_v54  ;;  %v3562_v48 = vadd.f32 %v3530_v40, %v6495_v50  ;;  %2426 = vst.msk [vmem:[%s6370_s27 + $0x28] sm:$0xff] %vm378_vm2, %v2394_v34  ;;  %2427 = vst.msk [vmem:[%s6370_s27 + $0x30] sm:$0xff] %vm378_vm2, %v2395_v35  ;;  %v2163_v51 = vpop.f32.mrb[41].mxu1  ;;  %v3474_v52 = vrot.slane %v5346_v45, 1  ;;  %v3339_v56 = vpop.f32.mrb[43].mxu0  ;;  %v2300_v50 = vrot.slane %v5243_v42, 7 }
 0x1ef   : > { %3595 = vst.msk [vmem:[%s6370_s27 + $0x18] sm:$0xff] %vm378_vm2, %v3563_v41  ;;  %v3519_v57 = vsel %vm3495_vm3, %v3470_v9, %v3471_v44  ;;  %v2298_v58 = vrot.slane %v2163_v51, 7  ;;  %v5244_v59 = vpop.f32.mrb[42].mxu1  ;;  %v3472_v54 = vrot.slane %v3339_v56, 1  ;;  %v2366_v11 = vld [vmem:[%s6370_s27 + $0x48] sm:$0xff]  ;;  %v2369_v38 = vld [vmem:[%s6370_s27 + $0x60] sm:$0xff] }
 0x1f0   : > { %3593 = vst.msk [vmem:[%s6370_s27 + $0x8] sm:$0xff] %vm378_vm2, %v3561_v47  ;;  %3594 = vst.msk [vmem:[%s6370_s27 + $0x10] sm:$0xff] %vm378_vm2, %v3562_v48  ;;  %v6569_v60 = vsel %vm3495_vm3, %v3473_v49, %v3474_v52  ;;  %v2301_v61 = vrot.slane %v5244_v59, 7  ;;  %v2166_v62 = vpop.f32.mrb[43].mxu1 }
 0x1f1   : > { %v2348_v63 = vsel %vm2324_vm4, %v2297_v17, %v2298_v58  ;;  %v6576_v1 = vsel %vm3495_vm3, %v3472_v54, %v3473_v49  ;;  %v3518_v2 = vsel %vm3495_vm3, %v3471_v44, %v3472_v54  ;;  %v2299_v3 = vrot.slane %v2166_v62, 7  ;;  %v2372_v54 = vld [vmem:[%s6370_s27 + $0x78] sm:$0xff] }
 0x1f2   : > { %v2397_v4 = vadd.f32 %v2365_v0, %v2348_v63  ;;  %v2345_v5 = vsel %vm2324_vm4, %v2300_v50, %v2301_v61 }
 0x1f3   : > { %v3532_v7 = vld [vmem:[%s6370_s27 + $0x20] sm:$0xff]  ;;  %v2400_v8 = vadd.f32 %v2368_v6, %v2345_v5  ;;  %v2346_v9 = vsel %vm2324_vm4, %v2299_v3, %v2300_v50  ;;  %v2347_v10 = vsel %vm2324_vm4, %v2298_v58, %v2299_v3  ;;  %v5349_v13 = vpop.f32.mrb[44].mxu0 }
 0x1f4   : > { %v3564_v14 = vadd.f32 %v3532_v7, %v3522_v22  ;;  %v3535_v15 = vld [vmem:[%s6370_s27 + $0x38] sm:$0xff]  ;;  %2429 = vst.msk [vmem:[%s6370_s27 + $0x40] sm:$0xff] %vm378_vm2, %v2397_v4  ;;  %v2398_v17 = vadd.f32 %v2366_v11, %v2347_v10  ;;  %v2399_v18 = vadd.f32 %v2367_v12, %v2346_v9  ;;  %v3352_v19 = vpop.f32.mrb[45].mxu0  ;;  %v3477_v32 = vrot.slane %v5349_v13, 1  ;;  %v2371_v9 = vld [vmem:[%s6370_s27 + $0x70] sm:$0xff] }
 0x1f5   : > { %v3533_v20 = vld [vmem:[%s6370_s27 + $0x28] sm:$0xff]  ;;  %v3534_v23 = vld [vmem:[%s6370_s27 + $0x30] sm:$0xff]  ;;  %v3567_v24 = vadd.f32 %v3535_v15, %v3519_v57  ;;  %2432 = vst.msk [vmem:[%s6370_s27 + $0x58] sm:$0xff] %vm378_vm2, %v2400_v8  ;;  %v5247_v25 = vpop.f32.mrb[44].mxu1  ;;  %v3475_v26 = vrot.slane %v3352_v19, 1  ;;  %v6597_v27 = vpop.f32.mrb[46].mxu0 }
 0x1f6   : > { %3596 = vst.msk [vmem:[%s6370_s27 + $0x20] sm:$0xff] %vm378_vm2, %v3564_v14  ;;  %v3565_v22 = vadd.f32 %v3533_v20, %v6534_v21  ;;  %v3566_v28 = vadd.f32 %v3534_v23, %v6527_v16  ;;  %2430 = vst.msk [vmem:[%s6370_s27 + $0x48] sm:$0xff] %vm378_vm2, %v2398_v17  ;;  %v2179_v29 = vpop.f32.mrb[45].mxu1  ;;  %v3478_v30 = vrot.slane %v6597_v27, 1  ;;  %v3355_v31 = vpop.f32.mrb[47].mxu0  ;;  %v2304_v41 = vrot.slane %v5247_v25, 7 }
 0x1f7   : > { %2431 = vst.msk [vmem:[%s6370_s27 + $0x50] sm:$0xff] %vm378_vm2, %v2399_v18  ;;  %3599 = vst.msk [vmem:[%s6370_s27 + $0x38] sm:$0xff] %vm378_vm2, %v3567_v24  ;;  %v3515_v33 = vsel %vm3495_vm3, %v3474_v52, %v3475_v26  ;;  %v2302_v21 = vrot.slane %v2179_v29, 7  ;;  %v5248_v34 = vpop.f32.mrb[46].mxu1  ;;  %v3476_v45 = vrot.slane %v3355_v31, 1  ;;  %v2370_v8 = vld [vmem:[%s6370_s27 + $0x68] sm:$0xff] }
 0x1f8   : > { %3597 = vst.msk [vmem:[%s6370_s27 + $0x28] sm:$0xff] %vm378_vm2, %v3565_v22  ;;  %3598 = vst.msk [vmem:[%s6370_s27 + $0x30] sm:$0xff] %vm378_vm2, %v3566_v28  ;;  %v2182_v16 = vpop.f32.mrb[47].mxu1  ;;  %v6620_v36 = vsel %vm3495_vm3, %v3477_v32, %v3478_v30  ;;  %v2305_v44 = vrot.slane %v5248_v34, 7  ;;  %v2373_v22 = vld [vmem:[%s6370_s27 + $0x80] sm:$0xff] }
 0x1f9   : > { %v2344_v35 = vsel %vm2324_vm4, %v2301_v61, %v2302_v21  ;;  %v2303_v51 = vrot.slane %v2182_v16, 7  ;;  %v3513_v50 = vsel %vm3495_vm3, %v3476_v45, %v3477_v32  ;;  %v3514_v61 = vsel %vm3495_vm3, %v3475_v26, %v3476_v45 }
 0x1fa   : > { %v2401_v42 = vadd.f32 %v2369_v38, %v2344_v35  ;;  %v2341_v59 = vsel %vm2324_vm4, %v2304_v41, %v2305_v44  ;;  %v2376_v38 = vld [vmem:[%s6370_s27 + $0x98] sm:$0xff] }
 0x1fb   : > { %v3536_v40 = vld [vmem:[%s6370_s27 + $0x40] sm:$0xff]  ;;  %v6624_v47 = vpop.f32.mrb[48].mxu0  ;;  %v2404_v3 = vadd.f32 %v2372_v54, %v2341_v59  ;;  %v2342_v6 = vsel %vm2324_vm4, %v2303_v51, %v2304_v41  ;;  %v2343_v7 = vsel %vm2324_vm4, %v2302_v21, %v2303_v51 }
 0x1fc   : > { %v3568_v48 = vadd.f32 %v3536_v40, %v3518_v2  ;;  %v3539_v49 = vld [vmem:[%s6370_s27 + $0x58] sm:$0xff]  ;;  %v6627_v52 = vpop.f32.mrb[49].mxu0  ;;  %2433 = vst.msk [vmem:[%s6370_s27 + $0x60] sm:$0xff] %vm378_vm2, %v2401_v42  ;;  %v3481_v20 = vrot.slane %v6624_v47, 1 }
 0x1fd   : > { %v3537_v56 = vld [vmem:[%s6370_s27 + $0x48] sm:$0xff]  ;;  %v3571_v58 = vadd.f32 %v3539_v49, %v3515_v33  ;;  %v6640_v62 = vpop.f32.mrb[48].mxu1  ;;  %v6642_v63 = vpop.f32.mrb[50].mxu0  ;;  %2436 = vst.msk [vmem:[%s6370_s27 + $0x78] sm:$0xff] %vm378_vm2, %v2404_v3  ;;  %v3479_v12 = vrot.slane %v6627_v52, 1 }
 0x1fe   : > { %v3538_v57 = vld [vmem:[%s6370_s27 + $0x50] sm:$0xff]  ;;  %3600 = vst.msk [vmem:[%s6370_s27 + $0x40] sm:$0xff] %vm378_vm2, %v3568_v48  ;;  %v3569_v0 = vadd.f32 %v3537_v56, %v6576_v1  ;;  %v2195_v4 = vpop.f32.mrb[49].mxu1  ;;  %v3371_v5 = vpop.f32.mrb[51].mxu0  ;;  %v2403_v1 = vadd.f32 %v2371_v9, %v2342_v6  ;;  %v3482_v23 = vrot.slane %v6642_v63, 1  ;;  %v2308_v26 = vrot.slane %v6640_v62, 7 }
 0x1ff   : > { %v3570_v2 = vadd.f32 %v3538_v57, %v6569_v60  ;;  %3603 = vst.msk [vmem:[%s6370_s27 + $0x58] sm:$0xff] %vm378_vm2, %v3571_v58  ;;  %v6656_v10 = vpop.f32.mrb[50].mxu1  ;;  %v2402_v60 = vadd.f32 %v2370_v8, %v2343_v7  ;;  %v3511_v15 = vsel %vm3495_vm3, %v3478_v30, %v3479_v12  ;;  %v2306_v17 = vrot.slane %v2195_v4, 7  ;;  %v2375_v58 = vld [vmem:[%s6370_s27 + $0x90] sm:$0xff] }
 0x200   : > { %3601 = vst.msk [vmem:[%s6370_s27 + $0x48] sm:$0xff] %vm378_vm2, %v3569_v0  ;;  %v2198_v11 = vpop.f32.mrb[51].mxu1  ;;  %2435 = vst.msk [vmem:[%s6370_s27 + $0x70] sm:$0xff] %vm378_vm2, %v2403_v1  ;;  %v2309_v28 = vrot.slane %v6656_v10, 7  ;;  %v3480_v29 = vrot.slane %v3371_v5, 1  ;;  %v6696_v21 = vsel %vm3495_vm3, %v3481_v20, %v3482_v23 }
 0x201   : > { %3602 = vst.msk [vmem:[%s6370_s27 + $0x50] sm:$0xff] %vm378_vm2, %v3570_v2  ;;  %2434 = vst.msk [vmem:[%s6370_s27 + $0x68] sm:$0xff] %vm378_vm2, %v2402_v60  ;;  %v2340_v27 = vsel %vm2324_vm4, %v2305_v44, %v2306_v17  ;;  %v2307_v51 = vrot.slane %v2198_v11, 7 }
 0x202   : > { %v2405_v33 = vadd.f32 %v2373_v22, %v2340_v27  ;;  %v2337_v35 = vsel %vm2324_vm4, %v2308_v26, %v2309_v28  ;;  %v6705_v40 = vsel %vm3495_vm3, %v3480_v29, %v3481_v20  ;;  %v3510_v47 = vsel %vm3495_vm3, %v3479_v12, %v3480_v29  ;;  %v2377_v12 = vld [vmem:[%s6370_s27 + $0xa0] sm:$0xff] }
 0x203   : > { %v6669_v13 = vpop.f32.mrb[52].mxu0  ;;  %v3540_v14 = vld [vmem:[%s6370_s27 + $0x60] sm:$0xff]  ;;  %v2408_v45 = vadd.f32 %v2376_v38, %v2337_v35  ;;  %v2338_v56 = vsel %vm2324_vm4, %v2307_v51, %v2308_v26  ;;  %v2339_v57 = vsel %vm2324_vm4, %v2306_v17, %v2307_v51 }
 0x204   : > { %v6674_v18 = vpop.f32.mrb[53].mxu0  ;;  %v3572_v19 = vadd.f32 %v3540_v14, %v3514_v61  ;;  %v3543_v32 = vld [vmem:[%s6370_s27 + $0x78] sm:$0xff]  ;;  %2437 = vst.msk [vmem:[%s6370_s27 + $0x80] sm:$0xff] %vm378_vm2, %v2405_v33  ;;  %v3485_v3 = vrot.slane %v6669_v13, 1 }
 0x205   : > { %v6678_v24 = vpop.f32.mrb[52].mxu1  ;;  %v6680_v25 = vpop.f32.mrb[54].mxu0  ;;  %v3575_v16 = vadd.f32 %v3543_v32, %v3511_v15  ;;  %2440 = vst.msk [vmem:[%s6370_s27 + $0x98] sm:$0xff] %vm378_vm2, %v2408_v45  ;;  %v3483_v63 = vrot.slane %v6674_v18, 1  ;;  %v2380_v18 = vld [vmem:[%s6370_s27 + $0xb8] sm:$0xff] }
 0x206   : > { %v6687_v30 = vpop.f32.mrb[53].mxu1  ;;  %v6689_v31 = vpop.f32.mrb[55].mxu0  ;;  %3604 = vst.msk [vmem:[%s6370_s27 + $0x60] sm:$0xff] %vm378_vm2, %v3572_v19  ;;  %v3486_v5 = vrot.slane %v6680_v25, 1  ;;  %v2312_v8 = vrot.slane %v6678_v24, 7 }
 0x207   : > { %v6698_v34 = vpop.f32.mrb[54].mxu1  ;;  %v3542_v44 = vld [vmem:[%s6370_s27 + $0x70] sm:$0xff]  ;;  %3607 = vst.msk [vmem:[%s6370_s27 + $0x78] sm:$0xff] %vm378_vm2, %v3575_v16  ;;  %v2310_v4 = vrot.slane %v6687_v30, 7  ;;  %v3507_v9 = vsel %vm3495_vm3, %v3482_v23, %v3483_v63  ;;  %v3484_v19 = vrot.slane %v6689_v31, 1 }
 0x208   : > { %v6707_v41 = vpop.f32.mrb[55].mxu1  ;;  %v3541_v42 = vld [vmem:[%s6370_s27 + $0x68] sm:$0xff]  ;;  %v3574_v49 = vadd.f32 %v3542_v44, %v6620_v36  ;;  %v2313_v10 = vrot.slane %v6698_v34, 7  ;;  %v6764_v13 = vsel %vm3495_vm3, %v3485_v3, %v3486_v5 }
 0x209   : > { %v3573_v48 = vadd.f32 %v3541_v42, %v3513_v50  ;;  %v2374_v36 = vld [vmem:[%s6370_s27 + $0x88] sm:$0xff]  ;;  %v2407_v50 = vadd.f32 %v2375_v58, %v2338_v56  ;;  %v2336_v11 = vsel %vm2324_vm4, %v2309_v28, %v2310_v4  ;;  %v3505_v25 = vsel %vm3495_vm3, %v3484_v19, %v3485_v3  ;;  %v2379_v42 = vld [vmem:[%s6370_s27 + $0xb0] sm:$0xff]  ;;  %v6822_v56 = vpop.permute.xlu0 %3691 }
 0x20a   : > { %3606 = vst.msk [vmem:[%s6370_s27 + $0x70] sm:$0xff] %vm378_vm2, %v3574_v49  ;;  %v2406_v54 = vadd.f32 %v2374_v36, %v2339_v57  ;;  %v2409_v15 = vadd.f32 %v2377_v12, %v2336_v11  ;;  %v2333_v17 = vsel %vm2324_vm4, %v2312_v8, %v2313_v10  ;;  %v3506_v26 = vsel %vm3495_vm3, %v3483_v63, %v3484_v19  ;;  %v2378_v34 = vld [vmem:[%s6370_s27 + $0xa8] sm:$0xff]  ;;  %v6824_v57 = vpop.permute.xlu1 %3701  ;;  %v2381_v63 = vld [vmem:[%s6370_s27 + $0xc0] sm:$0xff]  ;;  %v2383_v19 = vld [vmem:[%s6370_s27 + $0xd0] sm:$0xff] }
 0x20b   : > { %v6720_v52 = vpop.f32.mrb[56].mxu0  ;;  %3605 = vst.msk [vmem:[%s6370_s27 + $0x68] sm:$0xff] %vm378_vm2, %v3573_v48  ;;  %2439 = vst.msk [vmem:[%s6370_s27 + $0x90] sm:$0xff] %vm378_vm2, %v2407_v50  ;;  %v3544_v7 = vld [vmem:[%s6370_s27 + $0x80] sm:$0xff]  ;;  %v2412_v23 = vadd.f32 %v2380_v18, %v2333_v17  ;;  %v2311_v27 = vrot.slane %v6707_v41, 7  ;;  %v2382_v18 = vld [vmem:[%s6370_s27 + $0xc8] sm:$0xff] }
 0x20c   : > { %v6732_v59 = vpop.f32.mrb[57].mxu0  ;;  %2438 = vst.msk [vmem:[%s6370_s27 + $0x88] sm:$0xff] %vm378_vm2, %v2406_v54  ;;  %v3576_v1 = vadd.f32 %v3544_v7, %v3510_v47  ;;  %v3547_v14 = vld [vmem:[%s6370_s27 + $0x98] sm:$0xff]  ;;  %2441 = vst.msk [vmem:[%s6370_s27 + $0xa0] sm:$0xff] %vm378_vm2, %v2409_v15 }
 0x20d   : > { %v6734_v61 = vpop.f32.mrb[56].mxu1  ;;  %v6736_v62 = vpop.f32.mrb[58].mxu0  ;;  %v3579_v20 = vadd.f32 %v3547_v14, %v3507_v9  ;;  %2444 = vst.msk [vmem:[%s6370_s27 + $0xb8] sm:$0xff] %vm378_vm2, %v2412_v23  ;;  %v2334_v32 = vsel %vm2324_vm4, %v2311_v27, %v2312_v8  ;;  %v2335_v33 = vsel %vm2324_vm4, %v2310_v4, %v2311_v27 }
 0x20e   : > { %v6739_v0 = vpop.f32.mrb[57].mxu1  ;;  %v6741_v2 = vpop.f32.mrb[59].mxu0  ;;  %3608 = vst.msk [vmem:[%s6370_s27 + $0x80] sm:$0xff] %vm378_vm2, %v3576_v1  ;;  %v2410_v44 = vadd.f32 %v2378_v34, %v2335_v33  ;;  %v2411_v47 = vadd.f32 %v2379_v42, %v2334_v32  ;;  %v3490_v51 = vrot.slane %v6736_v62, 1  ;;  %v2316_v58 = vrot.slane %v6734_v61, 7  ;;  %v2385_v32 = vld [vmem:[%s6370_s27 + $0xe0] sm:$0xff] }
 0x20f   : > { %v6750_v6 = vpop.f32.mrb[58].mxu1  ;;  %3611 = vst.msk [vmem:[%s6370_s27 + $0x98] sm:$0xff] %vm378_vm2, %v3579_v20  ;;  %v2314_v49 = vrot.slane %v6739_v0, 7  ;;  %v6858_v11 = vpop.permute.xlu0 %3696 }
 0x210   : > { %v6757_v60 = vpop.f32.mrb[59].mxu1  ;;  %2442 = vst.msk [vmem:[%s6370_s27 + $0xa8] sm:$0xff] %vm378_vm2, %v2410_v44  ;;  %2443 = vst.msk [vmem:[%s6370_s27 + $0xb0] sm:$0xff] %vm378_vm2, %v2411_v47  ;;  %v6860_v12 = vpop.permute.xlu1 %3706 }
 0x211   : > { %v2332_v62 = vsel %vm2324_vm4, %v2313_v10, %v2314_v49  ;;  %v2315_v10 = vrot.slane %v6757_v60, 7 }
 0x212   : > { %v3546_v31 = vld [vmem:[%s6370_s27 + $0x90] sm:$0xff]  ;;  %v2413_v61 = vadd.f32 %v2381_v63, %v2332_v62  ;;  %v2386_v63 = vld [vmem:[%s6370_s27 + $0xe8] sm:$0xff] }
 0x213   : > { %v6773_v24 = vpop.f32.mrb[60].mxu0  ;;  %v3545_v30 = vld [vmem:[%s6370_s27 + $0x88] sm:$0xff]  ;;  %v3578_v41 = vadd.f32 %v3546_v31, %v6696_v21  ;;  %v3489_v21 = vrot.slane %v6720_v52, 1  ;;  %v3548_v36 = vld [vmem:[%s6370_s27 + $0xa0] sm:$0xff]  ;;  %v2317_v52 = vrot.slane %v6750_v6, 7  ;;  %v3488_v6 = vrot.slane %v6741_v2, 1  ;;  %v6888_v34 = vpop.permute.xlu0 %3711 }
 0x214   : > { %v6782_v22 = vpop.f32.mrb[61].mxu0  ;;  %v3577_v38 = vadd.f32 %v3545_v30, %v6705_v40  ;;  %v3487_v40 = vrot.slane %v6732_v59, 1  ;;  %v3580_v54 = vadd.f32 %v3548_v36, %v3506_v26  ;;  %v3551_v50 = vld [vmem:[%s6370_s27 + $0xb8] sm:$0xff]  ;;  %2445 = vst.msk [vmem:[%s6370_s27 + $0xc0] sm:$0xff] %vm378_vm2, %v2413_v61  ;;  %v2330_v17 = vsel %vm2324_vm4, %v2315_v10, %v2316_v58 }
 0x215   : > { %v6788_v28 = vpop.f32.mrb[60].mxu1  ;;  %v6790_v29 = vpop.f32.mrb[62].mxu0  ;;  %3610 = vst.msk [vmem:[%s6370_s27 + $0x90] sm:$0xff] %vm378_vm2, %v3578_v41  ;;  %v6837_v0 = vsel %vm3495_vm3, %v3489_v21, %v3490_v51  ;;  %v2329_v4 = vsel %vm2324_vm4, %v2316_v58, %v2317_v52  ;;  %v3501_v8 = vsel %vm3495_vm3, %v3488_v6, %v3489_v21  ;;  %v3491_v1 = vrot.slane %v6782_v22, 1 }
 0x216   : > { %v6799_v16 = vpop.f32.mrb[61].mxu1  ;;  %v6801_v35 = vpop.f32.mrb[63].mxu0  ;;  %3609 = vst.msk [vmem:[%s6370_s27 + $0x88] sm:$0xff] %vm378_vm2, %v3577_v38  ;;  %v3503_v59 = vsel %vm3495_vm3, %v3486_v5, %v3487_v40  ;;  %v2384_v5 = vld [vmem:[%s6370_s27 + $0xd8] sm:$0xff]  ;;  %3612 = vst.msk [vmem:[%s6370_s27 + $0xa0] sm:$0xff] %vm378_vm2, %v3580_v54  ;;  %v3502_v9 = vsel %vm3495_vm3, %v3487_v40, %v3488_v6  ;;  %v2331_v60 = vsel %vm2324_vm4, %v2314_v49, %v2315_v10  ;;  %v3494_v22 = vrot.slane %v6790_v29, 1 }
 0x217   : > { %v6806_v45 = vpop.f32.mrb[62].mxu1  ;;  %v3583_v3 = vadd.f32 %v3551_v50, %v3503_v59  ;;  %v2416_v7 = vadd.f32 %v2384_v5, %v2329_v4  ;;  %v3549_v2 = vld [vmem:[%s6370_s27 + $0xa8] sm:$0xff]  ;;  %v3550_v14 = vld [vmem:[%s6370_s27 + $0xb0] sm:$0xff]  ;;  %v2414_v23 = vadd.f32 %v2382_v18, %v2331_v60  ;;  %v2415_v26 = vadd.f32 %v2383_v19, %v2330_v17  ;;  %v6890_v38 = vpop.permute.xlu1 %3716  ;;  %v2357_v40 = vld [vmem:[%s6370_s27] sm:$0xff] }
 0x218   : > { %v6808_v48 = vpop.f32.mrb[63].mxu1  ;;  %v3581_v15 = vadd.f32 %v3549_v2, %v3505_v25  ;;  %v3582_v20 = vadd.f32 %v3550_v14, %v6764_v13  ;;  %v3499_v25 = vsel %vm3495_vm3, %v3490_v51, %v3491_v1  ;;  %v2318_v27 = vrot.slane %v6799_v16, 7  ;;  %v6930_v54 = vpop.permute.xlu0 %3721  ;;  %v3625_v2 = vld [vmem:[%s6370_s27 + $0x8] sm:$0xff]  ;;  %v3627_v19 = vld [vmem:[%s6370_s27 + $0x18] sm:$0xff] }
 0x219   : > { %3615 = vst.msk [vmem:[%s6370_s27 + $0xb8] sm:$0xff] %vm378_vm2, %v3583_v3  ;;  %2448 = vst.msk [vmem:[%s6370_s27 + $0xd8] sm:$0xff] %vm378_vm2, %v2416_v7  ;;  %v3493_v30 = vrot.slane %v6773_v24, 1  ;;  %v2321_v33 = vrot.slane %v6806_v45, 7  ;;  %v2320_v29 = vrot.slane %v6788_v28, 7  ;;  %v3527_v45 = vsel %vm3495_vm3, %v3494_v22, %v3463_v46 }
 0x21a   : > { %3613 = vst.msk [vmem:[%s6370_s27 + $0xa8] sm:$0xff] %vm378_vm2, %v3581_v15  ;;  %3614 = vst.msk [vmem:[%s6370_s27 + $0xb0] sm:$0xff] %vm378_vm2, %v3582_v20  ;;  %v2328_v31 = vsel %vm2324_vm4, %v2317_v52, %v2318_v27  ;;  %v3492_v21 = vrot.slane %v6801_v35, 1  ;;  %v2319_v51 = vrot.slane %v6808_v48, 7  ;;  %v2387_v52 = vld [vmem:[%s6370_s27 + $0xf0] sm:$0xff] }
 0x21b   : > { %2446 = vst.msk [vmem:[%s6370_s27 + $0xc8] sm:$0xff] %vm378_vm2, %v2414_v23  ;;  %2447 = vst.msk [vmem:[%s6370_s27 + $0xd0] sm:$0xff] %vm378_vm2, %v2415_v26  ;;  %v3552_v13 = vld [vmem:[%s6370_s27 + $0xc0] sm:$0xff]  ;;  %v2417_v42 = vadd.f32 %v2385_v32, %v2328_v31  ;;  %v3496_v44 = vsel %vm3495_vm3, %v3493_v30, %v3494_v22  ;;  %v2325_v28 = vsel %vm2324_vm4, %v2320_v29, %v2321_v33  ;;  %v6932_v50 = vpop.permute.xlu1 %3726  ;;  %v3626_v15 = vld [vmem:[%s6370_s27 + $0x10] sm:$0xff] }
 0x21c   : > { %v3584_v16 = vadd.f32 %v3552_v13, %v3502_v9  ;;  %v2356_v47 = vsel %vm2324_vm4, %v2321_v33, %v2290_v53  ;;  %v2420_v49 = vadd.f32 %v2388_v39, %v2325_v28  ;;  %v3497_v58 = vsel %vm3495_vm3, %v3492_v21, %v3493_v30  ;;  %v6946_v4 = vpop.permute.xlu0 %3731  ;;  %v3630_v28 = vld [vmem:[%s6370_s27 + $0x30] sm:$0xff] }
 0x21d   : > { %2449 = vst.msk [vmem:[%s6370_s27 + $0xe0] sm:$0xff] %vm378_vm2, %v2417_v42  ;;  %v2389_v46 = vadd.f32 %v2357_v40, %v2356_v47  ;;  %v3498_v53 = vsel %vm3495_vm3, %v3491_v1, %v3492_v21  ;;  %v2326_v48 = vsel %vm2324_vm4, %v2319_v51, %v2320_v29  ;;  %v2327_v62 = vsel %vm2324_vm4, %v2318_v27, %v2319_v51  ;;  %v3628_v27 = vld [vmem:[%s6370_s27 + $0x20] sm:$0xff]  ;;  %v3631_v51 = vld [vmem:[%s6370_s27 + $0x38] sm:$0xff] }
 0x21e   : > { %3616 = vst.msk [vmem:[%s6370_s27 + $0xc0] sm:$0xff] %vm378_vm2, %v3584_v16  ;;  %2452 = vst.msk [vmem:[%s6370_s27 + $0xf8] sm:$0xff] %vm378_vm2, %v2420_v49  ;;  %v2418_v3 = vadd.f32 %v2386_v63, %v2327_v62  ;;  %v3956_v20 = vmul.f32 %v3626_v15, %v3626_v15  ;;  %v3850_v23 = vmul.f32 %v6858_v11, %v3625_v2  ;;  %v3629_v16 = vld [vmem:[%s6370_s27 + $0x28] sm:$0xff] }
 0x21f   : > { %2421 = vst.msk [vmem:[%s6370_s27] sm:$0xff] %vm378_vm2, %v2389_v46  ;;  %v6948_v5 = vpop.permute.xlu1 %3736  ;;  %v3851_v26 = vmul.f32 %v6824_v57, %v3626_v15  ;;  %v3852_v33 = vmul.f32 %v6860_v12, %v3627_v19  ;;  %v3853_v39 = vmul.f32 %v6888_v34, %v3628_v27  ;;  %v3959_v21 = vmul.f32 %v3629_v16, %v3629_v16  ;;  %v3634_v15 = vld [vmem:[%s6370_s27 + $0x50] sm:$0xff] }
 0x220   : > { %v3555_v41 = vld [vmem:[%s6370_s27 + $0xd8] sm:$0xff]  ;;  %2450 = vst.msk [vmem:[%s6370_s27 + $0xe8] sm:$0xff] %vm378_vm2, %v2418_v3  ;;  %v6963_v60 = vpop.permute.xlu0 %3741  ;;  %v3988_v32 = vmul.f32 %v3956_v20, %v6824_v57  ;;  %v3882_v42 = vsel %vm378_vm2, %v3850_v23, 0.0 }
 0x221   : > { %v3587_v24 = vadd.f32 %v3555_v41, %v3499_v25  ;;  %v3957_v25 = vmul.f32 %v3627_v19, %v3627_v19  ;;  %v3886_v49 = vsel %vm378_vm2, %v3852_v33, 0.0  ;;  %v3888_v3 = vsel %vm378_vm2, %v3853_v39, 0.0 }
 0x222   : > { %v3553_v36 = vld [vmem:[%s6370_s27 + $0xc8] sm:$0xff]  ;;  %v3554_v43 = vld [vmem:[%s6370_s27 + $0xd0] sm:$0xff]  ;;  %v3859_v33 = vmul.f32 %v6963_v60, %v3634_v15 }
 0x223   : > { %3619 = vst.msk [vmem:[%s6370_s27 + $0xd8] sm:$0xff] %vm378_vm2, %v3587_v24  ;;  %v3585_v35 = vadd.f32 %v3553_v36, %v3501_v8  ;;  %v3586_v59 = vadd.f32 %v3554_v43, %v6837_v0  ;;  %v2419_v0 = vadd.f32 %v2387_v52, %v2326_v48  ;;  %v6965_v18 = vpop.permute.xlu1 %3746  ;;  %v3958_v24 = vmul.f32 %v3628_v27, %v3628_v27 }
 0x224   : > { %v3556_v61 = vld [vmem:[%s6370_s27 + $0xe0] sm:$0xff]  ;;  %v6981_v29 = vpop.permute.xlu0 %3751  ;;  %v3989_v57 = vmul.f32 %v3957_v25, %v6860_v12  ;;  %v3854_v12 = vmul.f32 %v6890_v38, %v3629_v16  ;;  %v3635_v25 = vld [vmem:[%s6370_s27 + $0x58] sm:$0xff] }
 0x225   : > { %3617 = vst.msk [vmem:[%s6370_s27 + $0xc8] sm:$0xff] %vm378_vm2, %v3585_v35  ;;  %3618 = vst.msk [vmem:[%s6370_s27 + $0xd0] sm:$0xff] %vm378_vm2, %v3586_v59  ;;  %v3588_v37 = vadd.f32 %v3556_v61, %v3498_v53  ;;  %v3559_v7 = vld [vmem:[%s6370_s27 + $0xf8] sm:$0xff]  ;;  %v3960_v53 = vmul.f32 %v3630_v28, %v3630_v28  ;;  %v3632_v35 = vld [vmem:[%s6370_s27 + $0x40] sm:$0xff]  ;;  %v3855_v59 = vmul.f32 %v6930_v54, %v3630_v28 }
 0x226   : > { %2451 = vst.msk [vmem:[%s6370_s27 + $0xf0] sm:$0xff] %vm378_vm2, %v2419_v0  ;;  %v3528_v6 = vld [vmem:[%s6370_s27] sm:$0xff]  ;;  %v3591_v9 = vadd.f32 %v3559_v7, %v3527_v45  ;;  %v3884_v45 = vsel %vm378_vm2, %v3851_v26, 0.0  ;;  %v4023_v0 = vsel %vm378_vm2, %v3989_v57, 0.0  ;;  %v3991_v61 = vmul.f32 %v3959_v21, %v6890_v38  ;;  %v3637_v28 = vld [vmem:[%s6370_s27 + $0x68] sm:$0xff] }
 0x227   : > { %3620 = vst.msk [vmem:[%s6370_s27 + $0xe0] sm:$0xff] %vm378_vm2, %v3588_v37  ;;  %v3560_v8 = vadd.f32 %v3528_v6, %v6504_v55  ;;  %v3557_v1 = vld [vmem:[%s6370_s27 + $0xe8] sm:$0xff]  ;;  %v3955_v55 = vmul.f32 %v3625_v2, %v3625_v2  ;;  %v6983_v41 = vpop.permute.xlu1 %3756  ;;  %v3962_v37 = vmul.f32 %v3632_v35, %v3632_v35  ;;  %v3992_v2 = vmul.f32 %v3960_v53, %v6930_v54  ;;  %v3636_v16 = vld [vmem:[%s6370_s27 + $0x60] sm:$0xff] }
 0x228   : > { %3623 = vst.msk [vmem:[%s6370_s27 + $0xf8] sm:$0xff] %vm378_vm2, %v3591_v9  ;;  %v3589_v17 = vadd.f32 %v3557_v1, %v3497_v58  ;;  %v3990_v58 = vmul.f32 %v3958_v24, %v6888_v34  ;;  %v7001_v48 = vpop.permute.xlu0 %3761  ;;  %v3961_v34 = vmul.f32 %v3631_v51, %v3631_v51  ;;  %v3633_v6 = vld [vmem:[%s6370_s27 + $0x48] sm:$0xff]  ;;  %v3856_v1 = vmul.f32 %v6932_v50, %v3631_v51  ;;  %v3638_v51 = vld [vmem:[%s6370_s27 + $0x70] sm:$0xff] }
 0x229   : > { %3592 = vst.msk [vmem:[%s6370_s27] sm:$0xff] %vm378_vm2, %v3560_v8  ;;  %v3987_v13 = vmul.f32 %v3955_v55, %v6858_v11  ;;  %v4027_v38 = vsel %vm378_vm2, %v3991_v61, 0.0  ;;  %v3857_v20 = vmul.f32 %v6946_v4, %v3632_v35  ;;  %v3963_v23 = vmul.f32 %v3633_v6, %v3633_v6 }
 0x22a   : > { %3621 = vst.msk [vmem:[%s6370_s27 + $0xe8] sm:$0xff] %vm378_vm2, %v3589_v17  ;;  %v4025_v9 = vsel %vm378_vm2, %v3990_v58, 0.0  ;;  %v3993_v19 = vmul.f32 %v3961_v34, %v6932_v50  ;;  %v3994_v26 = vmul.f32 %v3962_v37, %v6946_v4  ;;  %v3964_v50 = vmul.f32 %v3634_v15, %v3634_v15  ;;  %v3641_v15 = vld [vmem:[%s6370_s27 + $0x88] sm:$0xff] }
 0x22b   : > { %v4019_v40 = vsel %vm378_vm2, %v3987_v13, 0.0  ;;  %v7003_v52 = vpop.permute.xlu1 %3766  ;;  %v3861_v35 = vmul.f32 %v6981_v29, %v3636_v16  ;;  %v3862_v37 = vmul.f32 %v6983_v41, %v3637_v28 }
 0x22c   : > { %v7020_v27 = vpop.permute.xlu0 %3771  ;;  %v4031_v24 = vsel %vm378_vm2, %v3993_v19, 0.0  ;;  %v4033_v57 = vsel %vm378_vm2, %v3994_v26, 0.0  ;;  %v3996_v21 = vmul.f32 %v3964_v50, %v6963_v60  ;;  %v3967_v60 = vmul.f32 %v3637_v28, %v3637_v28 }
 0x22d   : > { %v3558_v10 = vld [vmem:[%s6370_s27 + $0xf0] sm:$0xff] }
 0x22e   : > { %v3590_v14 = vadd.f32 %v3558_v10, %v3496_v44  ;;  %v3890_v10 = vsel %vm378_vm2, %v3854_v12, 0.0 }
 0x22f   : > { %v7022_v54 = vpop.permute.xlu1 %3776 }
 0x230   : > { %3622 = vst.msk [vmem:[%s6370_s27 + $0xf0] sm:$0xff] %vm378_vm2, %v3590_v14  ;;  %v3624_v22 = vld [vmem:[%s6370_s27] sm:$0xff]  ;;  %v3892_v14 = vsel %vm378_vm2, %v3855_v59, 0.0  ;;  %v3968_v59 = vmul.f32 %v3638_v51, %v3638_v51 }
 0x231   : > { %v3849_v30 = vmul.f32 %v6822_v56, %v3624_v22  ;;  %v3954_v31 = vmul.f32 %v3624_v22, %v3624_v22 }
 0x233   : > { %v3881_v44 = vsel %vm378_vm2, %v3849_v30, 0.0  ;;  %v3986_v11 = vmul.f32 %v3954_v31, %v6822_v56  ;;  %v4021_v56 = vsel %vm378_vm2, %v3988_v32, 0.0  ;;  %v4029_v30 = vsel %vm378_vm2, %v3992_v2, 0.0 }
 0x234   : > { %v3883_v47 = vadd.f32 %v3882_v42, %v3881_v44  ;;  %v3894_v31 = vsel %vm378_vm2, %v3856_v1, 0.0  ;;  %v3858_v32 = vmul.f32 %v6948_v5, %v3633_v6  ;;  %v3896_v44 = vsel %vm378_vm2, %v3857_v20, 0.0 }
 0x235   : > { %v4018_v46 = vsel %vm378_vm2, %v3986_v11, 0.0  ;;  %v3995_v11 = vmul.f32 %v3963_v23, %v6948_v5  ;;  %v7041_v5 = vpop.permute.xlu1 %3786  ;;  %v3863_v6 = vmul.f32 %v7001_v48, %v3638_v51  ;;  %v3999_v2 = vmul.f32 %v3967_v60, %v6983_v41  ;;  %v3642_v41 = vld [vmem:[%s6370_s27 + $0x90] sm:$0xff] }
 0x236   : > { %v3885_v36 = vadd.f32 %v3884_v45, %v3883_v47  ;;  %v4020_v43 = vadd.f32 %v4019_v40, %v4018_v46  ;;  %v3965_v45 = vmul.f32 %v3635_v25, %v3635_v25  ;;  %v3898_v39 = vsel %vm378_vm2, %v3858_v32, 0.0 }
 0x237   : > { %v3860_v46 = vmul.f32 %v6965_v18, %v3635_v25  ;;  %v4035_v12 = vsel %vm378_vm2, %v3995_v11, 0.0  ;;  %v3906_v20 = vsel %vm378_vm2, %v3862_v37, 0.0  ;;  %v3908_v25 = vsel %vm378_vm2, %v3863_v6, 0.0 }
 0x238   : > { %v3887_v62 = vadd.f32 %v3886_v49, %v3885_v36  ;;  %v4022_v63 = vadd.f32 %v4021_v56, %v4020_v43  ;;  %v3966_v49 = vmul.f32 %v3636_v16, %v3636_v16  ;;  %v3900_v36 = vsel %vm378_vm2, %v3859_v33, 0.0  ;;  %v7039_v43 = vpop.permute.xlu0 %3781  ;;  %v3643_v33 = vld [vmem:[%s6370_s27 + $0x98] sm:$0xff] }
 0x239   : > { %v3997_v53 = vmul.f32 %v3965_v45, %v6965_v18  ;;  %v3902_v61 = vsel %vm378_vm2, %v3860_v46, 0.0  ;;  %v3971_v32 = vmul.f32 %v3641_v15, %v3641_v15  ;;  %v3972_v11 = vmul.f32 %v3642_v41, %v3642_v41 }
 0x23a   : > { %v3889_v7 = vadd.f32 %v3888_v3, %v3887_v62  ;;  %v4024_v8 = vadd.f32 %v4023_v0, %v4022_v63  ;;  %v3639_v62 = vld [vmem:[%s6370_s27 + $0x78] sm:$0xff]  ;;  %v4037_v3 = vsel %vm378_vm2, %v3996_v21, 0.0  ;;  %v3998_v34 = vmul.f32 %v3966_v49, %v6981_v29 }
 0x23b   : > { %v3969_v1 = vmul.f32 %v3639_v62, %v3639_v62  ;;  %v3864_v23 = vmul.f32 %v7003_v52, %v3639_v62  ;;  %v3867_v45 = vmul.f32 %v7039_v43, %v3642_v41  ;;  %v4003_v46 = vmul.f32 %v3971_v32, %v7022_v54 }
 0x23c   : > { %v3891_v17 = vadd.f32 %v3890_v10, %v3889_v7  ;;  %v4026_v55 = vadd.f32 %v4025_v9, %v4024_v8  ;;  %v3640_v7 = vld [vmem:[%s6370_s27 + $0x80] sm:$0xff]  ;;  %v4039_v9 = vsel %vm378_vm2, %v3997_v53, 0.0  ;;  %v3904_v10 = vsel %vm378_vm2, %v3861_v35, 0.0 }
 0x23d   : > { %v4041_v19 = vsel %vm378_vm2, %v3998_v34, 0.0  ;;  %v3970_v26 = vmul.f32 %v3640_v7, %v3640_v7  ;;  %v3973_v49 = vmul.f32 %v3643_v33, %v3643_v33  ;;  %v4004_v53 = vmul.f32 %v3972_v11, %v7039_v43 }
 0x23e   : > { %v3893_v22 = vadd.f32 %v3892_v14, %v3891_v17  ;;  %v4028_v13 = vadd.f32 %v4027_v38, %v4026_v55  ;;  %v4000_v14 = vmul.f32 %v3968_v59, %v7001_v48  ;;  %v3792_v17 = vpop.permute.xlu0 %3791  ;;  %v7058_v38 = vpop.permute.xlu1 %3796  ;;  %v3916_v60 = vsel %vm378_vm2, %v3867_v45, 0.0 }
 0x240   : > { %v3895_v4 = vadd.f32 %v3894_v31, %v3893_v22  ;;  %v4030_v42 = vadd.f32 %v4029_v30, %v4028_v13  ;;  %v4043_v13 = vsel %vm378_vm2, %v3999_v2, 0.0  ;;  %v4001_v30 = vmul.f32 %v3969_v1, %v7003_v52 }
 0x241   : > { %v3865_v31 = vmul.f32 %v7020_v27, %v3640_v7  ;;  %v4045_v50 = vsel %vm378_vm2, %v4000_v14, 0.0  ;;  %v3647_v7 = vld [vmem:[%s6370_s27 + $0xb8] sm:$0xff] }
 0x242   : > { %v3897_v47 = vadd.f32 %v3896_v44, %v3895_v4  ;;  %v4032_v40 = vadd.f32 %v4031_v24, %v4030_v42  ;;  %v3910_v42 = vsel %vm378_vm2, %v3864_v23, 0.0  ;;  %v4002_v24 = vmul.f32 %v3970_v26, %v7020_v27 }
 0x243   : > { %v3866_v44 = vmul.f32 %v7022_v54, %v3641_v15  ;;  %v3912_v21 = vsel %vm378_vm2, %v3865_v31, 0.0  ;;  %v3868_v27 = vmul.f32 %v7041_v5, %v3643_v33  ;;  %v4051_v54 = vsel %vm378_vm2, %v4003_v46, 0.0  ;;  %v3648_v15 = vld [vmem:[%s6370_s27 + $0xc0] sm:$0xff]  ;;  %v3650_v33 = vld [vmem:[%s6370_s27 + $0xd0] sm:$0xff] }
 0x244   : > { %v3899_v56 = vadd.f32 %v3898_v39, %v3897_v47  ;;  %v4034_v58 = vadd.f32 %v4033_v57, %v4032_v40  ;;  %v3644_v57 = vld [vmem:[%s6370_s27 + $0xa0] sm:$0xff]  ;;  %v3802_v47 = vpop.permute.xlu0 %3801  ;;  %v3807_v40 = vpop.permute.xlu1 %3806  ;;  %v4047_v39 = vsel %vm378_vm2, %v4001_v30, 0.0 }
 0x245   : > { %v3974_v35 = vmul.f32 %v3644_v57, %v3644_v57  ;;  %v3918_v34 = vsel %vm378_vm2, %v3868_v27, 0.0  ;;  %v3652_v27 = vld [vmem:[%s6370_s27 + $0xe0] sm:$0xff] }
 0x246   : > { %v3901_v63 = vadd.f32 %v3900_v36, %v3899_v56  ;;  %v4036_v0 = vadd.f32 %v4035_v12, %v4034_v58  ;;  %v3645_v56 = vld [vmem:[%s6370_s27 + $0xa8] sm:$0xff]  ;;  %v4049_v58 = vsel %vm378_vm2, %v4002_v24, 0.0  ;;  %v3914_v12 = vsel %vm378_vm2, %v3866_v44, 0.0  ;;  %v3651_v44 = vld [vmem:[%s6370_s27 + $0xd8] sm:$0xff] }
 0x248   : > { %v3903_v18 = vadd.f32 %v3902_v61, %v3901_v63  ;;  %v4038_v8 = vadd.f32 %v4037_v3, %v4036_v0  ;;  %v3646_v63 = vld [vmem:[%s6370_s27 + $0xb0] sm:$0xff]  ;;  %v4005_v0 = vmul.f32 %v3973_v49, %v7041_v5  ;;  %v3869_v3 = vmul.f32 %v3792_v17, %v3644_v57  ;;  %v3817_v43 = vpop.permute.xlu1 %3816 }
 0x249   : > { %v3975_v61 = vmul.f32 %v3645_v56, %v3645_v56  ;;  %v3976_v2 = vmul.f32 %v3646_v63, %v3646_v63  ;;  %v3871_v5 = vmul.f32 %v3802_v47, %v3646_v63  ;;  %v3981_v49 = vmul.f32 %v3651_v44, %v3651_v44 }
 0x24a   : > { %v3905_v29 = vadd.f32 %v3904_v10, %v3903_v18  ;;  %v4040_v55 = vadd.f32 %v4039_v9, %v4038_v8  ;;  %v3812_v18 = vpop.permute.xlu0 %3811  ;;  %v4053_v8 = vsel %vm378_vm2, %v4004_v53, 0.0  ;;  %v4006_v9 = vmul.f32 %v3974_v35, %v3792_v17  ;;  %v3649_v17 = vld [vmem:[%s6370_s27 + $0xc8] sm:$0xff] }
 0x24b   : > { %v3870_v10 = vmul.f32 %v7058_v38, %v3645_v56  ;;  %v3924_v32 = vsel %vm378_vm2, %v3871_v5, 0.0  ;;  %v3979_v24 = vmul.f32 %v3649_v17, %v3649_v17 }
 0x24c   : > { %v3907_v22 = vadd.f32 %v3906_v20, %v3905_v29  ;;  %v4042_v48 = vadd.f32 %v4041_v19, %v4040_v55  ;;  %v4055_v29 = vsel %vm378_vm2, %v4005_v0, 0.0  ;;  %v3920_v55 = vsel %vm378_vm2, %v3869_v3, 0.0 }
 0x24d   : > { %v4007_v19 = vmul.f32 %v3975_v61, %v7058_v38  ;;  %v3977_v20 = vmul.f32 %v3647_v7, %v3647_v7  ;;  %v4057_v41 = vsel %vm378_vm2, %v4006_v9, 0.0  ;;  %v3982_v0 = vmul.f32 %v3652_v27, %v3652_v27 }
 0x24e   : > { %v3909_v16 = vadd.f32 %v3908_v25, %v3907_v22  ;;  %v4044_v4 = vadd.f32 %v4043_v13, %v4042_v48  ;;  %v3872_v25 = vmul.f32 %v3807_v40, %v3647_v7  ;;  %v3922_v22 = vsel %vm378_vm2, %v3870_v10, 0.0 }
 0x24f   : > { %v4008_v48 = vmul.f32 %v3976_v2, %v3802_v47  ;;  %v3978_v13 = vmul.f32 %v3648_v15, %v3648_v15  ;;  %v4059_v38 = vsel %vm378_vm2, %v4007_v19, 0.0  ;;  %v3874_v47 = vmul.f32 %v3817_v43, %v3649_v17  ;;  %v3655_v2 = vld [vmem:[%s6370_s27 + $0xf8] sm:$0xff] }
 0x250   : > { %v3911_v52 = vadd.f32 %v3910_v42, %v3909_v16  ;;  %v4046_v28 = vadd.f32 %v4045_v50, %v4044_v4  ;;  %v3822_v50 = vpop.permute.xlu0 %3821  ;;  %v3827_v16 = vpop.permute.xlu1 %3826  ;;  %v4009_v4 = vmul.f32 %v3977_v20, %v3807_v40  ;;  %v3873_v42 = vmul.f32 %v3812_v18, %v3648_v15 }
 0x251   : > { %v3926_v57 = vsel %vm378_vm2, %v3872_v25, 0.0  ;;  %v3875_v56 = vmul.f32 %v3822_v50, %v3650_v33  ;;  %v3876_v53 = vmul.f32 %v3827_v16, %v3651_v44  ;;  %v3930_v63 = vsel %vm378_vm2, %v3874_v47, 0.0 }
 0x252   : > { %v3913_v51 = vadd.f32 %v3912_v21, %v3911_v52  ;;  %v4048_v36 = vadd.f32 %v4047_v39, %v4046_v28  ;;  %v4061_v52 = vsel %vm378_vm2, %v4008_v48, 0.0  ;;  %v4010_v28 = vmul.f32 %v3978_v13, %v3812_v18 }
 0x253   : > { %v3980_v39 = vmul.f32 %v3650_v33, %v3650_v33  ;;  %v3928_v40 = vsel %vm378_vm2, %v3873_v42, 0.0  ;;  %v3932_v7 = vsel %vm378_vm2, %v3875_v56, 0.0  ;;  %v3934_v10 = vsel %vm378_vm2, %v3876_v53, 0.0  ;;  %v3688_v56 = vld [vmem:[#allocation3] sm:$0x1] }
 0x254   : > { %v3915_v59 = vadd.f32 %v3914_v12, %v3913_v51  ;;  %v4050_v62 = vadd.f32 %v4049_v58, %v4048_v36  ;;  %v4063_v51 = vsel %vm378_vm2, %v4009_v4, 0.0  ;;  %v4011_v36 = vmul.f32 %v3979_v24, %v3817_v43  ;;  %v3832_v35 = vpop.permute.xlu0 %3831  ;;  %v3953_v53 = vld [vmem:[#allocation4] sm:$0x1] }
 0x255   : > { %v3877_v18 = vmul.f32 %v3832_v35, %v3652_v27 }
 0x256   : > { %v3917_v37 = vadd.f32 %v3916_v60, %v3915_v59  ;;  %v4052_v6 = vadd.f32 %v4051_v54, %v4050_v62  ;;  %v3837_v60 = vpop.permute.xlu1 %3836  ;;  %v3653_v59 = vld [vmem:[%s6370_s27 + $0xe8] sm:$0xff]  ;;  %v4065_v62 = vsel %vm378_vm2, %v4010_v28, 0.0  ;;  %v4012_v54 = vmul.f32 %v3980_v39, %v3822_v50 }
 0x257   : > { %v3983_v43 = vmul.f32 %v3653_v59, %v3653_v59  ;;  %v3878_v5 = vmul.f32 %v3837_v60, %v3653_v59 }
 0x258   : > { %v3919_v1 = vadd.f32 %v3918_v34, %v3917_v37  ;;  %v4054_v14 = vadd.f32 %v4053_v8, %v4052_v6  ;;  %v4013_v34 = vmul.f32 %v3981_v49, %v3827_v16  ;;  %v3654_v37 = vld [vmem:[%s6370_s27 + $0xf0] sm:$0xff]  ;;  %v4067_v6 = vsel %vm378_vm2, %v4011_v36, 0.0  ;;  %v3842_v20 = vpop.permute.xlu0 %3841 }
 0x259   : > { %v3984_v15 = vmul.f32 %v3654_v37, %v3654_v37  ;;  %v4015_v25 = vmul.f32 %v3983_v43, %v3837_v60  ;;  %v3879_v17 = vmul.f32 %v3842_v20, %v3654_v37 }
 0x25a   : > { %v3921_v23 = vadd.f32 %v3920_v55, %v3919_v1  ;;  %v4056_v26 = vadd.f32 %v4055_v29, %v4054_v14  ;;  %v4069_v1 = vsel %vm378_vm2, %v4012_v54, 0.0  ;;  %v4014_v14 = vmul.f32 %v3982_v0, %v3832_v35 }
 0x25b   : > { %v4071_v19 = vsel %vm378_vm2, %v4013_v34, 0.0  ;;  %v4075_v16 = vsel %vm378_vm2, %v4015_v25, 0.0 }
 0x25c   : > { %v4058_v30 = vadd.f32 %v4057_v41, %v4056_v26  ;;  %v3923_v31 = vadd.f32 %v3922_v22, %v3921_v23  ;;  %v3847_v23 = vpop.permute.xlu1 %3846  ;;  %v3936_v26 = vsel %vm378_vm2, %v3877_v18, 0.0  ;;  %v3985_v41 = vmul.f32 %v3655_v2, %v3655_v2 }
 0x25d   : > { %v4073_v13 = vsel %vm378_vm2, %v4014_v14, 0.0 }
 0x25e   : > { %v4060_v11 = vadd.f32 %v4059_v38, %v4058_v30  ;;  %v3925_v45 = vadd.f32 %v3924_v32, %v3923_v31  ;;  %v3938_v30 = vsel %vm378_vm2, %v3878_v5, 0.0  ;;  %v4016_v31 = vmul.f32 %v3984_v15, %v3842_v20 }
 0x25f   : > { %v3880_v32 = vmul.f32 %v3847_v23, %v3655_v2  ;;  %v3940_v38 = vsel %vm378_vm2, %v3879_v17, 0.0  ;;  %v4017_v4 = vmul.f32 %v3985_v41, %v3847_v23 }
 0x260   : > { %v4062_v21 = vadd.f32 %v4061_v52, %v4060_v11  ;;  %v3927_v46 = vadd.f32 %v3926_v57, %v3925_v45  ;;  %v4077_v44 = vsel %vm378_vm2, %v4016_v31, 0.0 }
 0x261   : > { %v3942_v11 = vsel %vm378_vm2, %v3880_v32, 0.0  ;;  %v4079_v52 = vsel %vm378_vm2, %v4017_v4, 0.0 }
 0x262   : > { %v4064_v58 = vadd.f32 %v4063_v51, %v4062_v21  ;;  %v3929_v12 = vadd.f32 %v3928_v40, %v3927_v46 }
 0x264   : > { %v4066_v3 = vadd.f32 %v4065_v62, %v4064_v58  ;;  %v3931_v61 = vadd.f32 %v3930_v63, %v3929_v12 }
 0x266   : > { %v4068_v8 = vadd.f32 %v4067_v6, %v4066_v3  ;;  %v3933_v9 = vadd.f32 %v3932_v7, %v3931_v61 }
 0x268   : > { %v4070_v29 = vadd.f32 %v4069_v1, %v4068_v8  ;;  %v3935_v55 = vadd.f32 %v3934_v10, %v3933_v9 }
 0x26a   : > { %v4072_v22 = vadd.f32 %v4071_v19, %v4070_v29  ;;  %v3937_v48 = vadd.f32 %v3936_v26, %v3935_v55 }
 0x26c   : > { %v4074_v50 = vadd.f32 %v4073_v13, %v4072_v22  ;;  %v3939_v33 = vadd.f32 %v3938_v30, %v3937_v48 }
 0x26e   : > { %v4076_v42 = vadd.f32 %v4075_v16, %v4074_v50  ;;  %v3941_v24 = vadd.f32 %v3940_v38, %v3939_v33 }
 0x270   : > { %v4078_v45 = vadd.f32 %v4077_v44, %v4076_v42  ;;  %v3943_v57 = vadd.f32 %v3942_v11, %v3941_v24 }
 0x272   : > { %v3944_v28 = vrot.slane %v3943_v57, 4  ;;  %v4080_v47 = vadd.f32 %v4079_v52, %v4078_v45 }
 0x274   : > { %v3945_v39 = vadd.f32 %v3944_v28, %v3943_v57  ;;  %v4081_v21 = vrot.slane %v4080_v47, 4 }
 0x276   : > { %v3946_v46 = vrot.slane %v3945_v39, 2  ;;  %v4082_v49 = vadd.f32 %v4081_v21, %v4080_v47 }
 0x278   : > { %v3947_v27 = vadd.f32 %v3946_v46, %v3945_v39  ;;  %v4083_v51 = vrot.slane %v4082_v49, 2 }
 0x27a   : > { %v3948_v40 = vrot.slane %v3947_v27, 1  ;;  %v4084_v36 = vadd.f32 %v4083_v51, %v4082_v49 }
 0x27c   : > { %v3949_v58 = vadd.f32 %v3948_v40, %v3947_v27  ;;  %v4085_v12 = vrot.slane %v4084_v36, 1 }
 0x27e   : > { %v3950_v35 = vadd.f32 %v3949_v58, %v3688_v56  ;;  %v4086_v60 = vadd.f32 %v4085_v12, %v4084_v36 }
 0x280   : > { %3952 = vst.msk [vmem:[#allocation3] sm:$0x1] %vm3951_vm5, %v3950_v35  ;;  %v4087_v59 = vadd.f32 %v4086_v60, %v3953_v53 }
 0x282   : > { %4088 = vst.msk [vmem:[#allocation4] sm:$0x1] %vm3951_vm5, %v4087_v59 }
 0x283 PF: > { %p4831_p10 = scmp.ne.s32.totalorder %s5812_s13, 1 }
 0x284   : > { %p4832_p11 = scmp.ne.s32.totalorder (!%p4831_p10), %s5808_s12, 0 }
 0x285   : > { %4092 = sbr.rel (%p4831_p10) target bundleno = 717 (0x2cd), region = 44 }
 0x28c   : > { %4096 = sbr.rel (%p4832_p11) target bundleno = 675 (0x2a3), region = 48  ;;  %v4097_v62 = vld [vmem:[#allocation3] sm:$0x1] (!%p4832_p11)  ;;  %v4099_v63 = vld [vmem:[#allocation4] sm:$0x1] (!%p4832_p11)  ;;  %vm4104_vm6 = vcmask (!%p4832_p11), 24576  }
 0x28d   : > { %v4098_v54 = vmul.f32 (!%p4832_p11), 0.00390625, %v4097_v62  ;;  %v4100_v0 = vmul.f32 (!%p4832_p11), 0.00390625, %v4099_v63 }
 0x28f   : > { %v4101_v3 = vmul.f32 (!%p4832_p11), %v4098_v54, %v4098_v54  ;;  %4105 = vst.msk [vmem:[#allocation5] sm:$0x1] (!%p4832_p11), %vm4104_vm6, %v4098_v54 }
 0x291   : > { %v4102_v61 = vsub.f32 (!%p4832_p11), %v4100_v0, %v4101_v3 }
 0x293   : > { %v4103_v34 = vmax.f32 %v4102_v61, 0.0 }
 0x295   : > { %v4106_v37 = vadd.f32 1e-05, %v4103_v34 }
 0x297   : > { %5776 = vrsqrt.f32 %v4106_v37 }
 0x2a1   : > { %v5777_v6 = vpop.eup %5776 }
 0x2a2   : > { %4108 = vst.msk [vmem:[#allocation6] sm:$0x1] %vm4104_vm6, %v5777_v6 }
 0x2a3 PF: > { %s4833_s13 = sshll.u32 %s5808_s12, 8  ;;  %vm4381_vm7 = vcmask 27648  }
 0x2a4   : > { %s7132_s11 = scalar_lea.vmem [#allocation2], %s4833_s13 }
 0x2a5   : > { %v4111_v43 = vld [vmem:[%s7132_s11] sm:$0xff]  ;;  %v4112_v8 = vld [vmem:[%s7132_s11 + $0x8] sm:$0xff]  ;;  %v4113_v9 = vld [vmem:[%s7132_s11 + $0x10] sm:$0xff] }
 0x2a6   : > { %v7128_v7 = vld [vmem:[#allocation5] ss:$0 sm:$0xff]  ;;  %v4114_v14 = vld [vmem:[%s7132_s11 + $0x18] sm:$0xff]  ;;  %v4116_v15 = vld [vmem:[%s7132_s11 + $0x28] sm:$0xff] }
 0x2a7   : > { %v4150_v10 = vsub.f32 %v4111_v43, %v7128_v7  ;;  %v4151_v2 = vsub.f32 %v4112_v8, %v7128_v7  ;;  %v4152_v1 = vsub.f32 %v4113_v9, %v7128_v7  ;;  %v4115_v5 = vld [vmem:[%s7132_s11 + $0x20] sm:$0xff]  ;;  %v4153_v29 = vsub.f32 %v4114_v14, %v7128_v7  ;;  %v4117_v20 = vld [vmem:[%s7132_s11 + $0x30] sm:$0xff]  ;;  %v4118_v23 = vld [vmem:[%s7132_s11 + $0x38] sm:$0xff] }
 0x2a8   : > { %v4154_v55 = vsub.f32 %v4115_v5, %v7128_v7  ;;  %v4155_v19 = vsub.f32 %v4116_v15, %v7128_v7  ;;  %v4156_v41 = vsub.f32 %v4117_v20, %v7128_v7  ;;  %v4157_v30 = vsub.f32 %v4118_v23, %v7128_v7  ;;  %v4119_v24 = vld [vmem:[%s7132_s11 + $0x40] sm:$0xff]  ;;  %v4120_v44 = vld [vmem:[%s7132_s11 + $0x48] sm:$0xff]  ;;  %v4121_v11 = vld [vmem:[%s7132_s11 + $0x50] sm:$0xff] }
 0x2a9   : > { %v7130_v18 = vld [vmem:[#allocation6] ss:$0 sm:$0xff]  ;;  %v4122_v47 = vld [vmem:[%s7132_s11 + $0x58] sm:$0xff]  ;;  %v4124_v21 = vld [vmem:[%s7132_s11 + $0x68] sm:$0xff]  ;;  %v4158_v56 = vsub.f32 %v4119_v24, %v7128_v7  ;;  %v4159_v58 = vsub.f32 %v4120_v44, %v7128_v7  ;;  %v4160_v12 = vsub.f32 %v4121_v11, %v7128_v7 }
 0x2aa   : > { %v4189_v26 = vmul.f32 %v7130_v18, %v4150_v10  ;;  %v4190_v25 = vmul.f32 %v7130_v18, %v4151_v2  ;;  %v4191_v17 = vmul.f32 %v7130_v18, %v4152_v1  ;;  %v4192_v22 = vmul.f32 %v7130_v18, %v4153_v29  ;;  %v4123_v39 = vld [vmem:[%s7132_s11 + $0x60] sm:$0xff]  ;;  %v4125_v40 = vld [vmem:[%s7132_s11 + $0x70] sm:$0xff]  ;;  %v4126_v53 = vld [vmem:[%s7132_s11 + $0x78] sm:$0xff] }
 0x2ab   : > { %v4193_v48 = vmul.f32 %v7130_v18, %v4154_v55  ;;  %v4194_v13 = vmul.f32 %v7130_v18, %v4155_v19  ;;  %v4195_v33 = vmul.f32 %v7130_v18, %v4156_v41  ;;  %v4196_v42 = vmul.f32 %v7130_v18, %v4157_v30  ;;  %v4127_v15 = vld [vmem:[%s7132_s11 + $0x80] sm:$0xff]  ;;  %v4128_v29 = vld [vmem:[%s7132_s11 + $0x88] sm:$0xff]  ;;  %v4129_v55 = vld [vmem:[%s7132_s11 + $0x90] sm:$0xff] }
 0x2ac   : > { %v4221_v31 = vmax.f32 %v4189_v26, 0.0  ;;  %v4222_v32 = vmax.f32 %v4190_v25, 0.0  ;;  %v4223_v50 = vmax.f32 %v4191_v17, 0.0  ;;  %v4224_v16 = vmax.f32 %v4192_v22, 0.0  ;;  %v4130_v25 = vld [vmem:[%s7132_s11 + $0x98] sm:$0xff]  ;;  %v4131_v17 = vld [vmem:[%s7132_s11 + $0xa0] sm:$0xff] }
 0x2ad   : > { %v4225_v38 = vmax.f32 %v4193_v48, 0.0  ;;  %v4226_v4 = vmax.f32 %v4194_v13, 0.0  ;;  %v4227_v28 = vmax.f32 %v4195_v33, 0.0  ;;  %v4228_v51 = vmax.f32 %v4196_v42, 0.0  ;;  %v4132_v41 = vld [vmem:[%s7132_s11 + $0xa8] sm:$0xff] }
 0x2ae   : > { %v4874_v45 = vpack.c.bf16 %v4221_v31, %v4221_v31  ;;  %v4875_v57 = vpack.c.bf16 %v4222_v32, %v4222_v32  ;;  %v4876_v52 = vpack.c.bf16 %v4223_v50, %v4223_v50  ;;  %v4877_v46 = vpack.c.bf16 %v4224_v16, %v4224_v16  ;;  %v4133_v31 = vld [vmem:[%s7132_s11 + $0xb0] sm:$0xff] }
 0x2af   : > { %v4878_v49 = vpack.c.bf16 %v4225_v38, %v4225_v38  ;;  %v4879_v27 = vpack.c.bf16 %v4226_v4, %v4226_v4  ;;  %v4880_v36 = vpack.c.bf16 %v4227_v28, %v4227_v28  ;;  %v4881_v35 = vpack.c.bf16 %v4228_v51, %v4228_v51  ;;  %v4134_v38 = vld [vmem:[%s7132_s11 + $0xb8] sm:$0xff] }
 0x2b0   : > { %4382 = vst.msk [vmem:[%s5912_s6] sm:$0xf] %vm4381_vm7, %v4874_v45  ;;  %4383 = vst.msk [vmem:[%s5912_s6 + $0x4] sm:$0xf] %vm4381_vm7, %v4875_v57  ;;  %v4161_v60 = vsub.f32 %v4122_v47, %v7128_v7  ;;  %v4162_v59 = vsub.f32 %v4123_v39, %v7128_v7  ;;  %v4163_v62 = vsub.f32 %v4124_v21, %v7128_v7 }
 0x2b1   : > { %4384 = vst.msk [vmem:[%s5912_s6 + $0x8] sm:$0xf] %vm4381_vm7, %v4876_v52  ;;  %4385 = vst.msk [vmem:[%s5912_s6 + $0xc] sm:$0xf] %vm4381_vm7, %v4877_v46  ;;  %v4197_v63 = vmul.f32 %v7130_v18, %v4158_v56  ;;  %v4198_v54 = vmul.f32 %v7130_v18, %v4159_v58  ;;  %v4199_v0 = vmul.f32 %v7130_v18, %v4160_v12  ;;  %v4135_v12 = vld [vmem:[%s7132_s11 + $0xc0] sm:$0xff] }
 0x2b2   : > { %4386 = vst.msk [vmem:[%s5912_s6 + $0x10] sm:$0xf] %vm4381_vm7, %v4878_v49  ;;  %4387 = vst.msk [vmem:[%s5912_s6 + $0x14] sm:$0xf] %vm4381_vm7, %v4879_v27  ;;  %v4164_v3 = vsub.f32 %v4125_v40, %v7128_v7  ;;  %v4200_v61 = vmul.f32 %v7130_v18, %v4161_v60  ;;  %v4201_v34 = vmul.f32 %v7130_v18, %v4162_v59 }
 0x2b3   : > { %4388 = vst.msk [vmem:[%s5912_s6 + $0x18] sm:$0xf] %vm4381_vm7, %v4880_v36  ;;  %4389 = vst.msk [vmem:[%s5912_s6 + $0x1c] sm:$0xf] %vm4381_vm7, %v4881_v35  ;;  %v4202_v37 = vmul.f32 %v7130_v18, %v4163_v62  ;;  %v4165_v6 = vsub.f32 %v4126_v53, %v7128_v7  ;;  %v4229_v43 = vmax.f32 %v4197_v63, 0.0  ;;  %v4230_v8 = vmax.f32 %v4198_v54, 0.0 }
 0x2b4   : > { %v4231_v9 = vmax.f32 %v4199_v0, 0.0  ;;  %v4203_v10 = vmul.f32 %v7130_v18, %v4164_v3  ;;  %v4232_v2 = vmax.f32 %v4200_v61, 0.0  ;;  %v4233_v1 = vmax.f32 %v4201_v34, 0.0  ;;  %v4136_v53 = vld [vmem:[%s7132_s11 + $0xc8] sm:$0xff]  ;;  %v4137_v35 = vld [vmem:[%s7132_s11 + $0xd0] sm:$0xff]  ;;  %v4138_v54 = vld [vmem:[%s7132_s11 + $0xd8] sm:$0xff] }
 0x2b5   : > { %v4234_v14 = vmax.f32 %v4202_v37, 0.0  ;;  %v4204_v5 = vmul.f32 %v7130_v18, %v4165_v6  ;;  %v4882_v19 = vpack.c.bf16 %v4229_v43, %v4229_v43  ;;  %v4883_v20 = vpack.c.bf16 %v4230_v8, %v4230_v8  ;;  %v4139_v0 = vld [vmem:[%s7132_s11 + $0xe0] sm:$0xff]  ;;  %v4140_v3 = vld [vmem:[%s7132_s11 + $0xe8] sm:$0xff]  ;;  %v4141_v43 = vld [vmem:[%s7132_s11 + $0xf0] sm:$0xff] }
 0x2b6   : > { %v4884_v23 = vpack.c.bf16 %v4231_v9, %v4231_v9  ;;  %v4235_v26 = vmax.f32 %v4203_v10, 0.0  ;;  %v4885_v22 = vpack.c.bf16 %v4232_v2, %v4232_v2  ;;  %v4886_v48 = vpack.c.bf16 %v4233_v1, %v4233_v1  ;;  %v4142_v1 = vld [vmem:[%s7132_s11 + $0xf8] sm:$0xff] }
 0x2b7   : > { %v4887_v13 = vpack.c.bf16 %v4234_v14, %v4234_v14  ;;  %v4236_v30 = vmax.f32 %v4204_v5, 0.0  ;;  %4390 = vst.msk [vmem:[%s5912_s6 + $0x20] sm:$0xf] %vm4381_vm7, %v4882_v19  ;;  %4391 = vst.msk [vmem:[%s5912_s6 + $0x24] sm:$0xf] %vm4381_vm7, %v4883_v20  ;;  %v4166_v50 = vsub.f32 %v4127_v15, %v7128_v7  ;;  %v4167_v33 = vsub.f32 %v4128_v29, %v7128_v7 }
 0x2b8   : > { %4392 = vst.msk [vmem:[%s5912_s6 + $0x28] sm:$0xf] %vm4381_vm7, %v4884_v23  ;;  %v4888_v32 = vpack.c.bf16 %v4235_v26, %v4235_v26  ;;  %v4168_v16 = vsub.f32 %v4129_v55, %v7128_v7  ;;  %4393 = vst.msk [vmem:[%s5912_s6 + $0x2c] sm:$0xf] %vm4381_vm7, %v4885_v22  ;;  %v4169_v42 = vsub.f32 %v4130_v25, %v7128_v7 }
 0x2b9   : > { %4394 = vst.msk [vmem:[%s5912_s6 + $0x30] sm:$0xf] %vm4381_vm7, %v4886_v48  ;;  %4395 = vst.msk [vmem:[%s5912_s6 + $0x34] sm:$0xf] %vm4381_vm7, %v4887_v13  ;;  %v4889_v4 = vpack.c.bf16 %v4236_v30, %v4236_v30  ;;  %v4170_v24 = vsub.f32 %v4131_v17, %v7128_v7  ;;  %v4171_v44 = vsub.f32 %v4132_v41, %v7128_v7 }
 0x2ba   : > { %4396 = vst.msk [vmem:[%s5912_s6 + $0x38] sm:$0xf] %vm4381_vm7, %v4888_v32  ;;  %v4205_v11 = vmul.f32 %v7130_v18, %v4166_v50  ;;  %v4206_v45 = vmul.f32 %v7130_v18, %v4167_v33  ;;  %v4207_v57 = vmul.f32 %v7130_v18, %v4168_v16  ;;  %v4172_v52 = vsub.f32 %v4133_v31, %v7128_v7 }
 0x2bb   : > { %4397 = vst.msk [vmem:[%s5912_s6 + $0x3c] sm:$0xf] %vm4381_vm7, %v4889_v4  ;;  %v4208_v28 = vmul.f32 %v7130_v18, %v4169_v42  ;;  %v4209_v47 = vmul.f32 %v7130_v18, %v4170_v24  ;;  %v4210_v39 = vmul.f32 %v7130_v18, %v4171_v44  ;;  %v4173_v21 = vsub.f32 %v4134_v38, %v7128_v7 }
 0x2bc   : > { %v4237_v46 = vmax.f32 %v4205_v11, 0.0  ;;  %v4238_v49 = vmax.f32 %v4206_v45, 0.0  ;;  %v4239_v27 = vmax.f32 %v4207_v57, 0.0  ;;  %v4211_v51 = vmul.f32 %v7130_v18, %v4172_v52 }
 0x2bd   : > { %v4240_v40 = vmax.f32 %v4208_v28, 0.0  ;;  %v4241_v36 = vmax.f32 %v4209_v47, 0.0  ;;  %v4242_v56 = vmax.f32 %v4210_v39, 0.0  ;;  %v4212_v58 = vmul.f32 %v7130_v18, %v4173_v21 }
 0x2be   : > { %v4890_v60 = vpack.c.bf16 %v4237_v46, %v4237_v46  ;;  %v4891_v59 = vpack.c.bf16 %v4238_v49, %v4238_v49  ;;  %v4892_v62 = vpack.c.bf16 %v4239_v27, %v4239_v27  ;;  %v4243_v63 = vmax.f32 %v4211_v51, 0.0 }
 0x2bf   : > { %v4893_v61 = vpack.c.bf16 %v4240_v40, %v4240_v40  ;;  %v4894_v34 = vpack.c.bf16 %v4241_v36, %v4241_v36  ;;  %v4895_v37 = vpack.c.bf16 %v4242_v56, %v4242_v56  ;;  %v4244_v6 = vmax.f32 %v4212_v58, 0.0 }
 0x2c0   : > { %4398 = vst.msk [vmem:[%s5912_s6 + $0x40] sm:$0xf] %vm4381_vm7, %v4890_v60  ;;  %4399 = vst.msk [vmem:[%s5912_s6 + $0x44] sm:$0xf] %vm4381_vm7, %v4891_v59  ;;  %v4896_v8 = vpack.c.bf16 %v4243_v63, %v4243_v63  ;;  %v4174_v9 = vsub.f32 %v4135_v12, %v7128_v7  ;;  %v4175_v10 = vsub.f32 %v4136_v53, %v7128_v7 }
 0x2c1   : > { %4400 = vst.msk [vmem:[%s5912_s6 + $0x48] sm:$0xf] %vm4381_vm7, %v4892_v62  ;;  %v4176_v2 = vsub.f32 %v4137_v35, %v7128_v7  ;;  %4401 = vst.msk [vmem:[%s5912_s6 + $0x4c] sm:$0xf] %vm4381_vm7, %v4893_v61  ;;  %v4897_v14 = vpack.c.bf16 %v4244_v6, %v4244_v6  ;;  %v4177_v5 = vsub.f32 %v4138_v54, %v7128_v7 }
 0x2c2   : > { %4402 = vst.msk [vmem:[%s5912_s6 + $0x50] sm:$0xf] %vm4381_vm7, %v4894_v34  ;;  %4403 = vst.msk [vmem:[%s5912_s6 + $0x54] sm:$0xf] %vm4381_vm7, %v4895_v37  ;;  %v4178_v15 = vsub.f32 %v4139_v0, %v7128_v7  ;;  %v4179_v29 = vsub.f32 %v4140_v3, %v7128_v7  ;;  %v4213_v55 = vmul.f32 %v7130_v18, %v4174_v9 }
 0x2c3   : > { %4404 = vst.msk [vmem:[%s5912_s6 + $0x58] sm:$0xf] %vm4381_vm7, %v4896_v8  ;;  %v4214_v19 = vmul.f32 %v7130_v18, %v4175_v10  ;;  %v4215_v20 = vmul.f32 %v7130_v18, %v4176_v2  ;;  %v4180_v23 = vsub.f32 %v4141_v43, %v7128_v7  ;;  %4405 = vst.msk [vmem:[%s5912_s6 + $0x5c] sm:$0xf] %vm4381_vm7, %v4897_v14 }
 0x2c4   : > { %v4216_v26 = vmul.f32 %v7130_v18, %v4177_v5  ;;  %v4217_v25 = vmul.f32 %v7130_v18, %v4178_v15  ;;  %v4218_v17 = vmul.f32 %v7130_v18, %v4179_v29  ;;  %v4181_v41 = vsub.f32 %v4142_v1, %v7128_v7 }
 0x2c5   : > { %v4245_v22 = vmax.f32 %v4213_v55, 0.0  ;;  %v4246_v48 = vmax.f32 %v4214_v19, 0.0  ;;  %v4247_v13 = vmax.f32 %v4215_v20, 0.0  ;;  %v4219_v30 = vmul.f32 %v7130_v18, %v4180_v23 }
 0x2c6   : > { %v4248_v31 = vmax.f32 %v4216_v26, 0.0  ;;  %v4249_v32 = vmax.f32 %v4217_v25, 0.0  ;;  %v4250_v50 = vmax.f32 %v4218_v17, 0.0  ;;  %v4220_v33 = vmul.f32 %v7130_v18, %v4181_v41 }
 0x2c7   : > { %v4898_v16 = vpack.c.bf16 %v4245_v22, %v4245_v22  ;;  %v4899_v38 = vpack.c.bf16 %v4246_v48, %v4246_v48  ;;  %v4900_v7 = vpack.c.bf16 %v4247_v13, %v4247_v13  ;;  %v4251_v4 = vmax.f32 %v4219_v30, 0.0 }
 0x2c8   : > { %v4901_v42 = vpack.c.bf16 %v4248_v31, %v4248_v31  ;;  %v4902_v24 = vpack.c.bf16 %v4249_v32, %v4249_v32  ;;  %v4903_v44 = vpack.c.bf16 %v4250_v50, %v4250_v50  ;;  %v4252_v11 = vmax.f32 %v4220_v33, 0.0 }
 0x2c9   : > { %4406 = vst.msk [vmem:[%s5912_s6 + $0x60] sm:$0xf] %vm4381_vm7, %v4898_v16  ;;  %4407 = vst.msk [vmem:[%s5912_s6 + $0x64] sm:$0xf] %vm4381_vm7, %v4899_v38  ;;  %v4904_v45 = vpack.c.bf16 %v4251_v4, %v4251_v4 }
 0x2ca   : > { %4408 = vst.msk [vmem:[%s5912_s6 + $0x68] sm:$0xf] %vm4381_vm7, %v4900_v7  ;;  %4409 = vst.msk [vmem:[%s5912_s6 + $0x6c] sm:$0xf] %vm4381_vm7, %v4901_v42  ;;  %v4905_v18 = vpack.c.bf16 %v4252_v11, %v4252_v11 }
 0x2cb   : > { %4410 = vst.msk [vmem:[%s5912_s6 + $0x70] sm:$0xf] %vm4381_vm7, %v4902_v24  ;;  %4411 = vst.msk [vmem:[%s5912_s6 + $0x74] sm:$0xf] %vm4381_vm7, %v4903_v44 }
 0x2cc   : > { %4412 = vst.msk [vmem:[%s5912_s6 + $0x78] sm:$0xf] %vm4381_vm7, %v4904_v45  ;;  %4413 = vst.msk [vmem:[%s5912_s6 + $0x7c] sm:$0xf] %vm4381_vm7, %v4905_v18 }
 0x2cd PF: > { %s13_s18 = sadd.s32 1, %s5832_s18   ;;  %s7319_s12 = smov %s5820_s15 }
 0x2ce   : > { %p10_p12 = scmp.ge.s32.totalorder %s13_s18, 10   ;;  %s7320_s13 = smov %s5824_s16 }
 0x2cf   : > { %s7321_s14 = smov %s5828_s17  ;;  %s7322_s15 = smov %s7326_s19 }
 0x2d0   : > { %s7323_s16 = smov %s7330_s20  ;;  %s7324_s17 = smov %s7334_s21 }
 0x2d1   :  { %12 = sbr.rel (!%p10_p12) target bundleno = 4 (0x4), region = 91 }

// kernel: residual_block.3
= control target key start
LH: loop header
LB: loop body
LE: loop exit
PB: predicated region body
PF: predicated region fallthrough
CT: control target
= control target key end

     0   :  { %s5792_s15 = smov 0   ;;  %s5794_s16 = smov 0   ;;  %s7288_s0 = inlined_call_operand.vmem [shape: bf16[2,576,4], index: 0, kind: input, shape index: {}]   ;;  %s7289_s1 = inlined_call_operand.vmem [shape: bf16[9,4,4], index: 1, kind: input, shape index: {}]   ;;  %s7290_s2 = inlined_call_operand.vmem [shape: f32[256,1], index: 2, kind: input, shape index: {}]   ;;  %s7291_s3 = inlined_call_operand.vmem [shape: f32[2,512,4], index: 3, kind: input, shape index: {}]   ;;  %s7292_s4 = inlined_call_operand.vmem [shape: f32[2,512,4], index: 4, kind: output, shape index: {}]  }
   0x1   :  { %s5796_s17 = smov 0   ;;  %s5798_s18 = smov 0  }
   0x2   :  { %s5800_s19 = smov 0   ;;  %s5802_s20 = smov 0  }
   0x3   :  { %s5804_s21 = smov 0  }
   0x4 LB: > { %s26_s22 = sadd.s32 1, %s5751_s18  ;;  %s29_s23 = sadd.s32 1, %s5755_s19  ;;  %s5763_s21 = sphi %s5804_s21, %s14_s21   ;;  %s5759_s20 = sphi %s5802_s20, %s7298_s20   ;;  %s5755_s19 = sphi %s5800_s19, %s7297_s19   ;;  %s5751_s18 = sphi %s5798_s18, %s7296_s18   ;;  %s5747_s17 = sphi %s5796_s17, %s7295_s17   ;;  %s5743_s16 = sphi %s5794_s16, %s7294_s16   ;;  %s5739_s15 = sphi %s5792_s15, %s7293_s15  }
   0x5   : > { %p27_p0 = scmp.ge.s32.totalorder %s26_s22, 2  ;;  %p4513_p1 = scmp.ge.s32.totalorder %s5763_s21, 1 }
   0x6   : > { %p206_p2 = scmp.lt.s32.totalorder %s5763_s21, 9  ;;  %s33_s24 = sadd.s32 1, %s5759_s20 }
   0x7   : > { %s7300_s22 = smov (%p27_p0, %s26_s22), 0  ;;  %s7302_s23 = smov (!%p27_p0, %s29_s23), %s5755_s19 }
   0x8   : > { %p207_p3 = pnand %p4513_p1, %p206_p2  ;;  %p31_p4 = scmp.ge.s32.totalorder %s7302_s23, 2 }
   0x9   : > { %p247_p6 = scmp.lt.s32.totalorder (!%p207_p3), %s5747_s17, 1  ;;  %s252_s25 = smul.u32 (!%p207_p3), %s5739_s15, %s5743_s16 }
   0xa   : > { %s7304_s23 = smov (%p31_p4, %s7302_s23), 0  ;;  %s7306_s24 = smov (!%p31_p4, %s33_s24), %s5759_s20 }
   0xb   : > { %p35_p5 = scmp.ge.s32.totalorder %s7306_s24, 2  ;;  %210 = sbr.rel (%p207_p3) target bundleno = 710 (0x2c6), region = 36 }
   0xc   : > { %s4515_s26 = sshll.u32 (!%p207_p3), %s252_s25, 5  ;;  %p4521_p8 = scmp.ne.s32.totalorder (!%p207_p3), %s5743_s16, 0 }
   0xd   : > { %s7308_s24 = smov (%p35_p5, %s7306_s24), 0  ;;  %p256_p7 = scmp.lt.s32.totalorder (!%p207_p3), %s4515_s26, 63 }
  0x12   : > { %s7310_s17 = smov (!%p247_p6, %s5747_s17), 1  ;;  %s7312_s26 = smov (!%p256_p7, %s4515_s26), 63 }
  0x13   : > { %s5502_s27 = smul.u32 288, %s7310_s17  ;;  %s4516_s5 = sshll.u32 %s7310_s17, 6 }
  0x14   : > { %s259_s6 = sadd.s32 %s4516_s5, %s7312_s26  ;;  %280 = sbr.rel (%p4521_p8) target bundleno = 643 (0x283), region = 40 }
  0x15   : > { %s5843_s30 = scalar_lea.vmem %s7288_s0, %s5502_s27  ;;  %s4517_s7 = sshll.u32 %s259_s6, 3 }
  0x16   : > { %s5848_s10 = scalar_lea.vmem %s7291_s3, %s4517_s7  ;;  %s5853_s13 = scalar_lea.vmem %s7292_s4, %s4517_s7 }
  0x17   : > { %p4522_p9 = scmp.ne.s32.totalorder (!%p4521_p8), %s5739_s15, 0 }
  0x1b   : > { %284 = sbr.rel (%p4522_p9) target bundleno = 34 (0x22), region = 44  ;;  %vm285_vm0 = vcmask (!%p4522_p9), 24576   ;;  %v5765_v0 = vmov (!%p4522_p9), 0.0  }
  0x1c   : > { %286 = vst.msk [vmem:[#allocation3] sm:$0x1] (!%p4522_p9), %vm285_vm0, %v5765_v0  ;;  %287 = vst.msk [vmem:[#allocation4] sm:$0x1] (!%p4522_p9), %vm285_vm0, %v5765_v0 }
  0x22 PF: > { %v4529_v1 = vld [vmem:[%s7289_s1 + $0x8] sm:$0x3]  ;;  %vm497_vm1 = vcmask 1041408   ;;  %v4525_v2 = vld [vmem:[%s7289_s1 + $0x2] sm:$0x3]  ;;  %s5864_s27 = sshll.u32 %s5739_s15, 8 }
  0x23   : > { %5492 = vmatprep.subr.msk.bf16.mxu1 %vm497_vm1, %v4529_v1  ;;  %5493 = vmatprep.subr.msk.bf16.mxu0 %vm497_vm1, %v4525_v2  ;;  %v499_v3 = vsel %vm497_vm1, %v4529_v1, 0  ;;  %v791_v4 = vsel %vm497_vm1, %v4525_v2, 0  ;;  %s289_s28 = sshra.s32 %s5864_s27, 3  ;;  %s4834_s5 = sadd.s32 32, %s5864_s27  ;;  %v4596_v5 = vld [vmem:[%s7289_s1 + $0xe] sm:$0x3] }
  0x24   : > { %4993 = vmatpush3.bf16.msra.mxu1 %v499_v3  ;;  %5027 = vmatpush3.bf16.msra.mxu0 %v791_v4  ;;  %s4524_s29 = sshll.u32 %s289_s28, 2  ;;  %vm448_vm2 = vcmask 31744   ;;  %s330_s9 = sshra.s32 %s4834_s5, 3  ;;  %v4728_v7 = vld [vmem:[%s7289_s1 + $0xa] sm:$0x3]  ;;  %v1123_v9 = vsel %vm497_vm1, %v4596_v5, 0 }
  0x25   : > { %s5876_s8 = scalar_lea.vmem %s5843_s30, %s4524_s29  ;;  %5494 = vmatprep.subr.msk.bf16.mxu1 %vm497_vm1, %v4525_v2  ;;  %5495 = vmatprep.subr.msk.bf16.mxu0 %vm497_vm1, %v4596_v5  ;;  %s4528_s11 = sshll.u32 %s330_s9, 2  ;;  %v5894_v11 = vld [vmem:[%s7289_s1 + $0x6] sm:$0x3]  ;;  %v2720_v30 = vsel %vm497_vm1, %v4728_v7, 0  ;;  %v1383_v49 = vld [vmem:[%s7289_s1] sm:$0x3] }
  0x26   : > { %v5563_v6 = vld [vmem:[%s5876_s8] sm:$0xff]   ;;  %s5885_s17 = scalar_lea.vmem %s5843_s30, %s4528_s11  ;;  %v5565_v8 = vld [vmem:[%s5876_s8 + $0x8] sm:$0xff]   ;;  %v5567_v13 = vld [vmem:[%s5876_s8 + $0x10] sm:$0xff]   ;;  %s4836_s28 = sadd.s32 64, %s5864_s27  ;;  %v1547_v48 = vsel %vm497_vm1, %v5894_v11, 0  ;;  %vm4021_vm5 = vcmask 24576  }
  0x27   : > { %5028 = vmatprep.mubr.msk.bf16.mxu0 %vm448_vm2, %v5563_v6  ;;  %v5564_v10 = vld [vmem:[%s5885_s17] sm:$0xff]   ;;  %v5566_v12 = vld [vmem:[%s5885_s17 + $0x8] sm:$0xff]   ;;  %v5568_v14 = vld [vmem:[%s5885_s17 + $0x10] sm:$0xff]   ;;  %s956_s29 = sshra.s32 %s4836_s28, 3 }
  0x28   : > { %5029 = vmatmul.mubr.msk.bf16.vlgmr.msra.gmra.mrb[0].mxu0 %vm448_vm2, %v5565_v8  ;;  %4994 = vmatprep.mubr.msk.bf16.mxu1 %vm448_vm2, %v5564_v10  ;;  %v5569_v15 = vld [vmem:[%s5876_s8 + $0x18] sm:$0xff]   ;;  %v5571_v16 = vld [vmem:[%s5876_s8 + $0x20] sm:$0xff]   ;;  %s4595_s5 = sshll.u32 %s956_s29, 2  ;;  %v5573_v19 = vld [vmem:[%s5876_s8 + $0x28] sm:$0xff]   ;;  %s6311_s29 = scalar_lea.vmem [#allocation2], %s5864_s27 }
  0x29   : > { %5061 = vmatpush3.bf16.msra.mxu0 %v1123_v9  ;;  %4995 = vmatmul.mubr.msk.bf16.vlgmr.msra.gmra.mrb[0].mxu1 %vm448_vm2, %v5566_v12  ;;  %v5570_v17 = vld [vmem:[%s5885_s17 + $0x18] sm:$0xff]   ;;  %v5572_v18 = vld [vmem:[%s5885_s17 + $0x20] sm:$0xff]   ;;  %s5918_s6 = scalar_lea.vmem %s5843_s30, %s4595_s5  ;;  %v5575_v20 = vld [vmem:[%s5876_s8 + $0x30] sm:$0xff]  }
  0x2a   : > { %5499 = vmatprep.subr.msk.bf16.mxu0 %vm497_vm1, %v4728_v7  ;;  %5299 = vmatpush3.bf16.msra.mxu1 %v791_v4  ;;  %v5574_v21 = vld [vmem:[%s5885_s17 + $0x28] sm:$0xff]   ;;  %v5576_v22 = vld [vmem:[%s5885_s17 + $0x30] sm:$0xff]   ;;  %v5577_v23 = vld [vmem:[%s5876_s8 + $0x38] sm:$0xff]   ;;  %v1839_v4 = vsel %vm497_vm1, %v1383_v49, 0 }
  0x2b   : > { %5032 = vmatprep.mubr.msk.bf16.mxu0 %vm448_vm2, %v5567_v13  ;;  %4998 = vmatprep.mubr.msk.bf16.mxu1 %vm448_vm2, %v5568_v14  ;;  %v5579_v24 = vld [vmem:[%s5918_s6] sm:$0xff]   ;;  %v5578_v25 = vld [vmem:[%s5885_s17 + $0x38] sm:$0xff]   ;;  %v5581_v27 = vld [vmem:[%s5918_s6 + $0x8] sm:$0xff]  }
  0x2c   : > { %5496 = vmatprep.subr.msk.bf16.mxu1 %vm497_vm1, %v5894_v11  ;;  %v5580_v26 = vld [vmem:[%s5885_s17 + $0x40] sm:$0xff]   ;;  %v5583_v28 = vld [vmem:[%s5918_s6 + $0x10] sm:$0xff]   ;;  %v5582_v29 = vld [vmem:[%s5885_s17 + $0x48] sm:$0xff]  }
  0x2d   : > { %v5584_v31 = vld [vmem:[%s5885_s17 + $0x50] sm:$0xff]   ;;  %v5585_v32 = vld [vmem:[%s5918_s6 + $0x18] sm:$0xff]   ;;  %v5587_v33 = vld [vmem:[%s5918_s6 + $0x20] sm:$0xff]  }
  0x2e   : > { %v5586_v34 = vld [vmem:[%s5885_s17 + $0x58] sm:$0xff]   ;;  %v5588_v35 = vld [vmem:[%s5885_s17 + $0x60] sm:$0xff]   ;;  %v5589_v36 = vld [vmem:[%s5918_s6 + $0x28] sm:$0xff]  }
  0x2f   : > { %v5591_v37 = vld [vmem:[%s5918_s6 + $0x30] sm:$0xff]   ;;  %v5590_v38 = vld [vmem:[%s5885_s17 + $0x68] sm:$0xff]   ;;  %v5593_v40 = vld [vmem:[%s5918_s6 + $0x38] sm:$0xff]  }
  0x30   : > { %5033 = vmatmul.mubr.msk.bf16.gmra.mrb[4].mxu0 %vm448_vm2, %v5569_v15  ;;  %v5592_v39 = vld [vmem:[%s5885_s17 + $0x70] sm:$0xff]   ;;  %v5595_v41 = vld [vmem:[%s5918_s6 + $0x40] sm:$0xff]   ;;  %v5594_v42 = vld [vmem:[%s5885_s17 + $0x78] sm:$0xff]  }
  0x31   : > { %5036 = vmatprep.mubr.msk.bf16.mxu0 %vm448_vm2, %v5571_v16  ;;  %4999 = vmatmul.mubr.msk.bf16.gmra.mrb[4].mxu1 %vm448_vm2, %v5570_v17  ;;  %v5596_v43 = vld [vmem:[%s5876_s8 + $0x40] sm:$0xff]   ;;  %v5597_v44 = vld [vmem:[%s5918_s6 + $0x48] sm:$0xff]   ;;  %v5599_v45 = vld [vmem:[%s5918_s6 + $0x50] sm:$0xff]  }
  0x32   : > { %5002 = vmatprep.mubr.msk.bf16.mxu1 %vm448_vm2, %v5572_v18  ;;  %v5598_v46 = vld [vmem:[%s5876_s8 + $0x48] sm:$0xff]   ;;  %v5600_v47 = vld [vmem:[%s5876_s8 + $0x50] sm:$0xff]   ;;  %v5601_v50 = vld [vmem:[%s5918_s6 + $0x58] sm:$0xff]  }
  0x33   : > { %v5603_v51 = vld [vmem:[%s5918_s6 + $0x60] sm:$0xff]   ;;  %v5602_v52 = vld [vmem:[%s5876_s8 + $0x58] sm:$0xff]   ;;  %v5605_v54 = vld [vmem:[%s5918_s6 + $0x68] sm:$0xff]  }
  0x34   : > { %v5604_v53 = vld [vmem:[%s5876_s8 + $0x60] sm:$0xff]   ;;  %v5607_v55 = vld [vmem:[%s5918_s6 + $0x70] sm:$0xff]   ;;  %v5606_v57 = vld [vmem:[%s5876_s8 + $0x68] sm:$0xff]  }
  0x35   : > { %v4727_v56 = vld [vmem:[%s7289_s1 + $0x4] sm:$0x3]  ;;  %v5608_v58 = vld [vmem:[%s5876_s8 + $0x70] sm:$0xff]   ;;  %v5609_v59 = vld [vmem:[%s5918_s6 + $0x78] sm:$0xff]  }
  0x36   : > { %v5611_v60 = vld [vmem:[%s5885_s17] sm:$0xff]   ;;  %v5610_v61 = vld [vmem:[%s5876_s8 + $0x78] sm:$0xff]   ;;  %v5613_v63 = vld [vmem:[%s5885_s17 + $0x8] sm:$0xff]   ;;  %v3012_v2 = vsel %vm497_vm1, %v4727_v56, 0 }
  0x37   : > { %v5612_v62 = vld [vmem:[%s5885_s17] sm:$0xff]   ;;  %v5615_v0 = vld [vmem:[%s5885_s17 + $0x10] sm:$0xff]   ;;  %v5614_v1 = vld [vmem:[%s5885_s17 + $0x8] sm:$0xff]  }
  0x38   : > { %5037 = vmatmul.mubr.msk.bf16.gmra.mrb[8].mxu0 %vm448_vm2, %v5573_v19  ;;  %v5616_v3 = vld [vmem:[%s5885_s17 + $0x10] sm:$0xff]   ;;  %v6021_v5 = vld [vmem:[%s7289_s1 + $0xc] sm:$0x3]  ;;  %v5617_v6 = vld [vmem:[%s5885_s17 + $0x18] sm:$0xff]  }
  0x39   : > { %5040 = vmatprep.mubr.msk.bf16.mxu0 %vm448_vm2, %v5575_v20  ;;  %5003 = vmatmul.mubr.msk.bf16.gmra.mrb[8].mxu1 %vm448_vm2, %v5574_v21  ;;  %v5619_v7 = vld [vmem:[%s5885_s17 + $0x20] sm:$0xff]   ;;  %v5618_v8 = vld [vmem:[%s5885_s17 + $0x18] sm:$0xff]   ;;  %v5621_v10 = vld [vmem:[%s5885_s17 + $0x28] sm:$0xff]  }
  0x3a   : > { %5006 = vmatprep.mubr.msk.bf16.mxu1 %vm448_vm2, %v5576_v22  ;;  %v5620_v9 = vld [vmem:[%s5885_s17 + $0x20] sm:$0xff]   ;;  %v5622_v11 = vld [vmem:[%s5885_s17 + $0x28] sm:$0xff]   ;;  %v5623_v12 = vld [vmem:[%s5885_s17 + $0x30] sm:$0xff]  }
  0x3b   : > { %v4793_v13 = vld [vmem:[%s7289_s1 + $0x10] sm:$0x3]  ;;  %v5625_v15 = vld [vmem:[%s5885_s17 + $0x38] sm:$0xff]   ;;  %v5627_v16 = vld [vmem:[%s5885_s17 + $0x40] sm:$0xff]  }
  0x3c   : > { %v5624_v14 = vld [vmem:[%s5885_s17 + $0x30] sm:$0xff]   ;;  %v5626_v17 = vld [vmem:[%s5885_s17 + $0x38] sm:$0xff]   ;;  %v5628_v18 = vld [vmem:[%s5885_s17 + $0x40] sm:$0xff]  }
  0x3d   : > { %v5629_v19 = vld [vmem:[%s5885_s17 + $0x48] sm:$0xff]   ;;  %v5631_v20 = vld [vmem:[%s5885_s17 + $0x50] sm:$0xff]  }
  0x3e   : > { %v5630_v21 = vld [vmem:[%s5885_s17 + $0x48] sm:$0xff]   ;;  %v5632_v22 = vld [vmem:[%s5885_s17 + $0x50] sm:$0xff]  }
  0x40   : > { %5041 = vmatmul.mubr.msk.bf16.gmra.mrb[12].mxu0 %vm448_vm2, %v5577_v23  ;;  %v5633_v23 = vld [vmem:[%s5885_s17 + $0x58] sm:$0xff]  }
  0x41   : > { %5062 = vmatprep.mubr.msk.bf16.mxu0 %vm448_vm2, %v5579_v24  ;;  %5007 = vmatmul.mubr.msk.bf16.gmra.mrb[12].mxu1 %vm448_vm2, %v5578_v25  ;;  %v5635_v24 = vld [vmem:[%s5885_s17 + $0x60] sm:$0xff]   ;;  %v5634_v25 = vld [vmem:[%s5885_s17 + $0x58] sm:$0xff]  }
  0x42   : > { %5010 = vmatprep.mubr.msk.bf16.mxu1 %vm448_vm2, %v5580_v26  ;;  %v5636_v26 = vld [vmem:[%s5885_s17 + $0x60] sm:$0xff]  }
  0x48   : > { %5063 = vmatmul.mubr.msk.bf16.vlgmr.msra.gmra.mrb[0].mxu0 %vm448_vm2, %v5581_v27  ;;  %v5637_v27 = vld [vmem:[%s5885_s17 + $0x68] sm:$0xff]  }
  0x49   : > { %5066 = vmatprep.mubr.msk.bf16.mxu0 %vm448_vm2, %v5583_v28  ;;  %5197 = vmatpush3.bf16.msra.mxu0 %v2720_v30  ;;  %v5639_v28 = vld [vmem:[%s5885_s17 + $0x70] sm:$0xff]  }
  0x4a   : > { %5011 = vmatmul.mubr.msk.bf16.gmra.mrb[16].mxu1 %vm448_vm2, %v5582_v29  ;;  %5500 = vmatprep.subr.msk.bf16.mxu0 %vm497_vm1, %v4727_v56  ;;  %v5638_v29 = vld [vmem:[%s5885_s17 + $0x68] sm:$0xff]   ;;  %v5640_v30 = vld [vmem:[%s5885_s17 + $0x70] sm:$0xff]   ;;  %v5660_v56 = vld [vmem:[%s5876_s8 + $0x40] sm:$0xff]  }
  0x4b   : > { %5014 = vmatprep.mubr.msk.bf16.mxu1 %vm448_vm2, %v5584_v31  ;;  %v5641_v31 = vld [vmem:[%s5885_s17 + $0x78] sm:$0xff]  }
  0x50   : > { %5067 = vmatmul.mubr.msk.bf16.gmra.mrb[4].mxu0 %vm448_vm2, %v5585_v32  ;;  %v5643_v32 = vld [vmem:[%s5876_s8] sm:$0xff]  }
  0x51   : > { %5070 = vmatprep.mubr.msk.bf16.mxu0 %vm448_vm2, %v5587_v33  ;;  %v5642_v33 = vld [vmem:[%s5885_s17 + $0x78] sm:$0xff]  }
  0x52   : > { %5015 = vmatmul.mubr.msk.bf16.gmra.mrb[20].mxu1 %vm448_vm2, %v5586_v34  ;;  %v5644_v34 = vld [vmem:[%s5876_s8] sm:$0xff]  }
  0x53   : > { %5018 = vmatprep.mubr.msk.bf16.mxu1 %vm448_vm2, %v5588_v35  ;;  %v5645_v35 = vld [vmem:[%s5876_s8 + $0x8] sm:$0xff]  }
  0x58   : > { %5071 = vmatmul.mubr.msk.bf16.gmra.mrb[8].mxu0 %vm448_vm2, %v5589_v36  ;;  %v5647_v36 = vld [vmem:[%s5876_s8 + $0x10] sm:$0xff]  }
  0x59   : > { %5074 = vmatprep.mubr.msk.bf16.mxu0 %vm448_vm2, %v5591_v37  ;;  %v5646_v37 = vld [vmem:[%s5876_s8 + $0x8] sm:$0xff]  }
  0x5a   : > { %5019 = vmatmul.mubr.msk.bf16.gmra.mrb[24].mxu1 %vm448_vm2, %v5590_v38  ;;  %v3338_v38 = vsel %vm497_vm1, %v4793_v13, 0 }
  0x5b   : > { %5022 = vmatprep.mubr.msk.bf16.mxu1 %vm448_vm2, %v5592_v39  ;;  %v5648_v39 = vld [vmem:[%s5876_s8 + $0x10] sm:$0xff]  }
  0x60   : > { %5075 = vmatmul.mubr.msk.bf16.gmra.mrb[12].mxu0 %vm448_vm2, %v5593_v40  ;;  %v2165_v40 = vsel %vm497_vm1, %v6021_v5, 0 }
  0x61   : > { %5078 = vmatprep.mubr.msk.bf16.mxu0 %vm448_vm2, %v5595_v41  ;;  %v5649_v41 = vld [vmem:[%s5876_s8 + $0x18] sm:$0xff]  }
  0x62   : > { %5023 = vmatmul.mubr.msk.bf16.gmra.mrb[28].mxu1 %vm448_vm2, %v5594_v42  ;;  %v5651_v42 = vld [vmem:[%s5876_s8 + $0x20] sm:$0xff]  }
  0x63   : > { %5044 = vmatprep.mubr.msk.bf16.mxu1 %vm448_vm2, %v5596_v43  ;;  %v5650_v43 = vld [vmem:[%s5876_s8 + $0x18] sm:$0xff]  }
  0x68   : > { %5079 = vmatmul.mubr.msk.bf16.gmra.mrb[16].mxu0 %vm448_vm2, %v5597_v44  ;;  %v5652_v44 = vld [vmem:[%s5876_s8 + $0x20] sm:$0xff]  }
  0x69   : > { %5082 = vmatprep.mubr.msk.bf16.mxu0 %vm448_vm2, %v5599_v45  ;;  %v5653_v45 = vld [vmem:[%s5876_s8 + $0x28] sm:$0xff]  }
  0x6a   : > { %5045 = vmatmul.mubr.msk.bf16.vlgmr.msra.gmra.mrb[16].mxu1 %vm448_vm2, %v5598_v46  ;;  %v5655_v46 = vld [vmem:[%s5876_s8 + $0x30] sm:$0xff]  }
  0x6b   : > { %5095 = vmatpush3.bf16.msra.mxu1 %v1547_v48  ;;  %5048 = vmatprep.mubr.msk.bf16.mxu1 %vm448_vm2, %v5600_v47  ;;  %v5654_v47 = vld [vmem:[%s5876_s8 + $0x28] sm:$0xff]   ;;  %v5656_v48 = vld [vmem:[%s5876_s8 + $0x30] sm:$0xff]  }
  0x6c   : > { %5497 = vmatprep.subr.msk.bf16.mxu1 %vm497_vm1, %v1383_v49  ;;  %v3726_v49 = vld [vmem:[%s7290_s2] sm:$0xff] }
  0x70   : > { %5083 = vmatmul.mubr.msk.bf16.gmra.mrb[20].mxu0 %vm448_vm2, %v5601_v50  ;;  %v3728_v50 = vld [vmem:[%s7290_s2 + $0x10] sm:$0xff] }
  0x71   : > { %5086 = vmatprep.mubr.msk.bf16.mxu0 %vm448_vm2, %v5603_v51  ;;  %v5657_v51 = vld [vmem:[%s5876_s8 + $0x38] sm:$0xff]  }
  0x72   : > { %5049 = vmatmul.mubr.msk.bf16.gmra.mrb[20].mxu1 %vm448_vm2, %v5602_v52  ;;  %v5766_v52 = vmov 0  }
  0x73   : > { %5052 = vmatprep.mubr.msk.bf16.mxu1 %vm448_vm2, %v5604_v53  ;;  %5561 = vset.pattern.permute.xlu0 %v5766_v52  ;;  %v5659_v53 = vld [vmem:[%s5876_s8 + $0x40] sm:$0xff]  }
  0x74   : > { %5562 = vset.pattern.permute.xlu1 %v5766_v52  ;;  %3761 = vperm.xlu0 %5561, %v3726_v49   ;;  %v3752_v49 = vld [vmem:[%s7290_s2 + $0xd0] sm:$0xff]  ;;  %v3753_v52 = vld [vmem:[%s7290_s2 + $0xd8] sm:$0xff] }
  0x75   : > { %3771 = vperm.xlu1 %5562, %v3728_v50  }
  0x78   : > { %5087 = vmatmul.mubr.msk.bf16.gmra.mrb[24].mxu0 %vm448_vm2, %v5605_v54  ;;  %v5658_v54 = vld [vmem:[%s5876_s8 + $0x38] sm:$0xff]  }
  0x79   : > { %5090 = vmatprep.mubr.msk.bf16.mxu0 %vm448_vm2, %v5607_v55  ;;  %v3727_v55 = vld [vmem:[%s7290_s2 + $0x8] sm:$0xff] }
  0x7a   : > { %5053 = vmatmul.mubr.msk.bf16.gmra.mrb[24].mxu1 %vm448_vm2, %v5606_v57  ;;  %v3729_v57 = vld [vmem:[%s7290_s2 + $0x18] sm:$0xff]  ;;  %3766 = vperm.xlu0 %5561, %v3727_v55   ;;  %v3755_v55 = vld [vmem:[%s7290_s2 + $0xe8] sm:$0xff] }
  0x7b   : > { %5056 = vmatprep.mubr.msk.bf16.mxu1 %vm448_vm2, %v5608_v58  ;;  %3776 = vperm.xlu1 %5562, %v3729_v57   ;;  %v3730_v58 = vld [vmem:[%s7290_s2 + $0x20] sm:$0xff] }
  0x7e   : > { %3781 = vperm.xlu0 %5561, %v3730_v58   ;;  %v5687_v58 = vld [vmem:[%s5918_s6 + $0x30] sm:$0xff]  }
  0x80   : > { %5091 = vmatmul.mubr.msk.bf16.gmra.mrb[28].mxu0 %vm448_vm2, %v5609_v59  ;;  %v3731_v59 = vld [vmem:[%s7290_s2 + $0x28] sm:$0xff] }
  0x81   : > { %5198 = vmatprep.mubr.msk.bf16.mxu0 %vm448_vm2, %v5611_v60  ;;  %v5661_v60 = vld [vmem:[%s5876_s8 + $0x48] sm:$0xff]   ;;  %3786 = vperm.xlu1 %5562, %v3731_v59  }
  0x82   : > { %5057 = vmatmul.mubr.msk.bf16.gmra.mrb[28].mxu1 %vm448_vm2, %v5610_v61  ;;  %v5663_v61 = vld [vmem:[%s5876_s8 + $0x50] sm:$0xff]  }
  0x83   : > { %5096 = vmatprep.mubr.msk.bf16.mxu1 %vm448_vm2, %v5612_v62  ;;  %v5662_v62 = vld [vmem:[%s5876_s8 + $0x48] sm:$0xff]  }
  0x88   : > { %5199 = vmatmul.mubr.msk.bf16.vlgmr.msra.gmra.mrb[32].mxu0 %vm448_vm2, %v5613_v63  ;;  %v3732_v63 = vld [vmem:[%s7290_s2 + $0x30] sm:$0xff] }
  0x89   : > { %5202 = vmatprep.mubr.msk.bf16.mxu0 %vm448_vm2, %v5615_v0  ;;  %5231 = vmatpush3.bf16.msra.mxu0 %v3012_v2  ;;  %v5664_v0 = vld [vmem:[%s5876_s8 + $0x50] sm:$0xff]   ;;  %v3734_v2 = vld [vmem:[%s7290_s2 + $0x40] sm:$0xff] }
  0x8a   : > { %5097 = vmatmul.mubr.msk.bf16.vlgmr.msra.gmra.mrb[32].mxu1 %vm448_vm2, %v5614_v1  ;;  %5501 = vmatprep.subr.msk.bf16.mxu0 %vm497_vm1, %v4793_v13  ;;  %v3733_v1 = vld [vmem:[%s7290_s2 + $0x38] sm:$0xff]  ;;  %v5671_v13 = vld [vmem:[%s5876_s8 + $0x70] sm:$0xff]  }
  0x8b   : > { %5129 = vmatpush3.bf16.msra.mxu1 %v1839_v4  ;;  %5100 = vmatprep.mubr.msk.bf16.mxu1 %vm448_vm2, %v5616_v3  ;;  %v3735_v3 = vld [vmem:[%s7290_s2 + $0x48] sm:$0xff]  ;;  %v5665_v4 = vld [vmem:[%s5876_s8 + $0x58] sm:$0xff]  }
  0x8c   : > { %5498 = vmatprep.subr.msk.bf16.mxu1 %vm497_vm1, %v6021_v5  ;;  %3791 = vperm.xlu0 %5561, %v3732_v63   ;;  %v5667_v5 = vld [vmem:[%s5876_s8 + $0x60] sm:$0xff]   ;;  %v5688_v63 = vld [vmem:[%s5918_s6 + $0x30] sm:$0xff]  }
  0x8d   : > { %3796 = vperm.xlu1 %5562, %v3733_v1  }
  0x90   : > { %5203 = vmatmul.mubr.msk.bf16.gmra.mrb[36].mxu0 %vm448_vm2, %v5617_v6  ;;  %3801 = vperm.xlu0 %5561, %v3734_v2   ;;  %v5666_v6 = vld [vmem:[%s5876_s8 + $0x58] sm:$0xff]  }
  0x91   : > { %5206 = vmatprep.mubr.msk.bf16.mxu0 %vm448_vm2, %v5619_v7  ;;  %3806 = vperm.xlu1 %5562, %v3735_v3   ;;  %v3736_v7 = vld [vmem:[%s7290_s2 + $0x50] sm:$0xff] }
  0x92   : > { %5101 = vmatmul.mubr.msk.bf16.gmra.mrb[36].mxu1 %vm448_vm2, %v5618_v8  ;;  %v5668_v8 = vld [vmem:[%s5876_s8 + $0x60] sm:$0xff]  }
  0x93   : > { %5104 = vmatprep.mubr.msk.bf16.mxu1 %vm448_vm2, %v5620_v9  ;;  %v3737_v9 = vld [vmem:[%s7290_s2 + $0x58] sm:$0xff] }
  0x94   : > { %3811 = vperm.xlu0 %5561, %v3736_v7  }
  0x95   : > { %3816 = vperm.xlu1 %5562, %v3737_v9  }
  0x98   : > { %5207 = vmatmul.mubr.msk.bf16.gmra.mrb[40].mxu0 %vm448_vm2, %v5621_v10  ;;  %v3738_v10 = vld [vmem:[%s7290_s2 + $0x60] sm:$0xff] }
  0x99   : > { %5210 = vmatprep.mubr.msk.bf16.mxu0 %vm448_vm2, %v5623_v12  ;;  %v5669_v12 = vld [vmem:[%s5876_s8 + $0x68] sm:$0xff]   ;;  %3821 = vperm.xlu0 %5561, %v3738_v10  }
  0x9a   : > { %5105 = vmatmul.mubr.msk.bf16.gmra.mrb[40].mxu1 %vm448_vm2, %v5622_v11  ;;  %v3739_v11 = vld [vmem:[%s7290_s2 + $0x68] sm:$0xff] }
  0x9b   : > { %5108 = vmatprep.mubr.msk.bf16.mxu1 %vm448_vm2, %v5624_v14  ;;  %v5670_v14 = vld [vmem:[%s5876_s8 + $0x68] sm:$0xff]   ;;  %3826 = vperm.xlu1 %5562, %v3739_v11   ;;  %v5690_v11 = vld [vmem:[%s5918_s6 + $0x38] sm:$0xff]  }
  0xa0   : > { %5211 = vmatmul.mubr.msk.bf16.gmra.mrb[44].mxu0 %vm448_vm2, %v5625_v15  ;;  %v3740_v15 = vld [vmem:[%s7290_s2 + $0x70] sm:$0xff] }
  0xa1   : > { %5214 = vmatprep.mubr.msk.bf16.mxu0 %vm448_vm2, %v5627_v16  ;;  %v5672_v16 = vld [vmem:[%s5876_s8 + $0x70] sm:$0xff]   ;;  %3831 = vperm.xlu0 %5561, %v3740_v15  }
  0xa2   : > { %5109 = vmatmul.mubr.msk.bf16.gmra.mrb[44].mxu1 %vm448_vm2, %v5626_v17  ;;  %v3741_v17 = vld [vmem:[%s7290_s2 + $0x78] sm:$0xff] }
  0xa3   : > { %5112 = vmatprep.mubr.msk.bf16.mxu1 %vm448_vm2, %v5628_v18  ;;  %3836 = vperm.xlu1 %5562, %v3741_v17   ;;  %v3742_v18 = vld [vmem:[%s7290_s2 + $0x80] sm:$0xff]  ;;  %v5693_v17 = vld [vmem:[%s5918_s6 + $0x48] sm:$0xff]  }
  0xa5   : > { %3841 = vperm.xlu0 %5561, %v3742_v18  }
  0xa8   : > { %5215 = vmatmul.mubr.msk.bf16.gmra.mrb[48].mxu0 %vm448_vm2, %v5629_v19  ;;  %v3743_v19 = vld [vmem:[%s7290_s2 + $0x88] sm:$0xff] }
  0xa9   : > { %5218 = vmatprep.mubr.msk.bf16.mxu0 %vm448_vm2, %v5631_v20  ;;  %v5673_v20 = vld [vmem:[%s5876_s8 + $0x78] sm:$0xff]   ;;  %3846 = vperm.xlu1 %5562, %v3743_v19  }
  0xaa   : > { %5113 = vmatmul.mubr.msk.bf16.gmra.mrb[48].mxu1 %vm448_vm2, %v5630_v21 }
  0xab   : > { %5116 = vmatprep.mubr.msk.bf16.mxu1 %vm448_vm2, %v5632_v22  ;;  %v5675_v22 = vld [vmem:[%s5918_s6] sm:$0xff]  }
  0xb0   : > { %5219 = vmatmul.mubr.msk.bf16.gmra.mrb[52].mxu0 %vm448_vm2, %v5633_v23 }
  0xb1   : > { %5222 = vmatprep.mubr.msk.bf16.mxu0 %vm448_vm2, %v5635_v24  ;;  %v5674_v24 = vld [vmem:[%s5876_s8 + $0x78] sm:$0xff]  }
  0xb2   : > { %5117 = vmatmul.mubr.msk.bf16.gmra.mrb[52].mxu1 %vm448_vm2, %v5634_v25  ;;  %v3744_v25 = vld [vmem:[%s7290_s2 + $0x90] sm:$0xff] }
  0xb3   : > { %5120 = vmatprep.mubr.msk.bf16.mxu1 %vm448_vm2, %v5636_v26  ;;  %3851 = vperm.xlu0 %5561, %v3744_v25   ;;  %v5696_v25 = vld [vmem:[%s5918_s6 + $0x50] sm:$0xff]  }
  0xb8   : > { %5223 = vmatmul.mubr.msk.bf16.gmra.mrb[56].mxu0 %vm448_vm2, %v5637_v27  ;;  %v5676_v27 = vld [vmem:[%s5918_s6] sm:$0xff]  }
  0xb9   : > { %5226 = vmatprep.mubr.msk.bf16.mxu0 %vm448_vm2, %v5639_v28  ;;  %v3745_v28 = vld [vmem:[%s7290_s2 + $0x98] sm:$0xff] }
  0xba   : > { %5121 = vmatmul.mubr.msk.bf16.gmra.mrb[56].mxu1 %vm448_vm2, %v5638_v29  ;;  %3856 = vperm.xlu1 %5562, %v3745_v28  }
  0xbb   : > { %5124 = vmatprep.mubr.msk.bf16.mxu1 %vm448_vm2, %v5640_v30  ;;  %v3746_v30 = vld [vmem:[%s7290_s2 + $0xa0] sm:$0xff] }
  0xbc   : > { %3861 = vperm.xlu0 %5561, %v3746_v30  }
  0xc0   : > { %5227 = vmatmul.mubr.msk.bf16.gmra.mrb[60].mxu0 %vm448_vm2, %v5641_v31  ;;  %v3747_v31 = vld [vmem:[%s7290_s2 + $0xa8] sm:$0xff] }
  0xc1   : > { %5232 = vmatprep.mubr.msk.bf16.mxu0 %vm448_vm2, %v5643_v32  ;;  %v5677_v32 = vld [vmem:[%s5918_s6 + $0x8] sm:$0xff]   ;;  %3866 = vperm.xlu1 %5562, %v3747_v31  }
  0xc2   : > { %5125 = vmatmul.mubr.msk.bf16.gmra.mrb[60].mxu1 %vm448_vm2, %v5642_v33 }
  0xc3   : > { %5130 = vmatprep.mubr.msk.bf16.mxu1 %vm448_vm2, %v5644_v34  ;;  %v5679_v34 = vld [vmem:[%s5918_s6 + $0x10] sm:$0xff]  }
  0xc8   : > { %5233 = vmatmul.mubr.msk.bf16.vlgmr.msra.gmra.mrb[32].mxu0 %vm448_vm2, %v5645_v35 }
  0xc9   : > { %5236 = vmatprep.mubr.msk.bf16.mxu0 %vm448_vm2, %v5647_v36  ;;  %5265 = vmatpush3.bf16.msra.mxu0 %v3338_v38  ;;  %v5678_v36 = vld [vmem:[%s5918_s6 + $0x8] sm:$0xff]  }
  0xca   : > { %5131 = vmatmul.mubr.msk.bf16.vlgmr.msra.gmra.mrb[32].mxu1 %vm448_vm2, %v5646_v37  ;;  %v3748_v37 = vld [vmem:[%s7290_s2 + $0xb0] sm:$0xff] }
  0xcb   : > { %5163 = vmatpush3.bf16.msra.mxu1 %v2165_v40  ;;  %5134 = vmatprep.mubr.msk.bf16.mxu1 %vm448_vm2, %v5648_v39  ;;  %v5680_v39 = vld [vmem:[%s5918_s6 + $0x10] sm:$0xff]   ;;  %v3749_v40 = vld [vmem:[%s7290_s2 + $0xb8] sm:$0xff] }
  0xcc   : > { %3871 = vperm.xlu0 %5561, %v3748_v37   ;;  %3876 = vperm.xlu1 %5562, %v3749_v40   ;;  %v5700_v37 = vld [vmem:[%s5918_s6 + $0x60] sm:$0xff]  }
  0xd0   : > { %5237 = vmatmul.mubr.msk.bf16.gmra.mrb[36].mxu0 %vm448_vm2, %v5649_v41 }
  0xd1   : > { %5240 = vmatprep.mubr.msk.bf16.mxu0 %vm448_vm2, %v5651_v42  ;;  %v3750_v42 = vld [vmem:[%s7290_s2 + $0xc0] sm:$0xff] }
  0xd2   : > { %5135 = vmatmul.mubr.msk.bf16.gmra.mrb[36].mxu1 %vm448_vm2, %v5650_v43  ;;  %v3751_v43 = vld [vmem:[%s7290_s2 + $0xc8] sm:$0xff]  ;;  %3881 = vperm.xlu0 %5561, %v3750_v42  }
  0xd3   : > { %5138 = vmatprep.mubr.msk.bf16.mxu1 %vm448_vm2, %v5652_v44  ;;  %v5681_v44 = vld [vmem:[%s5918_s6 + $0x18] sm:$0xff]   ;;  %3886 = vperm.xlu1 %5562, %v3751_v43  }
  0xd6   : > { %3891 = vperm.xlu0 %5561, %v3752_v49   ;;  %v5704_v49 = vld [vmem:[%s5918_s6 + $0x70] sm:$0xff]  }
  0xd7   : > { %3896 = vperm.xlu1 %5562, %v3753_v52   ;;  %v5705_v52 = vld [vmem:[%s5918_s6 + $0x78] sm:$0xff]  }
  0xd8   : > { %5241 = vmatmul.mubr.msk.bf16.gmra.mrb[40].mxu0 %vm448_vm2, %v5653_v45 }
  0xd9   : > { %5244 = vmatprep.mubr.msk.bf16.mxu0 %vm448_vm2, %v5655_v46  ;;  %v5683_v46 = vld [vmem:[%s5918_s6 + $0x20] sm:$0xff]  }
  0xda   : > { %5139 = vmatmul.mubr.msk.bf16.gmra.mrb[40].mxu1 %vm448_vm2, %v5654_v47 }
  0xdb   : > { %5142 = vmatprep.mubr.msk.bf16.mxu1 %vm448_vm2, %v5656_v48  ;;  %v5682_v48 = vld [vmem:[%s5918_s6 + $0x18] sm:$0xff]   ;;  %3906 = vperm.xlu1 %5562, %v3755_v55  }
  0xe0   : > { %5245 = vmatmul.mubr.msk.bf16.gmra.mrb[44].mxu0 %vm448_vm2, %v5657_v51  ;;  %v5684_v51 = vld [vmem:[%s5918_s6 + $0x20] sm:$0xff]  }
  0xe1   : > { %5248 = vmatprep.mubr.msk.bf16.mxu0 %vm448_vm2, %v5659_v53 }
  0xe2   : > { %5143 = vmatmul.mubr.msk.bf16.gmra.mrb[44].mxu1 %vm448_vm2, %v5658_v54  ;;  %v3754_v54 = vld [vmem:[%s7290_s2 + $0xe0] sm:$0xff] }
  0xe3   : > { %5146 = vmatprep.mubr.msk.bf16.mxu1 %vm448_vm2, %v5660_v56  ;;  %v5685_v56 = vld [vmem:[%s5918_s6 + $0x28] sm:$0xff]   ;;  %3901 = vperm.xlu0 %5561, %v3754_v54  }
  0xe8   : > { %5249 = vmatmul.mubr.msk.bf16.gmra.mrb[48].mxu0 %vm448_vm2, %v5661_v60  ;;  %v5686_v60 = vld [vmem:[%s5918_s6 + $0x28] sm:$0xff]  }
  0xe9   : > { %5252 = vmatprep.mubr.msk.bf16.mxu0 %vm448_vm2, %v5663_v61  ;;  %v3756_v61 = vld [vmem:[%s7290_s2 + $0xf0] sm:$0xff] }
  0xea   : > { %5147 = vmatmul.mubr.msk.bf16.gmra.mrb[48].mxu1 %vm448_vm2, %v5662_v62  ;;  %3911 = vperm.xlu0 %5561, %v3756_v61  }
  0xeb   : > { %5150 = vmatprep.mubr.msk.bf16.mxu1 %vm448_vm2, %v5664_v0  ;;  %v3757_v0 = vld [vmem:[%s7290_s2 + $0xf8] sm:$0xff] }
  0xec   : > { %3916 = vperm.xlu1 %5562, %v3757_v0  }
  0xf0   : > { %5253 = vmatmul.mubr.msk.bf16.gmra.mrb[52].mxu0 %vm448_vm2, %v5665_v4 }
  0xf1   : > { %5256 = vmatprep.mubr.msk.bf16.mxu0 %vm448_vm2, %v5667_v5  ;;  %v5689_v5 = vld [vmem:[%s5918_s6 + $0x38] sm:$0xff]  }
  0xf2   : > { %5151 = vmatmul.mubr.msk.bf16.gmra.mrb[52].mxu1 %vm448_vm2, %v5666_v6 }
  0xf3   : > { %5154 = vmatprep.mubr.msk.bf16.mxu1 %vm448_vm2, %v5668_v8  ;;  %v5691_v8 = vld [vmem:[%s5918_s6 + $0x40] sm:$0xff]  }
  0xf8   : > { %5257 = vmatmul.mubr.msk.bf16.gmra.mrb[56].mxu0 %vm448_vm2, %v5669_v12 }
  0xf9   : > { %5260 = vmatprep.mubr.msk.bf16.mxu0 %vm448_vm2, %v5671_v13  ;;  %v5692_v13 = vld [vmem:[%s5918_s6 + $0x40] sm:$0xff]  }
  0xfa   : > { %5155 = vmatmul.mubr.msk.bf16.gmra.mrb[56].mxu1 %vm448_vm2, %v5670_v14 }
  0xfb   : > { %5158 = vmatprep.mubr.msk.bf16.mxu1 %vm448_vm2, %v5672_v16 }
  0xfc   : > { %v6201_v21 = vpop.f32.mrb[0].mxu1 }
  0xfd   : > { %v6204_v23 = vpop.f32.mrb[1].mxu1 }
  0xfe   : > { %v6210_v26 = vpop.f32.mrb[2].mxu1 }
  0xff   : > { %v6216_v29 = vpop.f32.mrb[3].mxu1 }
 0x100   : > { %5261 = vmatmul.mubr.msk.bf16.gmra.mrb[60].mxu0 %vm448_vm2, %v5673_v20  ;;  %v5695_v20 = vld [vmem:[%s5918_s6 + $0x50] sm:$0xff]  }
 0x101   : > { %5266 = vmatprep.mubr.msk.bf16.mxu0 %vm448_vm2, %v5675_v22 }
 0x102   : > { %5159 = vmatmul.mubr.msk.bf16.gmra.mrb[60].mxu1 %vm448_vm2, %v5674_v24 }
 0x103   : > { %5164 = vmatprep.mubr.msk.bf16.mxu1 %vm448_vm2, %v5676_v27 }
 0x104   : > { %v6229_v33 = vpop.f32.mrb[4].mxu1 }
 0x105   : > { %v6232_v35 = vpop.f32.mrb[5].mxu1 }
 0x106   : > { %v6238_v38 = vpop.f32.mrb[6].mxu1 }
 0x107   : > { %v6244_v41 = vpop.f32.mrb[7].mxu1 }
 0x108   : > { %5267 = vmatmul.mubr.msk.bf16.vlgmr.msra.gmra.mrb[32].mxu0 %vm448_vm2, %v5677_v32  ;;  %v5699_v32 = vld [vmem:[%s5918_s6 + $0x60] sm:$0xff]  }
 0x109   : > { %5270 = vmatprep.mubr.msk.bf16.mxu0 %vm448_vm2, %v5679_v34 }
 0x10a   : > { %5165 = vmatmul.mubr.msk.bf16.vlgmr.msra.gmra.mrb[32].mxu1 %vm448_vm2, %v5678_v36 }
 0x10b   : > { %5168 = vmatprep.mubr.msk.bf16.mxu1 %vm448_vm2, %v5680_v39 }
 0x10c   : > { %v6257_v45 = vpop.f32.mrb[8].mxu1 }
 0x10d   : > { %v6260_v47 = vpop.f32.mrb[9].mxu1 }
 0x10e   : > { %v6266_v50 = vpop.f32.mrb[10].mxu1 }
 0x10f   : > { %v6272_v53 = vpop.f32.mrb[11].mxu1 }
 0x110   : > { %5271 = vmatmul.mubr.msk.bf16.gmra.mrb[36].mxu0 %vm448_vm2, %v5681_v44  ;;  %v5703_v44 = vld [vmem:[%s5918_s6 + $0x70] sm:$0xff]  }
 0x111   : > { %5274 = vmatprep.mubr.msk.bf16.mxu0 %vm448_vm2, %v5683_v46 }
 0x112   : > { %5169 = vmatmul.mubr.msk.bf16.gmra.mrb[36].mxu1 %vm448_vm2, %v5682_v48 }
 0x113   : > { %5172 = vmatprep.mubr.msk.bf16.mxu1 %vm448_vm2, %v5684_v51 }
 0x114   : > { %v6285_v57 = vpop.f32.mrb[12].mxu1 }
 0x115   : > { %v6288_v59 = vpop.f32.mrb[13].mxu1 }
 0x116   : > { %v6294_v62 = vpop.f32.mrb[14].mxu1 }
 0x117   : > { %v6300_v1 = vpop.f32.mrb[15].mxu1 }
 0x118   : > { %5275 = vmatmul.mubr.msk.bf16.gmra.mrb[40].mxu0 %vm448_vm2, %v5685_v56 }
 0x119   : > { %5278 = vmatprep.mubr.msk.bf16.mxu0 %vm448_vm2, %v5687_v58  ;;  %v5706_v58 = vld [vmem:[%s5918_s6 + $0x78] sm:$0xff]  }
 0x11a   : > { %5173 = vmatmul.mubr.msk.bf16.gmra.mrb[40].mxu1 %vm448_vm2, %v5686_v60 }
 0x11b   : > { %v5064_v2 = vpop.f32.mrb[0].mxu0  ;;  %5176 = vmatprep.mubr.msk.bf16.mxu1 %vm448_vm2, %v5688_v63 }
 0x11c   : > { %v5300_v3 = vadd.f32 %v5064_v2, %v6201_v21  ;;  %v1159_v4 = vpop.f32.mrb[1].mxu0 }
 0x11d   : > { %v5301_v6 = vadd.f32 %v1159_v4, %v6204_v23  ;;  %v5065_v7 = vpop.f32.mrb[2].mxu0  ;;  %v5694_v23 = vld [vmem:[%s5918_s6 + $0x48] sm:$0xff]  }
 0x11e   : > { %1321 = vst.msk [vmem:[%s6311_s29 + $0x10] sm:$0xff] %vm448_vm2, %v5300_v3  ;;  %v5302_v9 = vadd.f32 %v5065_v7, %v6210_v26  ;;  %v1162_v10 = vpop.f32.mrb[3].mxu0 }
 0x11f   : > { %1319 = vst.msk [vmem:[%s6311_s29] sm:$0xff] %vm448_vm2, %v5301_v6  ;;  %v5303_v12 = vadd.f32 %v1162_v10, %v6216_v29  ;;  %v5697_v29 = vld [vmem:[%s5918_s6 + $0x58] sm:$0xff]  }
 0x120   : > { %1322 = vst.msk [vmem:[%s6311_s29 + $0x18] sm:$0xff] %vm448_vm2, %v5302_v9  ;;  %5279 = vmatmul.mubr.msk.bf16.gmra.mrb[44].mxu0 %vm448_vm2, %v5689_v5 }
 0x121   : > { %1320 = vst.msk [vmem:[%s6311_s29 + $0x8] sm:$0xff] %vm448_vm2, %v5303_v12  ;;  %5282 = vmatprep.mubr.msk.bf16.mxu0 %vm448_vm2, %v5691_v8 }
 0x122   : > { %5177 = vmatmul.mubr.msk.bf16.gmra.mrb[44].mxu1 %vm448_vm2, %v5690_v11 }
 0x123   : > { %v5068_v14 = vpop.f32.mrb[4].mxu0  ;;  %5180 = vmatprep.mubr.msk.bf16.mxu1 %vm448_vm2, %v5692_v13 }
 0x124   : > { %v5304_v15 = vadd.f32 %v5068_v14, %v6229_v33  ;;  %v1175_v16 = vpop.f32.mrb[5].mxu0 }
 0x125   : > { %v5305_v18 = vadd.f32 %v1175_v16, %v6232_v35  ;;  %v5069_v19 = vpop.f32.mrb[6].mxu0  ;;  %v5698_v35 = vld [vmem:[%s5918_s6 + $0x58] sm:$0xff]  }
 0x126   : > { %1325 = vst.msk [vmem:[%s6311_s29 + $0x30] sm:$0xff] %vm448_vm2, %v5304_v15  ;;  %v5306_v21 = vadd.f32 %v5069_v19, %v6238_v38  ;;  %v1178_v22 = vpop.f32.mrb[7].mxu0 }
 0x127   : > { %1323 = vst.msk [vmem:[%s6311_s29 + $0x20] sm:$0xff] %vm448_vm2, %v5305_v18  ;;  %v5307_v24 = vadd.f32 %v1178_v22, %v6244_v41  ;;  %v5701_v41 = vld [vmem:[%s5918_s6 + $0x68] sm:$0xff]  }
 0x128   : > { %1326 = vst.msk [vmem:[%s6311_s29 + $0x38] sm:$0xff] %vm448_vm2, %v5306_v21  ;;  %5283 = vmatmul.mubr.msk.bf16.gmra.mrb[48].mxu0 %vm448_vm2, %v5693_v17 }
 0x129   : > { %1324 = vst.msk [vmem:[%s6311_s29 + $0x28] sm:$0xff] %vm448_vm2, %v5307_v24  ;;  %5286 = vmatprep.mubr.msk.bf16.mxu0 %vm448_vm2, %v5695_v20 }
 0x12a   : > { %5181 = vmatmul.mubr.msk.bf16.gmra.mrb[48].mxu1 %vm448_vm2, %v5694_v23 }
 0x12b   : > { %v5072_v26 = vpop.f32.mrb[8].mxu0  ;;  %5184 = vmatprep.mubr.msk.bf16.mxu1 %vm448_vm2, %v5696_v25 }
 0x12c   : > { %v5308_v27 = vadd.f32 %v5072_v26, %v6257_v45  ;;  %v1191_v28 = vpop.f32.mrb[9].mxu0 }
 0x12d   : > { %v5309_v30 = vadd.f32 %v1191_v28, %v6260_v47  ;;  %v5073_v31 = vpop.f32.mrb[10].mxu0  ;;  %v5702_v47 = vld [vmem:[%s5918_s6 + $0x68] sm:$0xff]  }
 0x12e   : > { %1329 = vst.msk [vmem:[%s6311_s29 + $0x50] sm:$0xff] %vm448_vm2, %v5308_v27  ;;  %v5310_v33 = vadd.f32 %v5073_v31, %v6266_v50  ;;  %v1194_v34 = vpop.f32.mrb[11].mxu0 }
 0x12f   : > { %1327 = vst.msk [vmem:[%s6311_s29 + $0x40] sm:$0xff] %vm448_vm2, %v5309_v30  ;;  %v5311_v36 = vadd.f32 %v1194_v34, %v6272_v53 }
 0x130   : > { %1330 = vst.msk [vmem:[%s6311_s29 + $0x58] sm:$0xff] %vm448_vm2, %v5310_v33  ;;  %5287 = vmatmul.mubr.msk.bf16.gmra.mrb[52].mxu0 %vm448_vm2, %v5697_v29 }
 0x131   : > { %1328 = vst.msk [vmem:[%s6311_s29 + $0x48] sm:$0xff] %vm448_vm2, %v5311_v36  ;;  %5290 = vmatprep.mubr.msk.bf16.mxu0 %vm448_vm2, %v5699_v32  ;;  %v2392_v36 = vlaneseq }
 0x132   : > { %5185 = vmatmul.mubr.msk.bf16.gmra.mrb[52].mxu1 %vm448_vm2, %v5698_v35 }
 0x133   : > { %v5076_v38 = vpop.f32.mrb[12].mxu0  ;;  %5188 = vmatprep.mubr.msk.bf16.mxu1 %vm448_vm2, %v5700_v37  ;;  %v6425_v37 = vshrl.u32 %v2392_v36, 7 }
 0x134   : > { %v5312_v39 = vadd.f32 %v5076_v38, %v6285_v57  ;;  %v1207_v40 = vpop.f32.mrb[13].mxu0 }
 0x135   : > { %v5313_v42 = vadd.f32 %v1207_v40, %v6288_v59  ;;  %v5077_v43 = vpop.f32.mrb[14].mxu0  ;;  %vm3565_vm3 = vcmp.lt.s32.totalorder %v6425_v37, 7  ;;  %vm2394_vm4 = vcmp.lt.s32.totalorder %v6425_v37, 1 }
 0x136   : > { %1333 = vst.msk [vmem:[%s6311_s29 + $0x70] sm:$0xff] %vm448_vm2, %v5312_v39  ;;  %v5314_v45 = vadd.f32 %v5077_v43, %v6294_v62  ;;  %v1210_v46 = vpop.f32.mrb[15].mxu0 }
 0x137   : > { %1331 = vst.msk [vmem:[%s6311_s29 + $0x60] sm:$0xff] %vm448_vm2, %v5313_v42  ;;  %v5315_v48 = vadd.f32 %v1210_v46, %v6300_v1 }
 0x138   : > { %1334 = vst.msk [vmem:[%s6311_s29 + $0x78] sm:$0xff] %vm448_vm2, %v5314_v45  ;;  %5291 = vmatmul.mubr.msk.bf16.gmra.mrb[56].mxu0 %vm448_vm2, %v5701_v41 }
 0x139   : > { %1332 = vst.msk [vmem:[%s6311_s29 + $0x68] sm:$0xff] %vm448_vm2, %v5315_v48  ;;  %5294 = vmatprep.mubr.msk.bf16.mxu0 %vm448_vm2, %v5703_v44 }
 0x13a   : > { %5189 = vmatmul.mubr.msk.bf16.gmra.mrb[56].mxu1 %vm448_vm2, %v5702_v47 }
 0x13b   : > { %v5080_v50 = vpop.f32.mrb[16].mxu0  ;;  %5192 = vmatprep.mubr.msk.bf16.mxu1 %vm448_vm2, %v5704_v49 }
 0x13c   : > { %v1223_v51 = vpop.f32.mrb[17].mxu0 }
 0x13d   : > { %v5046_v53 = vpop.f32.mrb[16].mxu1  ;;  %v5081_v54 = vpop.f32.mrb[18].mxu0 }
 0x13e   : > { %v5316_v55 = vadd.f32 %v5080_v50, %v5046_v53  ;;  %v891_v56 = vpop.f32.mrb[17].mxu1  ;;  %v1226_v57 = vpop.f32.mrb[19].mxu0 }
 0x13f   : > { %v5317_v59 = vadd.f32 %v1223_v51, %v891_v56  ;;  %v5047_v60 = vpop.f32.mrb[18].mxu1 }
 0x140   : > { %1337 = vst.msk [vmem:[%s6311_s29 + $0x90] sm:$0xff] %vm448_vm2, %v5316_v55  ;;  %v5318_v61 = vadd.f32 %v5081_v54, %v5047_v60  ;;  %v894_v62 = vpop.f32.mrb[19].mxu1  ;;  %5295 = vmatmul.mubr.msk.bf16.gmra.mrb[60].mxu0 %vm448_vm2, %v5705_v52 }
 0x141   : > { %1335 = vst.msk [vmem:[%s6311_s29 + $0x80] sm:$0xff] %vm448_vm2, %v5317_v59  ;;  %v5319_v63 = vadd.f32 %v1226_v57, %v894_v62  ;;  %v2428_v62 = vld [vmem:[%s6311_s29 + $0x8] sm:$0xff] }
 0x142   : > { %1338 = vst.msk [vmem:[%s6311_s29 + $0x98] sm:$0xff] %vm448_vm2, %v5318_v61  ;;  %5193 = vmatmul.mubr.msk.bf16.gmra.mrb[60].mxu1 %vm448_vm2, %v5706_v58  ;;  %v2430_v58 = vld [vmem:[%s6311_s29 + $0x18] sm:$0xff] }
 0x143   : > { %1336 = vst.msk [vmem:[%s6311_s29 + $0x88] sm:$0xff] %vm448_vm2, %v5319_v63  ;;  %v5084_v0 = vpop.f32.mrb[20].mxu0  ;;  %v2429_v63 = vld [vmem:[%s6311_s29 + $0x10] sm:$0xff] }
 0x144   : > { %v1239_v1 = vpop.f32.mrb[21].mxu0 }
 0x145   : > { %v5050_v2 = vpop.f32.mrb[20].mxu1  ;;  %v5085_v3 = vpop.f32.mrb[22].mxu0 }
 0x146   : > { %v5320_v4 = vadd.f32 %v5084_v0, %v5050_v2  ;;  %v907_v5 = vpop.f32.mrb[21].mxu1  ;;  %v1242_v6 = vpop.f32.mrb[23].mxu0 }
 0x147   : > { %v5321_v7 = vadd.f32 %v1239_v1, %v907_v5  ;;  %v5051_v8 = vpop.f32.mrb[22].mxu1 }
 0x148   : > { %1341 = vst.msk [vmem:[%s6311_s29 + $0xb0] sm:$0xff] %vm448_vm2, %v5320_v4  ;;  %v5322_v9 = vadd.f32 %v5085_v3, %v5051_v8  ;;  %v910_v10 = vpop.f32.mrb[23].mxu1 }
 0x149   : > { %1339 = vst.msk [vmem:[%s6311_s29 + $0xa0] sm:$0xff] %vm448_vm2, %v5321_v7  ;;  %v5323_v11 = vadd.f32 %v1242_v6, %v910_v10 }
 0x14a   : > { %1342 = vst.msk [vmem:[%s6311_s29 + $0xb8] sm:$0xff] %vm448_vm2, %v5322_v9 }
 0x14b   : > { %1340 = vst.msk [vmem:[%s6311_s29 + $0xa8] sm:$0xff] %vm448_vm2, %v5323_v11  ;;  %v5088_v12 = vpop.f32.mrb[24].mxu0 }
 0x14c   : > { %v1255_v13 = vpop.f32.mrb[25].mxu0 }
 0x14d   : > { %v5054_v14 = vpop.f32.mrb[24].mxu1  ;;  %v5089_v15 = vpop.f32.mrb[26].mxu0 }
 0x14e   : > { %v5324_v16 = vadd.f32 %v5088_v12, %v5054_v14  ;;  %v923_v17 = vpop.f32.mrb[25].mxu1  ;;  %v1258_v18 = vpop.f32.mrb[27].mxu0 }
 0x14f   : > { %v5325_v19 = vadd.f32 %v1255_v13, %v923_v17  ;;  %v5055_v20 = vpop.f32.mrb[26].mxu1 }
 0x150   : > { %1345 = vst.msk [vmem:[%s6311_s29 + $0xd0] sm:$0xff] %vm448_vm2, %v5324_v16  ;;  %v5326_v21 = vadd.f32 %v5089_v15, %v5055_v20  ;;  %v926_v22 = vpop.f32.mrb[27].mxu1  ;;  %v2431_v20 = vld [vmem:[%s6311_s29 + $0x20] sm:$0xff] }
 0x151   : > { %1343 = vst.msk [vmem:[%s6311_s29 + $0xc0] sm:$0xff] %vm448_vm2, %v5325_v19  ;;  %v5327_v23 = vadd.f32 %v1258_v18, %v926_v22 }
 0x152   : > { %1346 = vst.msk [vmem:[%s6311_s29 + $0xd8] sm:$0xff] %vm448_vm2, %v5326_v21 }
 0x153   : > { %1344 = vst.msk [vmem:[%s6311_s29 + $0xc8] sm:$0xff] %vm448_vm2, %v5327_v23  ;;  %v5092_v24 = vpop.f32.mrb[28].mxu0 }
 0x154   : > { %v1271_v25 = vpop.f32.mrb[29].mxu0 }
 0x155   : > { %v5058_v26 = vpop.f32.mrb[28].mxu1  ;;  %v5093_v27 = vpop.f32.mrb[30].mxu0 }
 0x156   : > { %v5328_v28 = vadd.f32 %v5092_v24, %v5058_v26  ;;  %v939_v29 = vpop.f32.mrb[29].mxu1  ;;  %v1274_v30 = vpop.f32.mrb[31].mxu0  ;;  %v2434_v26 = vld [vmem:[%s6311_s29 + $0x38] sm:$0xff] }
 0x157   : > { %v5329_v31 = vadd.f32 %v1271_v25, %v939_v29  ;;  %v5059_v32 = vpop.f32.mrb[30].mxu1 }
 0x158   : > { %1349 = vst.msk [vmem:[%s6311_s29 + $0xf0] sm:$0xff] %vm448_vm2, %v5328_v28  ;;  %v5330_v33 = vadd.f32 %v5093_v27, %v5059_v32  ;;  %v942_v34 = vpop.f32.mrb[31].mxu1 }
 0x159   : > { %1347 = vst.msk [vmem:[%s6311_s29 + $0xe0] sm:$0xff] %vm448_vm2, %v5329_v31  ;;  %v5331_v35 = vadd.f32 %v1274_v30, %v942_v34  ;;  %v2432_v30 = vld [vmem:[%s6311_s29 + $0x28] sm:$0xff]  ;;  %v2433_v31 = vld [vmem:[%s6311_s29 + $0x30] sm:$0xff] }
 0x15a   : > { %1350 = vst.msk [vmem:[%s6311_s29 + $0xf8] sm:$0xff] %vm448_vm2, %v5330_v33 }
 0x15b   : > { %1348 = vst.msk [vmem:[%s6311_s29 + $0xe8] sm:$0xff] %vm448_vm2, %v5331_v35 }
 0x1db   : > { %v5268_v38 = vpop.f32.mrb[32].mxu0 }
 0x1dc   : > { %v6427_v39 = vpop.f32.mrb[33].mxu0  ;;  %v3535_v42 = vrot.slane %v5268_v38, 1 }
 0x1dd   : > { %v5166_v40 = vpop.f32.mrb[32].mxu1  ;;  %v5269_v41 = vpop.f32.mrb[34].mxu0  ;;  %v3533_v46 = vrot.slane %v6427_v39, 1  ;;  %v2458_v39 = vld [vmem:[%s6311_s29 + $0xf8] sm:$0xff] }
 0x1de   : > { %v6430_v43 = vpop.f32.mrb[33].mxu1  ;;  %v3536_v44 = vrot.slane %v5269_v41, 1  ;;  %v3377_v45 = vpop.f32.mrb[35].mxu0  ;;  %v2362_v49 = vrot.slane %v5166_v40, 7 }
 0x1df   : > { %v5167_v47 = vpop.f32.mrb[34].mxu1  ;;  %v3534_v48 = vrot.slane %v3377_v45, 1  ;;  %v2360_v53 = vrot.slane %v6430_v43, 7 }
 0x1e0   : > { %v6436_v50 = vsel %vm3565_vm3, %v3535_v42, %v3536_v44  ;;  %v2363_v51 = vrot.slane %v5167_v47, 7  ;;  %v2204_v52 = vpop.f32.mrb[35].mxu1 }
 0x1e1   : > { %v3595_v54 = vsel %vm3565_vm3, %v3534_v48, %v3535_v42  ;;  %v6445_v55 = vsel %vm3565_vm3, %v3533_v46, %v3534_v48  ;;  %v2361_v56 = vrot.slane %v2204_v52, 7 }
 0x1e2   : > { %v2423_v57 = vsel %vm2394_vm4, %v2362_v49, %v2363_v51 }
 0x1e3   : > { %v2462_v59 = vadd.f32 %v2430_v58, %v2423_v57  ;;  %v2424_v60 = vsel %vm2394_vm4, %v2361_v56, %v2362_v49  ;;  %v2425_v61 = vsel %vm2394_vm4, %v2360_v53, %v2361_v56  ;;  %v5272_v0 = vpop.f32.mrb[36].mxu0 }
 0x1e4   : > { %v2460_v1 = vadd.f32 %v2428_v62, %v2425_v61  ;;  %v2461_v2 = vadd.f32 %v2429_v63, %v2424_v60  ;;  %v3390_v3 = vpop.f32.mrb[37].mxu0  ;;  %v3539_v7 = vrot.slane %v5272_v0, 1  ;;  %v2435_v0 = vld [vmem:[%s6311_s29 + $0x40] sm:$0xff] }
 0x1e5   : > { %2494 = vst.msk [vmem:[%s6311_s29 + $0x18] sm:$0xff] %vm448_vm2, %v2462_v59  ;;  %v5170_v4 = vpop.f32.mrb[36].mxu1  ;;  %v3537_v5 = vrot.slane %v3390_v3, 1  ;;  %v5273_v6 = vpop.f32.mrb[38].mxu0 }
 0x1e6   : > { %2492 = vst.msk [vmem:[%s6311_s29 + $0x8] sm:$0xff] %vm448_vm2, %v2460_v1  ;;  %2493 = vst.msk [vmem:[%s6311_s29 + $0x10] sm:$0xff] %vm448_vm2, %v2461_v2  ;;  %v2217_v8 = vpop.f32.mrb[37].mxu1  ;;  %v3540_v9 = vrot.slane %v5273_v6, 1  ;;  %v3393_v10 = vpop.f32.mrb[39].mxu0  ;;  %v2366_v15 = vrot.slane %v5170_v4, 7 }
 0x1e7   : > { %v3593_v11 = vsel %vm3565_vm3, %v3536_v44, %v3537_v5  ;;  %v2364_v12 = vrot.slane %v2217_v8, 7  ;;  %v5171_v13 = vpop.f32.mrb[38].mxu1  ;;  %v3538_v14 = vrot.slane %v3393_v10, 1  ;;  %v2438_v6 = vld [vmem:[%s6311_s29 + $0x58] sm:$0xff] }
 0x1e8   : > { %v6468_v16 = vsel %vm3565_vm3, %v3539_v7, %v3540_v9  ;;  %v2367_v17 = vrot.slane %v5171_v13, 7  ;;  %v2220_v18 = vpop.f32.mrb[39].mxu1 }
 0x1e9   : > { %v2422_v19 = vsel %vm2394_vm4, %v2363_v51, %v2364_v12  ;;  %v6475_v21 = vsel %vm3565_vm3, %v3538_v14, %v3539_v7  ;;  %v3592_v22 = vsel %vm3565_vm3, %v3537_v5, %v3538_v14  ;;  %v2365_v23 = vrot.slane %v2220_v18, 7 }
 0x1ea   : > { %v2463_v24 = vadd.f32 %v2431_v20, %v2422_v19  ;;  %v2419_v25 = vsel %vm2394_vm4, %v2366_v15, %v2367_v17 }
 0x1eb   : > { %v2466_v27 = vadd.f32 %v2434_v26, %v2419_v25  ;;  %v2420_v28 = vsel %vm2394_vm4, %v2365_v23, %v2366_v15  ;;  %v2421_v29 = vsel %vm2394_vm4, %v2364_v12, %v2365_v23  ;;  %v5276_v32 = vpop.f32.mrb[40].mxu0  ;;  %v2437_v12 = vld [vmem:[%s6311_s29 + $0x50] sm:$0xff] }
 0x1ec   : > { %v3601_v33 = vld [vmem:[%s6311_s29 + $0x18] sm:$0xff]  ;;  %2495 = vst.msk [vmem:[%s6311_s29 + $0x20] sm:$0xff] %vm448_vm2, %v2463_v24  ;;  %v2464_v34 = vadd.f32 %v2432_v30, %v2421_v29  ;;  %v2465_v35 = vadd.f32 %v2433_v31, %v2420_v28  ;;  %v3406_v36 = vpop.f32.mrb[41].mxu0  ;;  %v3543_v49 = vrot.slane %v5276_v32, 1 }
 0x1ed   : > { %v3599_v38 = vld [vmem:[%s6311_s29 + $0x8] sm:$0xff]  ;;  %v3600_v40 = vld [vmem:[%s6311_s29 + $0x10] sm:$0xff]  ;;  %v3633_v41 = vadd.f32 %v3601_v33, %v3593_v11  ;;  %2498 = vst.msk [vmem:[%s6311_s29 + $0x38] sm:$0xff] %vm448_vm2, %v2466_v27  ;;  %v5174_v42 = vpop.f32.mrb[40].mxu1  ;;  %v3541_v44 = vrot.slane %v3406_v36, 1  ;;  %v5277_v45 = vpop.f32.mrb[42].mxu0 }
 0x1ee   : > { %v3631_v47 = vadd.f32 %v3599_v38, %v3595_v54  ;;  %v3632_v48 = vadd.f32 %v3600_v40, %v6436_v50  ;;  %2496 = vst.msk [vmem:[%s6311_s29 + $0x28] sm:$0xff] %vm448_vm2, %v2464_v34  ;;  %2497 = vst.msk [vmem:[%s6311_s29 + $0x30] sm:$0xff] %vm448_vm2, %v2465_v35  ;;  %v2233_v51 = vpop.f32.mrb[41].mxu1  ;;  %v3544_v52 = vrot.slane %v5277_v45, 1  ;;  %v3409_v56 = vpop.f32.mrb[43].mxu0  ;;  %v2370_v50 = vrot.slane %v5174_v42, 7 }
 0x1ef   : > { %3665 = vst.msk [vmem:[%s6311_s29 + $0x18] sm:$0xff] %vm448_vm2, %v3633_v41  ;;  %v3589_v57 = vsel %vm3565_vm3, %v3540_v9, %v3541_v44  ;;  %v2368_v58 = vrot.slane %v2233_v51, 7  ;;  %v5175_v59 = vpop.f32.mrb[42].mxu1  ;;  %v3542_v54 = vrot.slane %v3409_v56, 1  ;;  %v2436_v11 = vld [vmem:[%s6311_s29 + $0x48] sm:$0xff]  ;;  %v2439_v38 = vld [vmem:[%s6311_s29 + $0x60] sm:$0xff] }
 0x1f0   : > { %3663 = vst.msk [vmem:[%s6311_s29 + $0x8] sm:$0xff] %vm448_vm2, %v3631_v47  ;;  %3664 = vst.msk [vmem:[%s6311_s29 + $0x10] sm:$0xff] %vm448_vm2, %v3632_v48  ;;  %v6510_v60 = vsel %vm3565_vm3, %v3543_v49, %v3544_v52  ;;  %v2371_v61 = vrot.slane %v5175_v59, 7  ;;  %v2236_v62 = vpop.f32.mrb[43].mxu1 }
 0x1f1   : > { %v2418_v63 = vsel %vm2394_vm4, %v2367_v17, %v2368_v58  ;;  %v6517_v1 = vsel %vm3565_vm3, %v3542_v54, %v3543_v49  ;;  %v3588_v2 = vsel %vm3565_vm3, %v3541_v44, %v3542_v54  ;;  %v2369_v3 = vrot.slane %v2236_v62, 7  ;;  %v2442_v54 = vld [vmem:[%s6311_s29 + $0x78] sm:$0xff] }
 0x1f2   : > { %v2467_v4 = vadd.f32 %v2435_v0, %v2418_v63  ;;  %v2415_v5 = vsel %vm2394_vm4, %v2370_v50, %v2371_v61 }
 0x1f3   : > { %v3602_v7 = vld [vmem:[%s6311_s29 + $0x20] sm:$0xff]  ;;  %v2470_v8 = vadd.f32 %v2438_v6, %v2415_v5  ;;  %v2416_v9 = vsel %vm2394_vm4, %v2369_v3, %v2370_v50  ;;  %v2417_v10 = vsel %vm2394_vm4, %v2368_v58, %v2369_v3  ;;  %v5280_v13 = vpop.f32.mrb[44].mxu0 }
 0x1f4   : > { %v3634_v14 = vadd.f32 %v3602_v7, %v3592_v22  ;;  %v3605_v15 = vld [vmem:[%s6311_s29 + $0x38] sm:$0xff]  ;;  %2499 = vst.msk [vmem:[%s6311_s29 + $0x40] sm:$0xff] %vm448_vm2, %v2467_v4  ;;  %v2468_v17 = vadd.f32 %v2436_v11, %v2417_v10  ;;  %v2469_v18 = vadd.f32 %v2437_v12, %v2416_v9  ;;  %v3422_v19 = vpop.f32.mrb[45].mxu0  ;;  %v3547_v32 = vrot.slane %v5280_v13, 1  ;;  %v2441_v9 = vld [vmem:[%s6311_s29 + $0x70] sm:$0xff] }
 0x1f5   : > { %v3603_v20 = vld [vmem:[%s6311_s29 + $0x28] sm:$0xff]  ;;  %v3604_v23 = vld [vmem:[%s6311_s29 + $0x30] sm:$0xff]  ;;  %v3637_v24 = vadd.f32 %v3605_v15, %v3589_v57  ;;  %2502 = vst.msk [vmem:[%s6311_s29 + $0x58] sm:$0xff] %vm448_vm2, %v2470_v8  ;;  %v5178_v25 = vpop.f32.mrb[44].mxu1  ;;  %v3545_v26 = vrot.slane %v3422_v19, 1  ;;  %v6538_v27 = vpop.f32.mrb[46].mxu0 }
 0x1f6   : > { %3666 = vst.msk [vmem:[%s6311_s29 + $0x20] sm:$0xff] %vm448_vm2, %v3634_v14  ;;  %v3635_v22 = vadd.f32 %v3603_v20, %v6475_v21  ;;  %v3636_v28 = vadd.f32 %v3604_v23, %v6468_v16  ;;  %2500 = vst.msk [vmem:[%s6311_s29 + $0x48] sm:$0xff] %vm448_vm2, %v2468_v17  ;;  %v2249_v29 = vpop.f32.mrb[45].mxu1  ;;  %v3548_v30 = vrot.slane %v6538_v27, 1  ;;  %v3425_v31 = vpop.f32.mrb[47].mxu0  ;;  %v2374_v41 = vrot.slane %v5178_v25, 7 }
 0x1f7   : > { %2501 = vst.msk [vmem:[%s6311_s29 + $0x50] sm:$0xff] %vm448_vm2, %v2469_v18  ;;  %3669 = vst.msk [vmem:[%s6311_s29 + $0x38] sm:$0xff] %vm448_vm2, %v3637_v24  ;;  %v3585_v33 = vsel %vm3565_vm3, %v3544_v52, %v3545_v26  ;;  %v2372_v21 = vrot.slane %v2249_v29, 7  ;;  %v5179_v34 = vpop.f32.mrb[46].mxu1  ;;  %v3546_v45 = vrot.slane %v3425_v31, 1  ;;  %v2440_v8 = vld [vmem:[%s6311_s29 + $0x68] sm:$0xff] }
 0x1f8   : > { %3667 = vst.msk [vmem:[%s6311_s29 + $0x28] sm:$0xff] %vm448_vm2, %v3635_v22  ;;  %3668 = vst.msk [vmem:[%s6311_s29 + $0x30] sm:$0xff] %vm448_vm2, %v3636_v28  ;;  %v2252_v16 = vpop.f32.mrb[47].mxu1  ;;  %v6561_v36 = vsel %vm3565_vm3, %v3547_v32, %v3548_v30  ;;  %v2375_v44 = vrot.slane %v5179_v34, 7  ;;  %v2443_v22 = vld [vmem:[%s6311_s29 + $0x80] sm:$0xff] }
 0x1f9   : > { %v2414_v35 = vsel %vm2394_vm4, %v2371_v61, %v2372_v21  ;;  %v2373_v51 = vrot.slane %v2252_v16, 7  ;;  %v3583_v50 = vsel %vm3565_vm3, %v3546_v45, %v3547_v32  ;;  %v3584_v61 = vsel %vm3565_vm3, %v3545_v26, %v3546_v45 }
 0x1fa   : > { %v2471_v42 = vadd.f32 %v2439_v38, %v2414_v35  ;;  %v2411_v59 = vsel %vm2394_vm4, %v2374_v41, %v2375_v44  ;;  %v2446_v38 = vld [vmem:[%s6311_s29 + $0x98] sm:$0xff] }
 0x1fb   : > { %v3606_v40 = vld [vmem:[%s6311_s29 + $0x40] sm:$0xff]  ;;  %v6565_v47 = vpop.f32.mrb[48].mxu0  ;;  %v2474_v3 = vadd.f32 %v2442_v54, %v2411_v59  ;;  %v2412_v6 = vsel %vm2394_vm4, %v2373_v51, %v2374_v41  ;;  %v2413_v7 = vsel %vm2394_vm4, %v2372_v21, %v2373_v51 }
 0x1fc   : > { %v3638_v48 = vadd.f32 %v3606_v40, %v3588_v2  ;;  %v3609_v49 = vld [vmem:[%s6311_s29 + $0x58] sm:$0xff]  ;;  %v6568_v52 = vpop.f32.mrb[49].mxu0  ;;  %2503 = vst.msk [vmem:[%s6311_s29 + $0x60] sm:$0xff] %vm448_vm2, %v2471_v42  ;;  %v3551_v20 = vrot.slane %v6565_v47, 1 }
 0x1fd   : > { %v3607_v56 = vld [vmem:[%s6311_s29 + $0x48] sm:$0xff]  ;;  %v3641_v58 = vadd.f32 %v3609_v49, %v3585_v33  ;;  %v6581_v62 = vpop.f32.mrb[48].mxu1  ;;  %v6583_v63 = vpop.f32.mrb[50].mxu0  ;;  %2506 = vst.msk [vmem:[%s6311_s29 + $0x78] sm:$0xff] %vm448_vm2, %v2474_v3  ;;  %v3549_v12 = vrot.slane %v6568_v52, 1 }
 0x1fe   : > { %v3608_v57 = vld [vmem:[%s6311_s29 + $0x50] sm:$0xff]  ;;  %3670 = vst.msk [vmem:[%s6311_s29 + $0x40] sm:$0xff] %vm448_vm2, %v3638_v48  ;;  %v3639_v0 = vadd.f32 %v3607_v56, %v6517_v1  ;;  %v2265_v4 = vpop.f32.mrb[49].mxu1  ;;  %v3441_v5 = vpop.f32.mrb[51].mxu0  ;;  %v2473_v1 = vadd.f32 %v2441_v9, %v2412_v6  ;;  %v3552_v23 = vrot.slane %v6583_v63, 1  ;;  %v2378_v26 = vrot.slane %v6581_v62, 7 }
 0x1ff   : > { %v3640_v2 = vadd.f32 %v3608_v57, %v6510_v60  ;;  %3673 = vst.msk [vmem:[%s6311_s29 + $0x58] sm:$0xff] %vm448_vm2, %v3641_v58  ;;  %v6597_v10 = vpop.f32.mrb[50].mxu1  ;;  %v2472_v60 = vadd.f32 %v2440_v8, %v2413_v7  ;;  %v3581_v15 = vsel %vm3565_vm3, %v3548_v30, %v3549_v12  ;;  %v2376_v17 = vrot.slane %v2265_v4, 7  ;;  %v2445_v58 = vld [vmem:[%s6311_s29 + $0x90] sm:$0xff] }
 0x200   : > { %3671 = vst.msk [vmem:[%s6311_s29 + $0x48] sm:$0xff] %vm448_vm2, %v3639_v0  ;;  %v2268_v11 = vpop.f32.mrb[51].mxu1  ;;  %2505 = vst.msk [vmem:[%s6311_s29 + $0x70] sm:$0xff] %vm448_vm2, %v2473_v1  ;;  %v2379_v28 = vrot.slane %v6597_v10, 7  ;;  %v3550_v29 = vrot.slane %v3441_v5, 1  ;;  %v6637_v21 = vsel %vm3565_vm3, %v3551_v20, %v3552_v23 }
 0x201   : > { %3672 = vst.msk [vmem:[%s6311_s29 + $0x50] sm:$0xff] %vm448_vm2, %v3640_v2  ;;  %2504 = vst.msk [vmem:[%s6311_s29 + $0x68] sm:$0xff] %vm448_vm2, %v2472_v60  ;;  %v2410_v27 = vsel %vm2394_vm4, %v2375_v44, %v2376_v17  ;;  %v2377_v51 = vrot.slane %v2268_v11, 7 }
 0x202   : > { %v2475_v33 = vadd.f32 %v2443_v22, %v2410_v27  ;;  %v2407_v35 = vsel %vm2394_vm4, %v2378_v26, %v2379_v28  ;;  %v6646_v40 = vsel %vm3565_vm3, %v3550_v29, %v3551_v20  ;;  %v3580_v47 = vsel %vm3565_vm3, %v3549_v12, %v3550_v29  ;;  %v2447_v12 = vld [vmem:[%s6311_s29 + $0xa0] sm:$0xff] }
 0x203   : > { %v6610_v13 = vpop.f32.mrb[52].mxu0  ;;  %v3610_v14 = vld [vmem:[%s6311_s29 + $0x60] sm:$0xff]  ;;  %v2478_v45 = vadd.f32 %v2446_v38, %v2407_v35  ;;  %v2408_v56 = vsel %vm2394_vm4, %v2377_v51, %v2378_v26  ;;  %v2409_v57 = vsel %vm2394_vm4, %v2376_v17, %v2377_v51 }
 0x204   : > { %v6615_v18 = vpop.f32.mrb[53].mxu0  ;;  %v3642_v19 = vadd.f32 %v3610_v14, %v3584_v61  ;;  %v3613_v32 = vld [vmem:[%s6311_s29 + $0x78] sm:$0xff]  ;;  %2507 = vst.msk [vmem:[%s6311_s29 + $0x80] sm:$0xff] %vm448_vm2, %v2475_v33  ;;  %v3555_v3 = vrot.slane %v6610_v13, 1 }
 0x205   : > { %v6619_v24 = vpop.f32.mrb[52].mxu1  ;;  %v6621_v25 = vpop.f32.mrb[54].mxu0  ;;  %v3645_v16 = vadd.f32 %v3613_v32, %v3581_v15  ;;  %2510 = vst.msk [vmem:[%s6311_s29 + $0x98] sm:$0xff] %vm448_vm2, %v2478_v45  ;;  %v3553_v63 = vrot.slane %v6615_v18, 1  ;;  %v2450_v18 = vld [vmem:[%s6311_s29 + $0xb8] sm:$0xff] }
 0x206   : > { %v6628_v30 = vpop.f32.mrb[53].mxu1  ;;  %v6630_v31 = vpop.f32.mrb[55].mxu0  ;;  %3674 = vst.msk [vmem:[%s6311_s29 + $0x60] sm:$0xff] %vm448_vm2, %v3642_v19  ;;  %v3556_v5 = vrot.slane %v6621_v25, 1  ;;  %v2382_v8 = vrot.slane %v6619_v24, 7 }
 0x207   : > { %v6639_v34 = vpop.f32.mrb[54].mxu1  ;;  %v3612_v44 = vld [vmem:[%s6311_s29 + $0x70] sm:$0xff]  ;;  %3677 = vst.msk [vmem:[%s6311_s29 + $0x78] sm:$0xff] %vm448_vm2, %v3645_v16  ;;  %v2380_v4 = vrot.slane %v6628_v30, 7  ;;  %v3577_v9 = vsel %vm3565_vm3, %v3552_v23, %v3553_v63  ;;  %v3554_v19 = vrot.slane %v6630_v31, 1 }
 0x208   : > { %v6648_v41 = vpop.f32.mrb[55].mxu1  ;;  %v3611_v42 = vld [vmem:[%s6311_s29 + $0x68] sm:$0xff]  ;;  %v3644_v49 = vadd.f32 %v3612_v44, %v6561_v36  ;;  %v2383_v10 = vrot.slane %v6639_v34, 7  ;;  %v6705_v13 = vsel %vm3565_vm3, %v3555_v3, %v3556_v5 }
 0x209   : > { %v3643_v48 = vadd.f32 %v3611_v42, %v3583_v50  ;;  %v2444_v36 = vld [vmem:[%s6311_s29 + $0x88] sm:$0xff]  ;;  %v2477_v50 = vadd.f32 %v2445_v58, %v2408_v56  ;;  %v2406_v11 = vsel %vm2394_vm4, %v2379_v28, %v2380_v4  ;;  %v3575_v25 = vsel %vm3565_vm3, %v3554_v19, %v3555_v3  ;;  %v2449_v42 = vld [vmem:[%s6311_s29 + $0xb0] sm:$0xff]  ;;  %v6763_v56 = vpop.permute.xlu0 %3761 }
 0x20a   : > { %3676 = vst.msk [vmem:[%s6311_s29 + $0x70] sm:$0xff] %vm448_vm2, %v3644_v49  ;;  %v2476_v54 = vadd.f32 %v2444_v36, %v2409_v57  ;;  %v2479_v15 = vadd.f32 %v2447_v12, %v2406_v11  ;;  %v2403_v17 = vsel %vm2394_vm4, %v2382_v8, %v2383_v10  ;;  %v3576_v26 = vsel %vm3565_vm3, %v3553_v63, %v3554_v19  ;;  %v2448_v34 = vld [vmem:[%s6311_s29 + $0xa8] sm:$0xff]  ;;  %v6765_v57 = vpop.permute.xlu1 %3771  ;;  %v2451_v63 = vld [vmem:[%s6311_s29 + $0xc0] sm:$0xff]  ;;  %v2453_v19 = vld [vmem:[%s6311_s29 + $0xd0] sm:$0xff] }
 0x20b   : > { %v6661_v52 = vpop.f32.mrb[56].mxu0  ;;  %3675 = vst.msk [vmem:[%s6311_s29 + $0x68] sm:$0xff] %vm448_vm2, %v3643_v48  ;;  %2509 = vst.msk [vmem:[%s6311_s29 + $0x90] sm:$0xff] %vm448_vm2, %v2477_v50  ;;  %v3614_v7 = vld [vmem:[%s6311_s29 + $0x80] sm:$0xff]  ;;  %v2482_v23 = vadd.f32 %v2450_v18, %v2403_v17  ;;  %v2381_v27 = vrot.slane %v6648_v41, 7  ;;  %v2452_v18 = vld [vmem:[%s6311_s29 + $0xc8] sm:$0xff] }
 0x20c   : > { %v6673_v59 = vpop.f32.mrb[57].mxu0  ;;  %2508 = vst.msk [vmem:[%s6311_s29 + $0x88] sm:$0xff] %vm448_vm2, %v2476_v54  ;;  %v3646_v1 = vadd.f32 %v3614_v7, %v3580_v47  ;;  %v3617_v14 = vld [vmem:[%s6311_s29 + $0x98] sm:$0xff]  ;;  %2511 = vst.msk [vmem:[%s6311_s29 + $0xa0] sm:$0xff] %vm448_vm2, %v2479_v15 }
 0x20d   : > { %v6675_v61 = vpop.f32.mrb[56].mxu1  ;;  %v6677_v62 = vpop.f32.mrb[58].mxu0  ;;  %v3649_v20 = vadd.f32 %v3617_v14, %v3577_v9  ;;  %2514 = vst.msk [vmem:[%s6311_s29 + $0xb8] sm:$0xff] %vm448_vm2, %v2482_v23  ;;  %v2404_v32 = vsel %vm2394_vm4, %v2381_v27, %v2382_v8  ;;  %v2405_v33 = vsel %vm2394_vm4, %v2380_v4, %v2381_v27 }
 0x20e   : > { %v6680_v0 = vpop.f32.mrb[57].mxu1  ;;  %v6682_v2 = vpop.f32.mrb[59].mxu0  ;;  %3678 = vst.msk [vmem:[%s6311_s29 + $0x80] sm:$0xff] %vm448_vm2, %v3646_v1  ;;  %v2480_v44 = vadd.f32 %v2448_v34, %v2405_v33  ;;  %v2481_v47 = vadd.f32 %v2449_v42, %v2404_v32  ;;  %v3560_v51 = vrot.slane %v6677_v62, 1  ;;  %v2386_v58 = vrot.slane %v6675_v61, 7  ;;  %v2455_v32 = vld [vmem:[%s6311_s29 + $0xe0] sm:$0xff] }
 0x20f   : > { %v6691_v6 = vpop.f32.mrb[58].mxu1  ;;  %3681 = vst.msk [vmem:[%s6311_s29 + $0x98] sm:$0xff] %vm448_vm2, %v3649_v20  ;;  %v2384_v49 = vrot.slane %v6680_v0, 7  ;;  %v6799_v11 = vpop.permute.xlu0 %3766 }
 0x210   : > { %v6698_v60 = vpop.f32.mrb[59].mxu1  ;;  %2512 = vst.msk [vmem:[%s6311_s29 + $0xa8] sm:$0xff] %vm448_vm2, %v2480_v44  ;;  %2513 = vst.msk [vmem:[%s6311_s29 + $0xb0] sm:$0xff] %vm448_vm2, %v2481_v47  ;;  %v6801_v12 = vpop.permute.xlu1 %3776 }
 0x211   : > { %v2402_v62 = vsel %vm2394_vm4, %v2383_v10, %v2384_v49  ;;  %v2385_v10 = vrot.slane %v6698_v60, 7 }
 0x212   : > { %v3616_v31 = vld [vmem:[%s6311_s29 + $0x90] sm:$0xff]  ;;  %v2483_v61 = vadd.f32 %v2451_v63, %v2402_v62  ;;  %v2456_v63 = vld [vmem:[%s6311_s29 + $0xe8] sm:$0xff] }
 0x213   : > { %v6714_v24 = vpop.f32.mrb[60].mxu0  ;;  %v3615_v30 = vld [vmem:[%s6311_s29 + $0x88] sm:$0xff]  ;;  %v3648_v41 = vadd.f32 %v3616_v31, %v6637_v21  ;;  %v3559_v21 = vrot.slane %v6661_v52, 1  ;;  %v3618_v36 = vld [vmem:[%s6311_s29 + $0xa0] sm:$0xff]  ;;  %v2387_v52 = vrot.slane %v6691_v6, 7  ;;  %v3558_v6 = vrot.slane %v6682_v2, 1  ;;  %v6829_v34 = vpop.permute.xlu0 %3781 }
 0x214   : > { %v6723_v22 = vpop.f32.mrb[61].mxu0  ;;  %v3647_v38 = vadd.f32 %v3615_v30, %v6646_v40  ;;  %v3557_v40 = vrot.slane %v6673_v59, 1  ;;  %v3650_v54 = vadd.f32 %v3618_v36, %v3576_v26  ;;  %v3621_v50 = vld [vmem:[%s6311_s29 + $0xb8] sm:$0xff]  ;;  %2515 = vst.msk [vmem:[%s6311_s29 + $0xc0] sm:$0xff] %vm448_vm2, %v2483_v61  ;;  %v2400_v17 = vsel %vm2394_vm4, %v2385_v10, %v2386_v58 }
 0x215   : > { %v6729_v28 = vpop.f32.mrb[60].mxu1  ;;  %v6731_v29 = vpop.f32.mrb[62].mxu0  ;;  %3680 = vst.msk [vmem:[%s6311_s29 + $0x90] sm:$0xff] %vm448_vm2, %v3648_v41  ;;  %v6778_v0 = vsel %vm3565_vm3, %v3559_v21, %v3560_v51  ;;  %v2399_v4 = vsel %vm2394_vm4, %v2386_v58, %v2387_v52  ;;  %v3571_v8 = vsel %vm3565_vm3, %v3558_v6, %v3559_v21  ;;  %v3561_v1 = vrot.slane %v6723_v22, 1 }
 0x216   : > { %v6740_v16 = vpop.f32.mrb[61].mxu1  ;;  %v6742_v35 = vpop.f32.mrb[63].mxu0  ;;  %3679 = vst.msk [vmem:[%s6311_s29 + $0x88] sm:$0xff] %vm448_vm2, %v3647_v38  ;;  %v3573_v59 = vsel %vm3565_vm3, %v3556_v5, %v3557_v40  ;;  %v2454_v5 = vld [vmem:[%s6311_s29 + $0xd8] sm:$0xff]  ;;  %3682 = vst.msk [vmem:[%s6311_s29 + $0xa0] sm:$0xff] %vm448_vm2, %v3650_v54  ;;  %v3572_v9 = vsel %vm3565_vm3, %v3557_v40, %v3558_v6  ;;  %v2401_v60 = vsel %vm2394_vm4, %v2384_v49, %v2385_v10  ;;  %v3564_v22 = vrot.slane %v6731_v29, 1 }
 0x217   : > { %v6747_v45 = vpop.f32.mrb[62].mxu1  ;;  %v3653_v3 = vadd.f32 %v3621_v50, %v3573_v59  ;;  %v2486_v7 = vadd.f32 %v2454_v5, %v2399_v4  ;;  %v3619_v2 = vld [vmem:[%s6311_s29 + $0xa8] sm:$0xff]  ;;  %v3620_v14 = vld [vmem:[%s6311_s29 + $0xb0] sm:$0xff]  ;;  %v2484_v23 = vadd.f32 %v2452_v18, %v2401_v60  ;;  %v2485_v26 = vadd.f32 %v2453_v19, %v2400_v17  ;;  %v6831_v38 = vpop.permute.xlu1 %3786  ;;  %v2427_v40 = vld [vmem:[%s6311_s29] sm:$0xff] }
 0x218   : > { %v6749_v48 = vpop.f32.mrb[63].mxu1  ;;  %v3651_v15 = vadd.f32 %v3619_v2, %v3575_v25  ;;  %v3652_v20 = vadd.f32 %v3620_v14, %v6705_v13  ;;  %v3569_v25 = vsel %vm3565_vm3, %v3560_v51, %v3561_v1  ;;  %v2388_v27 = vrot.slane %v6740_v16, 7  ;;  %v6871_v54 = vpop.permute.xlu0 %3791  ;;  %v3695_v2 = vld [vmem:[%s6311_s29 + $0x8] sm:$0xff]  ;;  %v3697_v19 = vld [vmem:[%s6311_s29 + $0x18] sm:$0xff] }
 0x219   : > { %3685 = vst.msk [vmem:[%s6311_s29 + $0xb8] sm:$0xff] %vm448_vm2, %v3653_v3  ;;  %2518 = vst.msk [vmem:[%s6311_s29 + $0xd8] sm:$0xff] %vm448_vm2, %v2486_v7  ;;  %v3563_v30 = vrot.slane %v6714_v24, 1  ;;  %v2391_v33 = vrot.slane %v6747_v45, 7  ;;  %v2390_v29 = vrot.slane %v6729_v28, 7  ;;  %v3597_v45 = vsel %vm3565_vm3, %v3564_v22, %v3533_v46 }
 0x21a   : > { %3683 = vst.msk [vmem:[%s6311_s29 + $0xa8] sm:$0xff] %vm448_vm2, %v3651_v15  ;;  %3684 = vst.msk [vmem:[%s6311_s29 + $0xb0] sm:$0xff] %vm448_vm2, %v3652_v20  ;;  %v2398_v31 = vsel %vm2394_vm4, %v2387_v52, %v2388_v27  ;;  %v3562_v21 = vrot.slane %v6742_v35, 1  ;;  %v2389_v51 = vrot.slane %v6749_v48, 7  ;;  %v2457_v52 = vld [vmem:[%s6311_s29 + $0xf0] sm:$0xff] }
 0x21b   : > { %2516 = vst.msk [vmem:[%s6311_s29 + $0xc8] sm:$0xff] %vm448_vm2, %v2484_v23  ;;  %2517 = vst.msk [vmem:[%s6311_s29 + $0xd0] sm:$0xff] %vm448_vm2, %v2485_v26  ;;  %v3622_v13 = vld [vmem:[%s6311_s29 + $0xc0] sm:$0xff]  ;;  %v2487_v42 = vadd.f32 %v2455_v32, %v2398_v31  ;;  %v3566_v44 = vsel %vm3565_vm3, %v3563_v30, %v3564_v22  ;;  %v2395_v28 = vsel %vm2394_vm4, %v2390_v29, %v2391_v33  ;;  %v6873_v50 = vpop.permute.xlu1 %3796  ;;  %v3696_v15 = vld [vmem:[%s6311_s29 + $0x10] sm:$0xff] }
 0x21c   : > { %v3654_v16 = vadd.f32 %v3622_v13, %v3572_v9  ;;  %v2426_v47 = vsel %vm2394_vm4, %v2391_v33, %v2360_v53  ;;  %v2490_v49 = vadd.f32 %v2458_v39, %v2395_v28  ;;  %v3567_v58 = vsel %vm3565_vm3, %v3562_v21, %v3563_v30  ;;  %v6887_v4 = vpop.permute.xlu0 %3801  ;;  %v3700_v28 = vld [vmem:[%s6311_s29 + $0x30] sm:$0xff] }
 0x21d   : > { %2519 = vst.msk [vmem:[%s6311_s29 + $0xe0] sm:$0xff] %vm448_vm2, %v2487_v42  ;;  %v2459_v46 = vadd.f32 %v2427_v40, %v2426_v47  ;;  %v3568_v53 = vsel %vm3565_vm3, %v3561_v1, %v3562_v21  ;;  %v2396_v48 = vsel %vm2394_vm4, %v2389_v51, %v2390_v29  ;;  %v2397_v62 = vsel %vm2394_vm4, %v2388_v27, %v2389_v51  ;;  %v3698_v27 = vld [vmem:[%s6311_s29 + $0x20] sm:$0xff]  ;;  %v3701_v51 = vld [vmem:[%s6311_s29 + $0x38] sm:$0xff] }
 0x21e   : > { %3686 = vst.msk [vmem:[%s6311_s29 + $0xc0] sm:$0xff] %vm448_vm2, %v3654_v16  ;;  %2522 = vst.msk [vmem:[%s6311_s29 + $0xf8] sm:$0xff] %vm448_vm2, %v2490_v49  ;;  %v2488_v3 = vadd.f32 %v2456_v63, %v2397_v62  ;;  %v4026_v20 = vmul.f32 %v3696_v15, %v3696_v15  ;;  %v3920_v23 = vmul.f32 %v6799_v11, %v3695_v2  ;;  %v3699_v16 = vld [vmem:[%s6311_s29 + $0x28] sm:$0xff] }
 0x21f   : > { %2491 = vst.msk [vmem:[%s6311_s29] sm:$0xff] %vm448_vm2, %v2459_v46  ;;  %v6889_v5 = vpop.permute.xlu1 %3806  ;;  %v3921_v26 = vmul.f32 %v6765_v57, %v3696_v15  ;;  %v3922_v33 = vmul.f32 %v6801_v12, %v3697_v19  ;;  %v3923_v39 = vmul.f32 %v6829_v34, %v3698_v27  ;;  %v4029_v21 = vmul.f32 %v3699_v16, %v3699_v16  ;;  %v3704_v15 = vld [vmem:[%s6311_s29 + $0x50] sm:$0xff] }
 0x220   : > { %v3625_v41 = vld [vmem:[%s6311_s29 + $0xd8] sm:$0xff]  ;;  %2520 = vst.msk [vmem:[%s6311_s29 + $0xe8] sm:$0xff] %vm448_vm2, %v2488_v3  ;;  %v6904_v60 = vpop.permute.xlu0 %3811  ;;  %v4058_v32 = vmul.f32 %v4026_v20, %v6765_v57  ;;  %v3952_v42 = vsel %vm448_vm2, %v3920_v23, 0.0 }
 0x221   : > { %v3657_v24 = vadd.f32 %v3625_v41, %v3569_v25  ;;  %v4027_v25 = vmul.f32 %v3697_v19, %v3697_v19  ;;  %v3956_v49 = vsel %vm448_vm2, %v3922_v33, 0.0  ;;  %v3958_v3 = vsel %vm448_vm2, %v3923_v39, 0.0 }
 0x222   : > { %v3623_v36 = vld [vmem:[%s6311_s29 + $0xc8] sm:$0xff]  ;;  %v3624_v43 = vld [vmem:[%s6311_s29 + $0xd0] sm:$0xff]  ;;  %v3929_v33 = vmul.f32 %v6904_v60, %v3704_v15 }
 0x223   : > { %3689 = vst.msk [vmem:[%s6311_s29 + $0xd8] sm:$0xff] %vm448_vm2, %v3657_v24  ;;  %v3655_v35 = vadd.f32 %v3623_v36, %v3571_v8  ;;  %v3656_v59 = vadd.f32 %v3624_v43, %v6778_v0  ;;  %v2489_v0 = vadd.f32 %v2457_v52, %v2396_v48  ;;  %v6906_v18 = vpop.permute.xlu1 %3816  ;;  %v4028_v24 = vmul.f32 %v3698_v27, %v3698_v27 }
 0x224   : > { %v3626_v61 = vld [vmem:[%s6311_s29 + $0xe0] sm:$0xff]  ;;  %v6922_v29 = vpop.permute.xlu0 %3821  ;;  %v4059_v57 = vmul.f32 %v4027_v25, %v6801_v12  ;;  %v3924_v12 = vmul.f32 %v6831_v38, %v3699_v16  ;;  %v3705_v25 = vld [vmem:[%s6311_s29 + $0x58] sm:$0xff] }
 0x225   : > { %3687 = vst.msk [vmem:[%s6311_s29 + $0xc8] sm:$0xff] %vm448_vm2, %v3655_v35  ;;  %3688 = vst.msk [vmem:[%s6311_s29 + $0xd0] sm:$0xff] %vm448_vm2, %v3656_v59  ;;  %v3658_v37 = vadd.f32 %v3626_v61, %v3568_v53  ;;  %v3629_v7 = vld [vmem:[%s6311_s29 + $0xf8] sm:$0xff]  ;;  %v4030_v53 = vmul.f32 %v3700_v28, %v3700_v28  ;;  %v3702_v35 = vld [vmem:[%s6311_s29 + $0x40] sm:$0xff]  ;;  %v3925_v59 = vmul.f32 %v6871_v54, %v3700_v28 }
 0x226   : > { %2521 = vst.msk [vmem:[%s6311_s29 + $0xf0] sm:$0xff] %vm448_vm2, %v2489_v0  ;;  %v3598_v6 = vld [vmem:[%s6311_s29] sm:$0xff]  ;;  %v3661_v9 = vadd.f32 %v3629_v7, %v3597_v45  ;;  %v3954_v45 = vsel %vm448_vm2, %v3921_v26, 0.0  ;;  %v4093_v0 = vsel %vm448_vm2, %v4059_v57, 0.0  ;;  %v4061_v61 = vmul.f32 %v4029_v21, %v6831_v38  ;;  %v3707_v28 = vld [vmem:[%s6311_s29 + $0x68] sm:$0xff] }
 0x227   : > { %3690 = vst.msk [vmem:[%s6311_s29 + $0xe0] sm:$0xff] %vm448_vm2, %v3658_v37  ;;  %v3630_v8 = vadd.f32 %v3598_v6, %v6445_v55  ;;  %v3627_v1 = vld [vmem:[%s6311_s29 + $0xe8] sm:$0xff]  ;;  %v4025_v55 = vmul.f32 %v3695_v2, %v3695_v2  ;;  %v6924_v41 = vpop.permute.xlu1 %3826  ;;  %v4032_v37 = vmul.f32 %v3702_v35, %v3702_v35  ;;  %v4062_v2 = vmul.f32 %v4030_v53, %v6871_v54  ;;  %v3706_v16 = vld [vmem:[%s6311_s29 + $0x60] sm:$0xff] }
 0x228   : > { %3693 = vst.msk [vmem:[%s6311_s29 + $0xf8] sm:$0xff] %vm448_vm2, %v3661_v9  ;;  %v3659_v17 = vadd.f32 %v3627_v1, %v3567_v58  ;;  %v4060_v58 = vmul.f32 %v4028_v24, %v6829_v34  ;;  %v6942_v48 = vpop.permute.xlu0 %3831  ;;  %v4031_v34 = vmul.f32 %v3701_v51, %v3701_v51  ;;  %v3703_v6 = vld [vmem:[%s6311_s29 + $0x48] sm:$0xff]  ;;  %v3926_v1 = vmul.f32 %v6873_v50, %v3701_v51  ;;  %v3708_v51 = vld [vmem:[%s6311_s29 + $0x70] sm:$0xff] }
 0x229   : > { %3662 = vst.msk [vmem:[%s6311_s29] sm:$0xff] %vm448_vm2, %v3630_v8  ;;  %v4057_v13 = vmul.f32 %v4025_v55, %v6799_v11  ;;  %v4097_v38 = vsel %vm448_vm2, %v4061_v61, 0.0  ;;  %v3927_v20 = vmul.f32 %v6887_v4, %v3702_v35  ;;  %v4033_v23 = vmul.f32 %v3703_v6, %v3703_v6 }
 0x22a   : > { %3691 = vst.msk [vmem:[%s6311_s29 + $0xe8] sm:$0xff] %vm448_vm2, %v3659_v17  ;;  %v4095_v9 = vsel %vm448_vm2, %v4060_v58, 0.0  ;;  %v4063_v19 = vmul.f32 %v4031_v34, %v6873_v50  ;;  %v4064_v26 = vmul.f32 %v4032_v37, %v6887_v4  ;;  %v4034_v50 = vmul.f32 %v3704_v15, %v3704_v15  ;;  %v3711_v15 = vld [vmem:[%s6311_s29 + $0x88] sm:$0xff] }
 0x22b   : > { %v4089_v40 = vsel %vm448_vm2, %v4057_v13, 0.0  ;;  %v6944_v52 = vpop.permute.xlu1 %3836  ;;  %v3931_v35 = vmul.f32 %v6922_v29, %v3706_v16  ;;  %v3932_v37 = vmul.f32 %v6924_v41, %v3707_v28 }
 0x22c   : > { %v6961_v27 = vpop.permute.xlu0 %3841  ;;  %v4101_v24 = vsel %vm448_vm2, %v4063_v19, 0.0  ;;  %v4103_v57 = vsel %vm448_vm2, %v4064_v26, 0.0  ;;  %v4066_v21 = vmul.f32 %v4034_v50, %v6904_v60  ;;  %v4037_v60 = vmul.f32 %v3707_v28, %v3707_v28 }
 0x22d   : > { %v3628_v10 = vld [vmem:[%s6311_s29 + $0xf0] sm:$0xff] }
 0x22e   : > { %v3660_v14 = vadd.f32 %v3628_v10, %v3566_v44  ;;  %v3960_v10 = vsel %vm448_vm2, %v3924_v12, 0.0 }
 0x22f   : > { %v6963_v54 = vpop.permute.xlu1 %3846 }
 0x230   : > { %3692 = vst.msk [vmem:[%s6311_s29 + $0xf0] sm:$0xff] %vm448_vm2, %v3660_v14  ;;  %v3694_v22 = vld [vmem:[%s6311_s29] sm:$0xff]  ;;  %v3962_v14 = vsel %vm448_vm2, %v3925_v59, 0.0  ;;  %v4038_v59 = vmul.f32 %v3708_v51, %v3708_v51 }
 0x231   : > { %v3919_v30 = vmul.f32 %v6763_v56, %v3694_v22  ;;  %v4024_v31 = vmul.f32 %v3694_v22, %v3694_v22 }
 0x233   : > { %v3951_v44 = vsel %vm448_vm2, %v3919_v30, 0.0  ;;  %v4056_v11 = vmul.f32 %v4024_v31, %v6763_v56  ;;  %v4091_v56 = vsel %vm448_vm2, %v4058_v32, 0.0  ;;  %v4099_v30 = vsel %vm448_vm2, %v4062_v2, 0.0 }
 0x234   : > { %v3953_v47 = vadd.f32 %v3952_v42, %v3951_v44  ;;  %v3964_v31 = vsel %vm448_vm2, %v3926_v1, 0.0  ;;  %v3928_v32 = vmul.f32 %v6889_v5, %v3703_v6  ;;  %v3966_v44 = vsel %vm448_vm2, %v3927_v20, 0.0 }
 0x235   : > { %v4088_v46 = vsel %vm448_vm2, %v4056_v11, 0.0  ;;  %v4065_v11 = vmul.f32 %v4033_v23, %v6889_v5  ;;  %v6982_v5 = vpop.permute.xlu1 %3856  ;;  %v3933_v6 = vmul.f32 %v6942_v48, %v3708_v51  ;;  %v4069_v2 = vmul.f32 %v4037_v60, %v6924_v41  ;;  %v3712_v41 = vld [vmem:[%s6311_s29 + $0x90] sm:$0xff] }
 0x236   : > { %v3955_v36 = vadd.f32 %v3954_v45, %v3953_v47  ;;  %v4090_v43 = vadd.f32 %v4089_v40, %v4088_v46  ;;  %v4035_v45 = vmul.f32 %v3705_v25, %v3705_v25  ;;  %v3968_v39 = vsel %vm448_vm2, %v3928_v32, 0.0 }
 0x237   : > { %v3930_v46 = vmul.f32 %v6906_v18, %v3705_v25  ;;  %v4105_v12 = vsel %vm448_vm2, %v4065_v11, 0.0  ;;  %v3976_v20 = vsel %vm448_vm2, %v3932_v37, 0.0  ;;  %v3978_v25 = vsel %vm448_vm2, %v3933_v6, 0.0 }
 0x238   : > { %v3957_v62 = vadd.f32 %v3956_v49, %v3955_v36  ;;  %v4092_v63 = vadd.f32 %v4091_v56, %v4090_v43  ;;  %v4036_v49 = vmul.f32 %v3706_v16, %v3706_v16  ;;  %v3970_v36 = vsel %vm448_vm2, %v3929_v33, 0.0  ;;  %v6980_v43 = vpop.permute.xlu0 %3851  ;;  %v3713_v33 = vld [vmem:[%s6311_s29 + $0x98] sm:$0xff] }
 0x239   : > { %v4067_v53 = vmul.f32 %v4035_v45, %v6906_v18  ;;  %v3972_v61 = vsel %vm448_vm2, %v3930_v46, 0.0  ;;  %v4041_v32 = vmul.f32 %v3711_v15, %v3711_v15  ;;  %v4042_v11 = vmul.f32 %v3712_v41, %v3712_v41 }
 0x23a   : > { %v3959_v7 = vadd.f32 %v3958_v3, %v3957_v62  ;;  %v4094_v8 = vadd.f32 %v4093_v0, %v4092_v63  ;;  %v3709_v62 = vld [vmem:[%s6311_s29 + $0x78] sm:$0xff]  ;;  %v4107_v3 = vsel %vm448_vm2, %v4066_v21, 0.0  ;;  %v4068_v34 = vmul.f32 %v4036_v49, %v6922_v29 }
 0x23b   : > { %v4039_v1 = vmul.f32 %v3709_v62, %v3709_v62  ;;  %v3934_v23 = vmul.f32 %v6944_v52, %v3709_v62  ;;  %v3937_v45 = vmul.f32 %v6980_v43, %v3712_v41  ;;  %v4073_v46 = vmul.f32 %v4041_v32, %v6963_v54 }
 0x23c   : > { %v3961_v17 = vadd.f32 %v3960_v10, %v3959_v7  ;;  %v4096_v55 = vadd.f32 %v4095_v9, %v4094_v8  ;;  %v3710_v7 = vld [vmem:[%s6311_s29 + $0x80] sm:$0xff]  ;;  %v4109_v9 = vsel %vm448_vm2, %v4067_v53, 0.0  ;;  %v3974_v10 = vsel %vm448_vm2, %v3931_v35, 0.0 }
 0x23d   : > { %v4111_v19 = vsel %vm448_vm2, %v4068_v34, 0.0  ;;  %v4040_v26 = vmul.f32 %v3710_v7, %v3710_v7  ;;  %v4043_v49 = vmul.f32 %v3713_v33, %v3713_v33  ;;  %v4074_v53 = vmul.f32 %v4042_v11, %v6980_v43 }
 0x23e   : > { %v3963_v22 = vadd.f32 %v3962_v14, %v3961_v17  ;;  %v4098_v13 = vadd.f32 %v4097_v38, %v4096_v55  ;;  %v4070_v14 = vmul.f32 %v4038_v59, %v6942_v48  ;;  %v3862_v17 = vpop.permute.xlu0 %3861  ;;  %v6999_v38 = vpop.permute.xlu1 %3866  ;;  %v3986_v60 = vsel %vm448_vm2, %v3937_v45, 0.0 }
 0x240   : > { %v3965_v4 = vadd.f32 %v3964_v31, %v3963_v22  ;;  %v4100_v42 = vadd.f32 %v4099_v30, %v4098_v13  ;;  %v4113_v13 = vsel %vm448_vm2, %v4069_v2, 0.0  ;;  %v4071_v30 = vmul.f32 %v4039_v1, %v6944_v52 }
 0x241   : > { %v3935_v31 = vmul.f32 %v6961_v27, %v3710_v7  ;;  %v4115_v50 = vsel %vm448_vm2, %v4070_v14, 0.0  ;;  %v3717_v7 = vld [vmem:[%s6311_s29 + $0xb8] sm:$0xff] }
 0x242   : > { %v3967_v47 = vadd.f32 %v3966_v44, %v3965_v4  ;;  %v4102_v40 = vadd.f32 %v4101_v24, %v4100_v42  ;;  %v3980_v42 = vsel %vm448_vm2, %v3934_v23, 0.0  ;;  %v4072_v24 = vmul.f32 %v4040_v26, %v6961_v27 }
 0x243   : > { %v3936_v44 = vmul.f32 %v6963_v54, %v3711_v15  ;;  %v3982_v21 = vsel %vm448_vm2, %v3935_v31, 0.0  ;;  %v3938_v27 = vmul.f32 %v6982_v5, %v3713_v33  ;;  %v4121_v54 = vsel %vm448_vm2, %v4073_v46, 0.0  ;;  %v3718_v15 = vld [vmem:[%s6311_s29 + $0xc0] sm:$0xff]  ;;  %v3720_v33 = vld [vmem:[%s6311_s29 + $0xd0] sm:$0xff] }
 0x244   : > { %v3969_v56 = vadd.f32 %v3968_v39, %v3967_v47  ;;  %v4104_v58 = vadd.f32 %v4103_v57, %v4102_v40  ;;  %v3714_v57 = vld [vmem:[%s6311_s29 + $0xa0] sm:$0xff]  ;;  %v3872_v47 = vpop.permute.xlu0 %3871  ;;  %v3877_v40 = vpop.permute.xlu1 %3876  ;;  %v4117_v39 = vsel %vm448_vm2, %v4071_v30, 0.0 }
 0x245   : > { %v4044_v35 = vmul.f32 %v3714_v57, %v3714_v57  ;;  %v3988_v34 = vsel %vm448_vm2, %v3938_v27, 0.0  ;;  %v3722_v27 = vld [vmem:[%s6311_s29 + $0xe0] sm:$0xff] }
 0x246   : > { %v3971_v63 = vadd.f32 %v3970_v36, %v3969_v56  ;;  %v4106_v0 = vadd.f32 %v4105_v12, %v4104_v58  ;;  %v3715_v56 = vld [vmem:[%s6311_s29 + $0xa8] sm:$0xff]  ;;  %v4119_v58 = vsel %vm448_vm2, %v4072_v24, 0.0  ;;  %v3984_v12 = vsel %vm448_vm2, %v3936_v44, 0.0  ;;  %v3721_v44 = vld [vmem:[%s6311_s29 + $0xd8] sm:$0xff] }
 0x248   : > { %v3973_v18 = vadd.f32 %v3972_v61, %v3971_v63  ;;  %v4108_v8 = vadd.f32 %v4107_v3, %v4106_v0  ;;  %v3716_v63 = vld [vmem:[%s6311_s29 + $0xb0] sm:$0xff]  ;;  %v4075_v0 = vmul.f32 %v4043_v49, %v6982_v5  ;;  %v3939_v3 = vmul.f32 %v3862_v17, %v3714_v57  ;;  %v3887_v43 = vpop.permute.xlu1 %3886 }
 0x249   : > { %v4045_v61 = vmul.f32 %v3715_v56, %v3715_v56  ;;  %v4046_v2 = vmul.f32 %v3716_v63, %v3716_v63  ;;  %v3941_v5 = vmul.f32 %v3872_v47, %v3716_v63  ;;  %v4051_v49 = vmul.f32 %v3721_v44, %v3721_v44 }
 0x24a   : > { %v3975_v29 = vadd.f32 %v3974_v10, %v3973_v18  ;;  %v4110_v55 = vadd.f32 %v4109_v9, %v4108_v8  ;;  %v3882_v18 = vpop.permute.xlu0 %3881  ;;  %v4123_v8 = vsel %vm448_vm2, %v4074_v53, 0.0  ;;  %v4076_v9 = vmul.f32 %v4044_v35, %v3862_v17  ;;  %v3719_v17 = vld [vmem:[%s6311_s29 + $0xc8] sm:$0xff] }
 0x24b   : > { %v3940_v10 = vmul.f32 %v6999_v38, %v3715_v56  ;;  %v3994_v32 = vsel %vm448_vm2, %v3941_v5, 0.0  ;;  %v4049_v24 = vmul.f32 %v3719_v17, %v3719_v17 }
 0x24c   : > { %v3977_v22 = vadd.f32 %v3976_v20, %v3975_v29  ;;  %v4112_v48 = vadd.f32 %v4111_v19, %v4110_v55  ;;  %v4125_v29 = vsel %vm448_vm2, %v4075_v0, 0.0  ;;  %v3990_v55 = vsel %vm448_vm2, %v3939_v3, 0.0 }
 0x24d   : > { %v4077_v19 = vmul.f32 %v4045_v61, %v6999_v38  ;;  %v4047_v20 = vmul.f32 %v3717_v7, %v3717_v7  ;;  %v4127_v41 = vsel %vm448_vm2, %v4076_v9, 0.0  ;;  %v4052_v0 = vmul.f32 %v3722_v27, %v3722_v27 }
 0x24e   : > { %v3979_v16 = vadd.f32 %v3978_v25, %v3977_v22  ;;  %v4114_v4 = vadd.f32 %v4113_v13, %v4112_v48  ;;  %v3942_v25 = vmul.f32 %v3877_v40, %v3717_v7  ;;  %v3992_v22 = vsel %vm448_vm2, %v3940_v10, 0.0 }
 0x24f   : > { %v4078_v48 = vmul.f32 %v4046_v2, %v3872_v47  ;;  %v4048_v13 = vmul.f32 %v3718_v15, %v3718_v15  ;;  %v4129_v38 = vsel %vm448_vm2, %v4077_v19, 0.0  ;;  %v3944_v47 = vmul.f32 %v3887_v43, %v3719_v17  ;;  %v3725_v2 = vld [vmem:[%s6311_s29 + $0xf8] sm:$0xff] }
 0x250   : > { %v3981_v52 = vadd.f32 %v3980_v42, %v3979_v16  ;;  %v4116_v28 = vadd.f32 %v4115_v50, %v4114_v4  ;;  %v3892_v50 = vpop.permute.xlu0 %3891  ;;  %v3897_v16 = vpop.permute.xlu1 %3896  ;;  %v4079_v4 = vmul.f32 %v4047_v20, %v3877_v40  ;;  %v3943_v42 = vmul.f32 %v3882_v18, %v3718_v15 }
 0x251   : > { %v3996_v57 = vsel %vm448_vm2, %v3942_v25, 0.0  ;;  %v3945_v56 = vmul.f32 %v3892_v50, %v3720_v33  ;;  %v3946_v53 = vmul.f32 %v3897_v16, %v3721_v44  ;;  %v4000_v63 = vsel %vm448_vm2, %v3944_v47, 0.0 }
 0x252   : > { %v3983_v51 = vadd.f32 %v3982_v21, %v3981_v52  ;;  %v4118_v36 = vadd.f32 %v4117_v39, %v4116_v28  ;;  %v4131_v52 = vsel %vm448_vm2, %v4078_v48, 0.0  ;;  %v4080_v28 = vmul.f32 %v4048_v13, %v3882_v18 }
 0x253   : > { %v4050_v39 = vmul.f32 %v3720_v33, %v3720_v33  ;;  %v3998_v40 = vsel %vm448_vm2, %v3943_v42, 0.0  ;;  %v4002_v7 = vsel %vm448_vm2, %v3945_v56, 0.0  ;;  %v4004_v10 = vsel %vm448_vm2, %v3946_v53, 0.0  ;;  %v3758_v56 = vld [vmem:[#allocation3] sm:$0x1] }
 0x254   : > { %v3985_v59 = vadd.f32 %v3984_v12, %v3983_v51  ;;  %v4120_v62 = vadd.f32 %v4119_v58, %v4118_v36  ;;  %v4133_v51 = vsel %vm448_vm2, %v4079_v4, 0.0  ;;  %v4081_v36 = vmul.f32 %v4049_v24, %v3887_v43  ;;  %v3902_v35 = vpop.permute.xlu0 %3901  ;;  %v4023_v53 = vld [vmem:[#allocation4] sm:$0x1] }
 0x255   : > { %v3947_v18 = vmul.f32 %v3902_v35, %v3722_v27 }
 0x256   : > { %v3987_v37 = vadd.f32 %v3986_v60, %v3985_v59  ;;  %v4122_v6 = vadd.f32 %v4121_v54, %v4120_v62  ;;  %v3907_v60 = vpop.permute.xlu1 %3906  ;;  %v3723_v59 = vld [vmem:[%s6311_s29 + $0xe8] sm:$0xff]  ;;  %v4135_v62 = vsel %vm448_vm2, %v4080_v28, 0.0  ;;  %v4082_v54 = vmul.f32 %v4050_v39, %v3892_v50 }
 0x257   : > { %v4053_v43 = vmul.f32 %v3723_v59, %v3723_v59  ;;  %v3948_v5 = vmul.f32 %v3907_v60, %v3723_v59 }
 0x258   : > { %v3989_v1 = vadd.f32 %v3988_v34, %v3987_v37  ;;  %v4124_v14 = vadd.f32 %v4123_v8, %v4122_v6  ;;  %v4083_v34 = vmul.f32 %v4051_v49, %v3897_v16  ;;  %v3724_v37 = vld [vmem:[%s6311_s29 + $0xf0] sm:$0xff]  ;;  %v4137_v6 = vsel %vm448_vm2, %v4081_v36, 0.0  ;;  %v3912_v20 = vpop.permute.xlu0 %3911 }
 0x259   : > { %v4054_v15 = vmul.f32 %v3724_v37, %v3724_v37  ;;  %v4085_v25 = vmul.f32 %v4053_v43, %v3907_v60  ;;  %v3949_v17 = vmul.f32 %v3912_v20, %v3724_v37 }
 0x25a   : > { %v3991_v23 = vadd.f32 %v3990_v55, %v3989_v1  ;;  %v4126_v26 = vadd.f32 %v4125_v29, %v4124_v14  ;;  %v4139_v1 = vsel %vm448_vm2, %v4082_v54, 0.0  ;;  %v4084_v14 = vmul.f32 %v4052_v0, %v3902_v35 }
 0x25b   : > { %v4141_v19 = vsel %vm448_vm2, %v4083_v34, 0.0  ;;  %v4145_v16 = vsel %vm448_vm2, %v4085_v25, 0.0 }
 0x25c   : > { %v4128_v30 = vadd.f32 %v4127_v41, %v4126_v26  ;;  %v3993_v31 = vadd.f32 %v3992_v22, %v3991_v23  ;;  %v3917_v23 = vpop.permute.xlu1 %3916  ;;  %v4006_v26 = vsel %vm448_vm2, %v3947_v18, 0.0  ;;  %v4055_v41 = vmul.f32 %v3725_v2, %v3725_v2 }
 0x25d   : > { %v4143_v13 = vsel %vm448_vm2, %v4084_v14, 0.0 }
 0x25e   : > { %v4130_v11 = vadd.f32 %v4129_v38, %v4128_v30  ;;  %v3995_v45 = vadd.f32 %v3994_v32, %v3993_v31  ;;  %v4008_v30 = vsel %vm448_vm2, %v3948_v5, 0.0  ;;  %v4086_v31 = vmul.f32 %v4054_v15, %v3912_v20 }
 0x25f   : > { %v3950_v32 = vmul.f32 %v3917_v23, %v3725_v2  ;;  %v4010_v38 = vsel %vm448_vm2, %v3949_v17, 0.0  ;;  %v4087_v4 = vmul.f32 %v4055_v41, %v3917_v23 }
 0x260   : > { %v4132_v21 = vadd.f32 %v4131_v52, %v4130_v11  ;;  %v3997_v46 = vadd.f32 %v3996_v57, %v3995_v45  ;;  %v4147_v44 = vsel %vm448_vm2, %v4086_v31, 0.0 }
 0x261   : > { %v4012_v11 = vsel %vm448_vm2, %v3950_v32, 0.0  ;;  %v4149_v52 = vsel %vm448_vm2, %v4087_v4, 0.0 }
 0x262   : > { %v4134_v58 = vadd.f32 %v4133_v51, %v4132_v21  ;;  %v3999_v12 = vadd.f32 %v3998_v40, %v3997_v46 }
 0x264   : > { %v4136_v3 = vadd.f32 %v4135_v62, %v4134_v58  ;;  %v4001_v61 = vadd.f32 %v4000_v63, %v3999_v12 }
 0x266   : > { %v4138_v8 = vadd.f32 %v4137_v6, %v4136_v3  ;;  %v4003_v9 = vadd.f32 %v4002_v7, %v4001_v61 }
 0x268   : > { %v4140_v29 = vadd.f32 %v4139_v1, %v4138_v8  ;;  %v4005_v55 = vadd.f32 %v4004_v10, %v4003_v9 }
 0x26a   : > { %v4142_v22 = vadd.f32 %v4141_v19, %v4140_v29  ;;  %v4007_v48 = vadd.f32 %v4006_v26, %v4005_v55 }
 0x26c   : > { %v4144_v50 = vadd.f32 %v4143_v13, %v4142_v22  ;;  %v4009_v33 = vadd.f32 %v4008_v30, %v4007_v48 }
 0x26e   : > { %v4146_v42 = vadd.f32 %v4145_v16, %v4144_v50  ;;  %v4011_v24 = vadd.f32 %v4010_v38, %v4009_v33 }
 0x270   : > { %v4148_v45 = vadd.f32 %v4147_v44, %v4146_v42  ;;  %v4013_v57 = vadd.f32 %v4012_v11, %v4011_v24 }
 0x272   : > { %v4014_v28 = vrot.slane %v4013_v57, 4  ;;  %v4150_v47 = vadd.f32 %v4149_v52, %v4148_v45 }
 0x274   : > { %v4015_v39 = vadd.f32 %v4014_v28, %v4013_v57  ;;  %v4151_v21 = vrot.slane %v4150_v47, 4 }
 0x276   : > { %v4016_v46 = vrot.slane %v4015_v39, 2  ;;  %v4152_v49 = vadd.f32 %v4151_v21, %v4150_v47 }
 0x278   : > { %v4017_v27 = vadd.f32 %v4016_v46, %v4015_v39  ;;  %v4153_v51 = vrot.slane %v4152_v49, 2 }
 0x27a   : > { %v4018_v40 = vrot.slane %v4017_v27, 1  ;;  %v4154_v36 = vadd.f32 %v4153_v51, %v4152_v49 }
 0x27c   : > { %v4019_v58 = vadd.f32 %v4018_v40, %v4017_v27  ;;  %v4155_v12 = vrot.slane %v4154_v36, 1 }
 0x27e   : > { %v4020_v35 = vadd.f32 %v4019_v58, %v3758_v56  ;;  %v4156_v60 = vadd.f32 %v4155_v12, %v4154_v36 }
 0x280   : > { %4022 = vst.msk [vmem:[#allocation3] sm:$0x1] %vm4021_vm5, %v4020_v35  ;;  %v4157_v59 = vadd.f32 %v4156_v60, %v4023_v53 }
 0x282   : > { %4158 = vst.msk [vmem:[#allocation4] sm:$0x1] %vm4021_vm5, %v4157_v59 }
 0x283 PF: > { %p4826_p10 = scmp.ne.s32.totalorder %s5743_s16, 1 }
 0x284   : > { %p4827_p11 = scmp.ne.s32.totalorder (!%p4826_p10), %s5739_s15, 0 }
 0x285   : > { %4162 = sbr.rel (%p4826_p10) target bundleno = 710 (0x2c6), region = 48 }
 0x28c   : > { %4166 = sbr.rel (%p4827_p11) target bundleno = 675 (0x2a3), region = 52  ;;  %v4167_v62 = vld [vmem:[#allocation3] sm:$0x1] (!%p4827_p11)  ;;  %v4169_v63 = vld [vmem:[#allocation4] sm:$0x1] (!%p4827_p11)  ;;  %vm4174_vm6 = vcmask (!%p4827_p11), 24576  }
 0x28d   : > { %v4168_v54 = vmul.f32 (!%p4827_p11), 0.00390625, %v4167_v62  ;;  %v4170_v0 = vmul.f32 (!%p4827_p11), 0.00390625, %v4169_v63 }
 0x28f   : > { %v4171_v3 = vmul.f32 (!%p4827_p11), %v4168_v54, %v4168_v54  ;;  %4175 = vst.msk [vmem:[#allocation5] sm:$0x1] (!%p4827_p11), %vm4174_vm6, %v4168_v54 }
 0x291   : > { %v4172_v61 = vsub.f32 (!%p4827_p11), %v4170_v0, %v4171_v3 }
 0x293   : > { %v4173_v34 = vmax.f32 %v4172_v61, 0.0 }
 0x295   : > { %v4176_v37 = vadd.f32 1e-05, %v4173_v34 }
 0x297   : > { %5707 = vrsqrt.f32 %v4176_v37 }
 0x2a1   : > { %v5708_v6 = vpop.eup %5707 }
 0x2a2   : > { %4178 = vst.msk [vmem:[#allocation6] sm:$0x1] %vm4174_vm6, %v5708_v6 }
 0x2a3 PF: > { %s4828_s16 = sshll.u32 %s5739_s15, 8  ;;  %v4291_v8 = vld [vmem:[%s5848_s10] sm:$0xff]  ;;  %v4292_v14 = vld [vmem:[%s5848_s10 + $0x8] sm:$0xff]  ;;  %vm4355_vm7 = vcmask 31744   ;;  %v4293_v55 = vld [vmem:[%s5848_s10 + $0x10] sm:$0xff] }
 0x2a4   : > { %s7073_s27 = scalar_lea.vmem [#allocation2], %s4828_s16  ;;  %v4294_v22 = vld [vmem:[%s5848_s10 + $0x18] sm:$0xff]  ;;  %v4295_v48 = vld [vmem:[%s5848_s10 + $0x20] sm:$0xff]  ;;  %v4296_v50 = vld [vmem:[%s5848_s10 + $0x28] sm:$0xff] }
 0x2a5   : > { %v4181_v43 = vld [vmem:[%s7073_s27] sm:$0xff]  ;;  %v4182_v9 = vld [vmem:[%s7073_s27 + $0x8] sm:$0xff]  ;;  %v4183_v10 = vld [vmem:[%s7073_s27 + $0x10] sm:$0xff] }
 0x2a6   : > { %v7069_v7 = vld [vmem:[#allocation5] ss:$0 sm:$0xff]  ;;  %v4184_v15 = vld [vmem:[%s7073_s27 + $0x18] sm:$0xff]  ;;  %v4186_v23 = vld [vmem:[%s7073_s27 + $0x28] sm:$0xff] }
 0x2a7   : > { %v4220_v2 = vsub.f32 %v4181_v43, %v7069_v7  ;;  %v4221_v1 = vsub.f32 %v4182_v9, %v7069_v7  ;;  %v4222_v5 = vsub.f32 %v4183_v10, %v7069_v7  ;;  %v4185_v29 = vld [vmem:[%s7073_s27 + $0x20] sm:$0xff]  ;;  %v4223_v19 = vsub.f32 %v4184_v15, %v7069_v7  ;;  %v4187_v26 = vld [vmem:[%s7073_s27 + $0x30] sm:$0xff]  ;;  %v4188_v30 = vld [vmem:[%s7073_s27 + $0x38] sm:$0xff] }
 0x2a8   : > { %v4224_v20 = vsub.f32 %v4185_v29, %v7069_v7  ;;  %v4225_v13 = vsub.f32 %v4186_v23, %v7069_v7  ;;  %v4226_v33 = vsub.f32 %v4187_v26, %v7069_v7  ;;  %v4227_v16 = vsub.f32 %v4188_v30, %v7069_v7  ;;  %v4189_v38 = vld [vmem:[%s7073_s27 + $0x40] sm:$0xff]  ;;  %v4190_v4 = vld [vmem:[%s7073_s27 + $0x48] sm:$0xff]  ;;  %v4297_v45 = vld [vmem:[%s5848_s10 + $0x30] sm:$0xff] }
 0x2a9   : > { %v7071_v18 = vld [vmem:[#allocation6] ss:$0 sm:$0xff]  ;;  %v4298_v57 = vld [vmem:[%s5848_s10 + $0x38] sm:$0xff]  ;;  %v4191_v52 = vld [vmem:[%s7073_s27 + $0x50] sm:$0xff]  ;;  %v4228_v51 = vsub.f32 %v4189_v38, %v7069_v7  ;;  %v4229_v36 = vsub.f32 %v4190_v4, %v7069_v7 }
 0x2aa   : > { %v4259_v25 = vmul.f32 %v7071_v18, %v4220_v2  ;;  %v4260_v17 = vmul.f32 %v7071_v18, %v4221_v1  ;;  %v4261_v41 = vmul.f32 %v7071_v18, %v4222_v5  ;;  %v4262_v31 = vmul.f32 %v7071_v18, %v4223_v19  ;;  %v4192_v46 = vld [vmem:[%s7073_s27 + $0x58] sm:$0xff]  ;;  %v4193_v49 = vld [vmem:[%s7073_s27 + $0x60] sm:$0xff]  ;;  %v4300_v56 = vld [vmem:[%s5848_s10 + $0x48] sm:$0xff] }
 0x2ab   : > { %v4263_v32 = vmul.f32 %v7071_v18, %v4224_v20  ;;  %v4264_v11 = vmul.f32 %v7071_v18, %v4225_v13  ;;  %v4265_v39 = vmul.f32 %v7071_v18, %v4226_v33  ;;  %v4266_v21 = vmul.f32 %v7071_v18, %v4227_v16  ;;  %v4299_v40 = vld [vmem:[%s5848_s10 + $0x40] sm:$0xff]  ;;  %v4194_v12 = vld [vmem:[%s7073_s27 + $0x68] sm:$0xff]  ;;  %v4301_v60 = vld [vmem:[%s5848_s10 + $0x50] sm:$0xff] }
 0x2ac   : > { %v4323_v42 = vadd.f32 %v4291_v8, %v4259_v25  ;;  %v4324_v24 = vadd.f32 %v4292_v14, %v4260_v17  ;;  %v4325_v44 = vadd.f32 %v4293_v55, %v4261_v41  ;;  %v4326_v28 = vadd.f32 %v4294_v22, %v4262_v31  ;;  %v4195_v63 = vld [vmem:[%s7073_s27 + $0x70] sm:$0xff]  ;;  %v4196_v54 = vld [vmem:[%s7073_s27 + $0x78] sm:$0xff]  ;;  %v4303_v37 = vld [vmem:[%s5848_s10 + $0x60] sm:$0xff] }
 0x2ad   : > { %v4327_v47 = vadd.f32 %v4295_v48, %v4263_v32  ;;  %v4328_v27 = vadd.f32 %v4296_v50, %v4264_v11  ;;  %v4230_v58 = vsub.f32 %v4191_v52, %v7069_v7  ;;  %v4329_v53 = vadd.f32 %v4297_v45, %v4265_v39  ;;  %v4302_v34 = vld [vmem:[%s5848_s10 + $0x58] sm:$0xff]  ;;  %v4304_v43 = vld [vmem:[%s5848_s10 + $0x68] sm:$0xff]  ;;  %v4197_v1 = vld [vmem:[%s7073_s27 + $0x80] sm:$0xff] }
 0x2ae   : > { %4356 = vst.msk [vmem:[%s5853_s13] sm:$0xff] %vm4355_vm7, %v4323_v42  ;;  %4357 = vst.msk [vmem:[%s5853_s13 + $0x8] sm:$0xff] %vm4355_vm7, %v4324_v24  ;;  %v4330_v35 = vadd.f32 %v4298_v57, %v4266_v21  ;;  %v4231_v59 = vsub.f32 %v4192_v46, %v7069_v7  ;;  %v4232_v62 = vsub.f32 %v4193_v49, %v7069_v7  ;;  %v4198_v14 = vld [vmem:[%s7073_s27 + $0x88] sm:$0xff]  ;;  %v4199_v5 = vld [vmem:[%s7073_s27 + $0x90] sm:$0xff] }
 0x2af   : > { %4358 = vst.msk [vmem:[%s5853_s13 + $0x10] sm:$0xff] %vm4355_vm7, %v4325_v44  ;;  %4359 = vst.msk [vmem:[%s5853_s13 + $0x18] sm:$0xff] %vm4355_vm7, %v4326_v28  ;;  %v4267_v0 = vmul.f32 %v7071_v18, %v4228_v51  ;;  %v4268_v3 = vmul.f32 %v7071_v18, %v4229_v36  ;;  %v4269_v61 = vmul.f32 %v7071_v18, %v4230_v58  ;;  %v4305_v20 = vld [vmem:[%s5848_s10 + $0x70] sm:$0xff]  ;;  %v4306_v23 = vld [vmem:[%s5848_s10 + $0x78] sm:$0xff] }
 0x2b0   : > { %4360 = vst.msk [vmem:[%s5853_s13 + $0x20] sm:$0xff] %vm4355_vm7, %v4327_v47  ;;  %4361 = vst.msk [vmem:[%s5853_s13 + $0x28] sm:$0xff] %vm4355_vm7, %v4328_v27  ;;  %v4233_v6 = vsub.f32 %v4194_v12, %v7069_v7  ;;  %v4270_v8 = vmul.f32 %v7071_v18, %v4231_v59  ;;  %v4271_v9 = vmul.f32 %v7071_v18, %v4232_v62  ;;  %v4200_v26 = vld [vmem:[%s7073_s27 + $0x98] sm:$0xff]  ;;  %v4201_v48 = vld [vmem:[%s7073_s27 + $0xa0] sm:$0xff] }
 0x2b1   : > { %4362 = vst.msk [vmem:[%s5853_s13 + $0x30] sm:$0xff] %vm4355_vm7, %v4329_v53  ;;  %4363 = vst.msk [vmem:[%s5853_s13 + $0x38] sm:$0xff] %vm4355_vm7, %v4330_v35  ;;  %v4234_v10 = vsub.f32 %v4195_v63, %v7069_v7  ;;  %v4235_v2 = vsub.f32 %v4196_v54, %v7069_v7  ;;  %v4331_v15 = vadd.f32 %v4299_v40, %v4267_v0  ;;  %v4202_v13 = vld [vmem:[%s7073_s27 + $0xa8] sm:$0xff]  ;;  %v4307_v32 = vld [vmem:[%s5848_s10 + $0x80] sm:$0xff] }
 0x2b2   : > { %v4332_v29 = vadd.f32 %v4300_v56, %v4268_v3  ;;  %v4333_v55 = vadd.f32 %v4301_v60, %v4269_v61  ;;  %v4272_v19 = vmul.f32 %v7071_v18, %v4233_v6  ;;  %v4334_v25 = vadd.f32 %v4302_v34, %v4270_v8  ;;  %v4308_v33 = vld [vmem:[%s5848_s10 + $0x88] sm:$0xff]  ;;  %v4203_v38 = vld [vmem:[%s7073_s27 + $0xb0] sm:$0xff]  ;;  %v4310_v11 = vld [vmem:[%s5848_s10 + $0x98] sm:$0xff] }
 0x2b3   : > { %v4335_v17 = vadd.f32 %v4303_v37, %v4271_v9  ;;  %v4273_v41 = vmul.f32 %v7071_v18, %v4234_v10  ;;  %v4274_v22 = vmul.f32 %v7071_v18, %v4235_v2  ;;  %4364 = vst.msk [vmem:[%s5853_s13 + $0x40] sm:$0xff] %vm4355_vm7, %v4331_v15  ;;  %v4236_v31 = vsub.f32 %v4197_v1, %v7069_v7  ;;  %v4309_v24 = vld [vmem:[%s5848_s10 + $0x90] sm:$0xff]  ;;  %v4204_v57 = vld [vmem:[%s7073_s27 + $0xb8] sm:$0xff]  ;;  %v4311_v39 = vld [vmem:[%s5848_s10 + $0xa0] sm:$0xff] }
 0x2b4   : > { %4365 = vst.msk [vmem:[%s5853_s13 + $0x48] sm:$0xff] %vm4355_vm7, %v4332_v29  ;;  %4366 = vst.msk [vmem:[%s5853_s13 + $0x50] sm:$0xff] %vm4355_vm7, %v4333_v55  ;;  %v4336_v30 = vadd.f32 %v4304_v43, %v4272_v19  ;;  %v4237_v50 = vsub.f32 %v4198_v14, %v7069_v7  ;;  %v4238_v16 = vsub.f32 %v4199_v5, %v7069_v7  ;;  %v4312_v46 = vld [vmem:[%s5848_s10 + $0xa8] sm:$0xff]  ;;  %v4313_v49 = vld [vmem:[%s5848_s10 + $0xb0] sm:$0xff] }
 0x2b5   : > { %4367 = vst.msk [vmem:[%s5853_s13 + $0x58] sm:$0xff] %vm4355_vm7, %v4334_v25  ;;  %4368 = vst.msk [vmem:[%s5853_s13 + $0x60] sm:$0xff] %vm4355_vm7, %v4335_v17  ;;  %v4337_v4 = vadd.f32 %v4305_v20, %v4273_v41  ;;  %v4338_v42 = vadd.f32 %v4306_v23, %v4274_v22  ;;  %v4239_v44 = vsub.f32 %v4200_v26, %v7069_v7  ;;  %v4205_v56 = vld [vmem:[%s7073_s27 + $0xc0] sm:$0xff]  ;;  %v4206_v58 = vld [vmem:[%s7073_s27 + $0xc8] sm:$0xff] }
 0x2b6   : > { %v4240_v45 = vsub.f32 %v4201_v48, %v7069_v7  ;;  %4369 = vst.msk [vmem:[%s5853_s13 + $0x68] sm:$0xff] %vm4355_vm7, %v4336_v30  ;;  %v4275_v52 = vmul.f32 %v7071_v18, %v4236_v31  ;;  %v4276_v28 = vmul.f32 %v7071_v18, %v4237_v50  ;;  %v4277_v47 = vmul.f32 %v7071_v18, %v4238_v16  ;;  %v4207_v12 = vld [vmem:[%s7073_s27 + $0xd0] sm:$0xff]  ;;  %v4314_v62 = vld [vmem:[%s5848_s10 + $0xb8] sm:$0xff]  ;;  %v4209_v54 = vld [vmem:[%s7073_s27 + $0xe0] sm:$0xff] }
 0x2b7   : > { %v4241_v21 = vsub.f32 %v4202_v13, %v7069_v7  ;;  %4370 = vst.msk [vmem:[%s5853_s13 + $0x70] sm:$0xff] %vm4355_vm7, %v4337_v4  ;;  %4371 = vst.msk [vmem:[%s5853_s13 + $0x78] sm:$0xff] %vm4355_vm7, %v4338_v42  ;;  %v4278_v27 = vmul.f32 %v7071_v18, %v4239_v44  ;;  %v4242_v40 = vsub.f32 %v4203_v38, %v7069_v7  ;;  %v4208_v63 = vld [vmem:[%s7073_s27 + $0xd8] sm:$0xff]  ;;  %v4210_v37 = vld [vmem:[%s7073_s27 + $0xe8] sm:$0xff] }
 0x2b8   : > { %v4279_v51 = vmul.f32 %v7071_v18, %v4240_v45  ;;  %v4243_v36 = vsub.f32 %v4204_v57, %v7069_v7  ;;  %v4339_v53 = vadd.f32 %v4307_v32, %v4275_v52  ;;  %v4340_v35 = vadd.f32 %v4308_v33, %v4276_v28  ;;  %v4211_v10 = vld [vmem:[%s7073_s27 + $0xf0] sm:$0xff]  ;;  %v4212_v2 = vld [vmem:[%s7073_s27 + $0xf8] sm:$0xff]  ;;  %v4315_v5 = vld [vmem:[%s5848_s10 + $0xc0] sm:$0xff] }
 0x2b9   : > { %v4341_v60 = vadd.f32 %v4309_v24, %v4277_v47  ;;  %v4280_v59 = vmul.f32 %v7071_v18, %v4241_v21  ;;  %v4342_v0 = vadd.f32 %v4310_v11, %v4278_v27  ;;  %v4281_v61 = vmul.f32 %v7071_v18, %v4242_v40  ;;  %v4316_v15 = vld [vmem:[%s5848_s10 + $0xc8] sm:$0xff]  ;;  %v4317_v29 = vld [vmem:[%s5848_s10 + $0xd0] sm:$0xff]  ;;  %v4318_v25 = vld [vmem:[%s5848_s10 + $0xd8] sm:$0xff] }
 0x2ba   : > { %v4343_v3 = vadd.f32 %v4311_v39, %v4279_v51  ;;  %v4282_v34 = vmul.f32 %v7071_v18, %v4243_v36  ;;  %4372 = vst.msk [vmem:[%s5853_s13 + $0x80] sm:$0xff] %vm4355_vm7, %v4339_v53  ;;  %4373 = vst.msk [vmem:[%s5853_s13 + $0x88] sm:$0xff] %vm4355_vm7, %v4340_v35  ;;  %v4244_v43 = vsub.f32 %v4205_v56, %v7069_v7  ;;  %v4319_v17 = vld [vmem:[%s5848_s10 + $0xe0] sm:$0xff]  ;;  %v4320_v13 = vld [vmem:[%s5848_s10 + $0xe8] sm:$0xff] }
 0x2bb   : > { %4374 = vst.msk [vmem:[%s5853_s13 + $0x90] sm:$0xff] %vm4355_vm7, %v4341_v60  ;;  %v4344_v6 = vadd.f32 %v4312_v46, %v4280_v59  ;;  %v4245_v8 = vsub.f32 %v4206_v58, %v7069_v7  ;;  %v4246_v9 = vsub.f32 %v4207_v12, %v7069_v7  ;;  %4375 = vst.msk [vmem:[%s5853_s13 + $0x98] sm:$0xff] %vm4355_vm7, %v4342_v0  ;;  %v4321_v38 = vld [vmem:[%s5848_s10 + $0xf0] sm:$0xff]  ;;  %v4322_v4 = vld [vmem:[%s5848_s10 + $0xf8] sm:$0xff] }
 0x2bc   : > { %4376 = vst.msk [vmem:[%s5853_s13 + $0xa0] sm:$0xff] %vm4355_vm7, %v4343_v3  ;;  %v4345_v1 = vadd.f32 %v4313_v49, %v4281_v61  ;;  %v4346_v14 = vadd.f32 %v4314_v62, %v4282_v34  ;;  %v4247_v55 = vsub.f32 %v4208_v63, %v7069_v7  ;;  %v4248_v19 = vsub.f32 %v4209_v54, %v7069_v7 }
 0x2bd   : > { %4377 = vst.msk [vmem:[%s5853_s13 + $0xa8] sm:$0xff] %vm4355_vm7, %v4344_v6  ;;  %v4283_v20 = vmul.f32 %v7071_v18, %v4244_v43  ;;  %v4284_v23 = vmul.f32 %v7071_v18, %v4245_v8  ;;  %v4285_v26 = vmul.f32 %v7071_v18, %v4246_v9  ;;  %v4249_v41 = vsub.f32 %v4210_v37, %v7069_v7 }
 0x2be   : > { %4378 = vst.msk [vmem:[%s5853_s13 + $0xb0] sm:$0xff] %vm4355_vm7, %v4345_v1  ;;  %4379 = vst.msk [vmem:[%s5853_s13 + $0xb8] sm:$0xff] %vm4355_vm7, %v4346_v14  ;;  %v4286_v22 = vmul.f32 %v7071_v18, %v4247_v55  ;;  %v4287_v48 = vmul.f32 %v7071_v18, %v4248_v19  ;;  %v4250_v30 = vsub.f32 %v4211_v10, %v7069_v7 }
 0x2bf   : > { %v4251_v31 = vsub.f32 %v4212_v2, %v7069_v7  ;;  %v4347_v32 = vadd.f32 %v4315_v5, %v4283_v20  ;;  %v4348_v50 = vadd.f32 %v4316_v15, %v4284_v23  ;;  %v4349_v33 = vadd.f32 %v4317_v29, %v4285_v26 }
 0x2c0   : > { %v4288_v16 = vmul.f32 %v7071_v18, %v4249_v41  ;;  %v4350_v42 = vadd.f32 %v4318_v25, %v4286_v22  ;;  %v4351_v24 = vadd.f32 %v4319_v17, %v4287_v48  ;;  %v4289_v44 = vmul.f32 %v7071_v18, %v4250_v30 }
 0x2c1   : > { %v4290_v11 = vmul.f32 %v7071_v18, %v4251_v31  ;;  %4380 = vst.msk [vmem:[%s5853_s13 + $0xc0] sm:$0xff] %vm4355_vm7, %v4347_v32  ;;  %4381 = vst.msk [vmem:[%s5853_s13 + $0xc8] sm:$0xff] %vm4355_vm7, %v4348_v50 }
 0x2c2   : > { %4382 = vst.msk [vmem:[%s5853_s13 + $0xd0] sm:$0xff] %vm4355_vm7, %v4349_v33  ;;  %v4352_v7 = vadd.f32 %v4320_v13, %v4288_v16  ;;  %4383 = vst.msk [vmem:[%s5853_s13 + $0xd8] sm:$0xff] %vm4355_vm7, %v4350_v42  ;;  %v4353_v45 = vadd.f32 %v4321_v38, %v4289_v44 }
 0x2c3   : > { %4384 = vst.msk [vmem:[%s5853_s13 + $0xe0] sm:$0xff] %vm4355_vm7, %v4351_v24  ;;  %v4354_v57 = vadd.f32 %v4322_v4, %v4290_v11 }
 0x2c4   : > { %4385 = vst.msk [vmem:[%s5853_s13 + $0xe8] sm:$0xff] %vm4355_vm7, %v4352_v7  ;;  %4386 = vst.msk [vmem:[%s5853_s13 + $0xf0] sm:$0xff] %vm4355_vm7, %v4353_v45 }
 0x2c5   : > { %4387 = vst.msk [vmem:[%s5853_s13 + $0xf8] sm:$0xff] %vm4355_vm7, %v4354_v57 }
 0x2c6 PF: > { %s14_s21 = sadd.s32 1, %s5763_s21   ;;  %s7293_s15 = smov %s5751_s18 }
 0x2c7   : > { %p11_p12 = scmp.ge.s32.totalorder %s14_s21, 10   ;;  %s7294_s16 = smov %s5755_s19 }
 0x2c8   : > { %s7295_s17 = smov %s5759_s20  ;;  %s7296_s18 = smov %s7300_s22 }
 0x2c9   : > { %s7297_s19 = smov %s7304_s23  ;;  %s7298_s20 = smov %s7308_s24 }
 0x2ca   :  { %13 = sbr.rel (!%p11_p12) target bundleno = 4 (0x4), region = 98 }

</bundles_post_ra>
